<compile_context>
chip_gen: v6e
topology: v6e:2x2x1
jax: 0.10.0
libtpu: 0.0.40
codegen_flags: <defaults>
</compile_context>

<pallas_src>
import functools

import jax
import jax.numpy as jnp
from jax import lax
from jax.experimental import pallas as pl
from jax.experimental.pallas import tpu as pltpu

GEM_P = 3.0      # GeM(p=3.0, freeze_p=True)
GEM_EPS = 1e-6   # GeM eps
BN_EPS = 1e-5    # nn.BatchNorm1d default eps


def _bn_eval(x, params):
  """Eval-mode BatchNorm1d. params: [4, C] = (gamma, beta, mean, var)."""
  gamma = params[0:1, :]
  beta = params[1:2, :]
  mean = params[2:3, :]
  var = params[3:4, :]
  return (x - mean) * lax.rsqrt(var + BN_EPS) * gamma + beta


def _gem_sum_cubes(x_ref, acc_ref, chunk):
  """acc_ref[b, c] = sum_hw clamp(x_ref[b, hw, c], eps)^3, accumulated chunk-wise.

  x_ref: [TB, HW, C] (channels-last, so C is the dense lane axis);
  acc_ref: [TB, C] f32 VMEM scratch.  Chunking over HW bounds the size of the
  live f32 temporaries (clamped / cubed values) instead of materializing the
  whole block in f32.
  """
  hw = x_ref.shape[1]
  assert hw % chunk == 0, (hw, chunk)
  n_chunks = hw // chunk

  def one_chunk(start):
    v = x_ref[:, pl.ds(start, chunk), :]
    # Clamp in the native dtype (bf16 VALU on v6e/v7x), then upcast; cube and
    # accumulate in f32 for accuracy.  p=3 is an integer power -> exact cube.
    vc = jnp.maximum(v, GEM_EPS).astype(jnp.float32)
    return jnp.sum(vc * vc * vc, axis=1)          # cross-sublane reduce -> [TB, C]

  acc_ref[...] = one_chunk(0)
  if n_chunks > 1:
    def body(i, carry):
      start = pl.multiple_of(i * chunk, chunk)
      acc_ref[...] += one_chunk(start)
      return carry
    lax.fori_loop(1, n_chunks, body, 0)


def _head_kernel(x3_ref, x4_ref, bn_ref, out_ref, acc3_ref, acc4_ref,
                 *, c4, hw3_chunk, hw4_chunk):
  # x3_ref: [TB, HW3, C3]  layer3 features, channels-last
  # x4_ref: [TB, HW4, C4]  layer4 features, channels-last
  # bn_ref: [4, C4 + C3]   packed (bottleneck | bottleneck_sub3) params
  # out_ref:[TB, C4 + C3]  cat(feat, sub_bn3)
  _gem_sum_cubes(x3_ref, acc3_ref, hw3_chunk)     # gap_sub3(x)
  _gem_sum_cubes(x4_ref, acc4_ref, hw4_chunk)     # gap(x4)

  inv3 = 1.0 / x3_ref.shape[1]
  inv4 = 1.0 / x4_ref.shape[1]
  # Final (mean)^(1/p) via exp/log only on the tiny pooled [TB, C] (EUP slot).
  # mean >= eps^3 > 0 by construction, so log is safe.
  g3 = jnp.exp(jnp.log(acc3_ref[...] * inv3) * (1.0 / GEM_P))
  gm = jnp.exp(jnp.log(acc4_ref[...] * inv4) * (1.0 / GEM_P))

  bn = bn_ref[...]
  feat = _bn_eval(gm, bn[:, :c4])                 # bottleneck (neck='bnneck')
  sub3 = _bn_eval(g3, bn[:, c4:])                 # bottleneck_sub3

  # neck_feat == 'after': cat(feat, sub_bn3) written as two static lane slices.
  out_ref[:, :c4] = feat.astype(out_ref.dtype)
  out_ref[:, c4:] = sub3.astype(out_ref.dtype)


def _round_up(x, m):
  return -(-x // m) * m


def _vmem_capacity_bytes(default=64 << 20):
  """Physical VMEM of the local chip; conservative 64 MiB (v7x) fallback."""
  try:
    info = pltpu.get_tpu_info()
    cap = getattr(info, "vmem_capacity_bytes", None)
    if cap:
      return int(cap)
  except Exception:
    pass
  return default


def _pick_hw_chunk(hw, target=128):
  """Largest chunk <= target that divides hw; prefer sublane-aligned (x8)."""
  if hw <= target:
    return hw
  for c in range(target, 7, -1):
    if hw % c == 0 and c % 8 == 0:
      return c
  for c in range(target, 15, -1):
    if hw % c == 0:
      return c
  return hw


def _pick_batch_tile(b, bytes_per_row, budget_bytes, max_tile):
  """Largest multiple-of-8 tile fitting the VMEM budget, with enough grid steps."""
  tb = budget_bytes // max(int(bytes_per_row), 1)
  tb = max(8, min((int(tb) // 8) * 8, max_tile))
  # Keep >= ~8 grid steps when possible so v7x megacore sharding still leaves
  # >= 4 double-buffered steps per TensorCore (never shrink below 8 rows).
  while tb > 8 and -(-b // tb) < 8:
    tb -= 8
  return tb


def backbone_layer34_head(x3_nchw, x4_nchw, bn3, bnm,
                          *, max_batch_tile=64, hw_chunk_target=128):
  """Eval-mode head of Backbone_layer34.

  x3_nchw: [B, C3, H, W]   layer3 feature map (bf16 or f32)
  x4_nchw: [B, C4, H4, W4] layer4 feature map
  bn3:     [4, C3]  bottleneck_sub3 params (gamma, beta, running_mean, running_var)
  bnm:     [4, C4]  bottleneck params
  returns: [B, C4 + C3] = cat(feat, sub_bn3), in the feature dtype.
  """
  B, C3, H3, W3 = x3_nchw.shape
  _, C4, H4, W4 = x4_nchw.shape
  HW3, HW4 = H3 * W3, H4 * W4
  out_dtype = x4_nchw.dtype

  # Channels-last so C (multiple of 128 in real use) is the lane axis.
  x3_cl = jnp.transpose(x3_nchw, (0, 2, 3, 1)).reshape(B, HW3, C3)
  x4_cl = jnp.transpose(x4_nchw, (0, 2, 3, 1)).reshape(B, HW4, C4)

  # One packed parameter stream, column order matches the output layout.
  bn_packed = jnp.concatenate([bnm, bn3], axis=1).astype(jnp.float32)  # [4, C4+C3]

  chunk3 = _pick_hw_chunk(HW3, hw_chunk_target)
  chunk4 = _pick_hw_chunk(HW4, hw_chunk_target)

  # Per-batch-row VMEM estimate: double-buffered inputs + live f32 chunk temps
  # + f32 accumulators + double-buffered output.
  in_bytes = jnp.dtype(x3_nchw.dtype).itemsize
  out_bytes = jnp.dtype(out_dtype).itemsize
  per_row = (2 * (HW3 * C3 + HW4 * C4) * in_bytes
             + 3 * 4 * max(chunk3 * C3, chunk4 * C4)
             + 4 * (C3 + C4)
             + 2 * (C3 + C4) * out_bytes)

  vmem_cap = _vmem_capacity_bytes()
  budget = int(vmem_cap * 0.55)
  tb = _pick_batch_tile(B, per_row, budget, max_batch_tile)

  # Pad the batch to a multiple of the tile (robust for any B, keeps pipelining);
  # padded rows are sliced off below.
  b_pad = _round_up(max(B, tb), tb)
  if b_pad != B:
    x3_cl = jnp.pad(x3_cl, ((0, b_pad - B), (0, 0), (0, 0)))
    x4_cl = jnp.pad(x4_cl, ((0, b_pad - B), (0, 0), (0, 0)))
  grid = (b_pad // tb,)

  needed = per_row * tb + 4 * 4 * (C3 + C4) + (1 << 20)
  vmem_limit = int(min(vmem_cap, max(32 << 20, needed + (16 << 20))))

  kernel = functools.partial(_head_kernel, c4=C4,
                             hw3_chunk=chunk3, hw4_chunk=chunk4)

  call = pl.pallas_call(
      kernel,
      out_shape=jax.ShapeDtypeStruct((b_pad, C4 + C3), out_dtype),
      grid_spec=pltpu.PrefetchScalarGridSpec(
          num_scalar_prefetch=0,
          grid=grid,
          in_specs=[
              pl.BlockSpec((tb, HW3, C3), lambda i: (i, 0, 0)),
              pl.BlockSpec((tb, HW4, C4), lambda i: (i, 0, 0)),
              pl.BlockSpec((4, C4 + C3), lambda i: (0, 0)),
          ],
          out_specs=pl.BlockSpec((tb, C4 + C3), lambda i: (i, 0)),
          scratch_shapes=[
              pltpu.VMEM((tb, C3), jnp.float32),   # sum-of-cubes acc, layer3
              pltpu.VMEM((tb, C4), jnp.float32),   # sum-of-cubes acc, layer4
          ],
      ),
      compiler_params=pltpu.CompilerParams(
          # Batch tiles are independent -> megacore sharding on v7x (no-op on
          # v5e/v6e) and auto double-buffered DMA/compute overlap.
          dimension_semantics=("parallel",),
          vmem_limit_bytes=vmem_limit,
      ),
  )
  out = call(x3_cl, x4_cl, bn_packed)
  return out[:B]


if __name__ == "__main__":
  key = jax.random.PRNGKey(0)
  # Small stand-ins for resnet50 layer3 (1024ch) / layer4 (2048ch) features.
  # Channels kept as multiples of 128 so the lane-dense layout is exercised;
  # layer3 HW=256 > chunk target so the chunked-accumulation loop runs too.
  B, C3, H3, W3 = 2, 128, 16, 16
  C4, H4, W4 = 256, 8, 8

  k1, k2, k3, k4 = jax.random.split(key, 4)
  x3 = jax.random.normal(k1, (B, C3, H3, W3), jnp.float32)
  x4 = jax.random.normal(k2, (B, C4, H4, W4), jnp.float32)

  def bn_params(c, k):
    kg, kb, km, kv = jax.random.split(k, 4)
    return jnp.stack([
        1.0 + 0.1 * jax.random.normal(kg, (c,), jnp.float32),   # gamma
        0.1 * jax.random.normal(kb, (c,), jnp.float32),         # beta
        0.1 * jax.random.normal(km, (c,), jnp.float32),         # running_mean
        0.5 + jax.random.uniform(kv, (c,), jnp.float32),        # running_var
    ], axis=0)

  bn3 = bn_params(C3, k3)
  bnm = bn_params(C4, k4)

  out = backbone_layer34_head(x3, x4, bn3, bnm)
  jax.block_until_ready(out)
  assert out.shape == (B, C4 + C3), out.shape

  # Plain-JAX reference of the same eval forward.
  def gem_ref(v):  # v: [B, C, h, w]
    return jnp.mean(jnp.maximum(v, GEM_EPS) ** GEM_P, axis=(-2, -1)) ** (1.0 / GEM_P)

  def bn_ref(x, p):
    return (x - p[2]) / jnp.sqrt(p[3] + BN_EPS) * p[0] + p[1]

  ref_s3 = bn_ref(gem_ref(x3), bn3)
  ref_feat = bn_ref(gem_ref(x4), bnm)
  ref_out = jnp.concatenate([ref_feat, ref_s3], axis=1)

  assert jnp.allclose(out, ref_out, atol=1e-4, rtol=1e-4)
  print("KERNEL_OK")
</pallas_src>

<mosaic_0001>
module attributes {stable_mosaic.version = 11 : i64} {
  func.func @_head_kernel(%arg0: i32, %arg1: memref<8x256x128xf32, #tpu.memory_space<vmem>>, %arg2: memref<8x64x256xf32, #tpu.memory_space<vmem>>, %arg3: memref<4x384xf32, #tpu.memory_space<vmem>>, %arg4: memref<8x384xf32, #tpu.memory_space<vmem>>, %arg5: memref<8x128xf32, #tpu.memory_space<vmem>>, %arg6: memref<8x256xf32, #tpu.memory_space<vmem>>) attributes {dimension_semantics = [#tpu.dimension_semantics<parallel>], iteration_bounds = array<i64: 1>, scalar_prefetch = 0 : i64, scratch_operands = 2 : i64, tpu.core_type = #tpu.core_type<tc>, window_params = [{transform_indices = @transform_0, window_bounds = array<i64: 8, 256, 128>}, {transform_indices = @transform_1, window_bounds = array<i64: 8, 64, 256>}, {pipeline_mode = #tpu.pipeline_mode<synchronous>, transform_indices = @transform_2, window_bounds = array<i64: 4, 384>}, {transform_indices = @transform_3, window_bounds = array<i64: 8, 384>}]} {
    %c0 = arith.constant 0 : index
    %c0_0 = arith.constant 0 : index
    %c0_1 = arith.constant 0 : index
    %0 = vector.load %arg1[%c0, %c0_0, %c0_1] : memref<8x256x128xf32, #tpu.memory_space<vmem>>, vector<8x128x128xf32>
    %cst = arith.constant 9.99999997E-7 : f32
    %1 = vector.broadcast %cst : f32 to vector<8x128x128xf32>
    %2 = arith.maximumf %0, %1 : vector<8x128x128xf32>
    %3 = arith.mulf %2, %2 : vector<8x128x128xf32>
    %4 = arith.mulf %3, %2 : vector<8x128x128xf32>
    %cst_2 = arith.constant dense<0.000000e+00> : vector<8x128xf32>
    %5 = vector.multi_reduction <add>, %4, %cst_2 [1] : vector<8x128x128xf32> to vector<8x128xf32>
    %c0_3 = arith.constant 0 : index
    %c0_4 = arith.constant 0 : index
    %6 = vector.load %arg5[%c0_3, %c0_4] : memref<8x128xf32, #tpu.memory_space<vmem>>, vector<8x128xf32>
    tpu.vector_store %arg5[%c0_3, %c0_4], %5 {strides = array<i32>} : memref<8x128xf32, #tpu.memory_space<vmem>>, vector<8x128xf32>,
    %c1_i32 = arith.constant 1 : i32
    %c128_i32 = arith.constant 128 : i32
    %7 = arith.muli %c1_i32, %c128_i32 : i32
    %8 = tpu.assume_multiple %7, 128 : i32
    %c0_5 = arith.constant 0 : index
    %c0_6 = arith.constant 0 : index
    %9 = vector.load %arg5[%c0_5, %c0_6] : memref<8x128xf32, #tpu.memory_space<vmem>>, vector<8x128xf32>
    %c0_7 = arith.constant 0 : index
    %10 = arith.index_cast %8 : i32 to index
    %c0_8 = arith.constant 0 : index
    %11 = vector.load %arg1[%c0_7, %10, %c0_8] : memref<8x256x128xf32, #tpu.memory_space<vmem>>, vector<8x128x128xf32>
    %cst_9 = arith.constant 9.99999997E-7 : f32
    %12 = vector.broadcast %cst_9 : f32 to vector<8x128x128xf32>
    %13 = arith.maximumf %11, %12 : vector<8x128x128xf32>
    %14 = arith.mulf %13, %13 : vector<8x128x128xf32>
    %15 = arith.mulf %14, %13 : vector<8x128x128xf32>
    %cst_10 = arith.constant dense<0.000000e+00> : vector<8x128xf32>
    %16 = vector.multi_reduction <add>, %15, %cst_10 [1] : vector<8x128x128xf32> to vector<8x128xf32>
    %17 = arith.addf %9, %16 : vector<8x128xf32>
    %c0_11 = arith.constant 0 : index
    %c0_12 = arith.constant 0 : index
    %18 = vector.load %arg5[%c0_11, %c0_12] : memref<8x128xf32, #tpu.memory_space<vmem>>, vector<8x128xf32>
    tpu.vector_store %arg5[%c0_11, %c0_12], %17 {strides = array<i32>} : memref<8x128xf32, #tpu.memory_space<vmem>>, vector<8x128xf32>,
    %c1_i32_13 = arith.constant 1 : i32
    %c0_14 = arith.constant 0 : index
    %c0_15 = arith.constant 0 : index
    %c0_16 = arith.constant 0 : index
    %19 = vector.load %arg2[%c0_14, %c0_15, %c0_16] : memref<8x64x256xf32, #tpu.memory_space<vmem>>, vector<8x64x256xf32>
    %cst_17 = arith.constant 9.99999997E-7 : f32
    %20 = vector.broadcast %cst_17 : f32 to vector<8x64x256xf32>
    %21 = arith.maximumf %19, %20 : vector<8x64x256xf32>
    %22 = arith.mulf %21, %21 : vector<8x64x256xf32>
    %23 = arith.mulf %22, %21 : vector<8x64x256xf32>
    %cst_18 = arith.constant dense<0.000000e+00> : vector<8x256xf32>
    %24 = vector.multi_reduction <add>, %23, %cst_18 [1] : vector<8x64x256xf32> to vector<8x256xf32>
    %c0_19 = arith.constant 0 : index
    %c0_20 = arith.constant 0 : index
    %25 = vector.load %arg6[%c0_19, %c0_20] : memref<8x256xf32, #tpu.memory_space<vmem>>, vector<8x256xf32>
    tpu.vector_store %arg6[%c0_19, %c0_20], %24 {strides = array<i32>} : memref<8x256xf32, #tpu.memory_space<vmem>>, vector<8x256xf32>,
    %c0_21 = arith.constant 0 : index
    %c0_22 = arith.constant 0 : index
    %26 = vector.load %arg5[%c0_21, %c0_22] : memref<8x128xf32, #tpu.memory_space<vmem>>, vector<8x128xf32>
    %cst_23 = arith.constant 3.906250e-03 : f32
    %27 = vector.broadcast %cst_23 : f32 to vector<8x128xf32>
    %28 = arith.mulf %26, %27 : vector<8x128xf32>
    %29 = math.log %28 : vector<8x128xf32>
    %cst_24 = arith.constant 0.333333343 : f32
    %30 = vector.broadcast %cst_24 : f32 to vector<8x128xf32>
    %31 = arith.mulf %29, %30 : vector<8x128xf32>
    %32 = math.exp %31 : vector<8x128xf32>
    %c0_25 = arith.constant 0 : index
    %c0_26 = arith.constant 0 : index
    %33 = vector.load %arg6[%c0_25, %c0_26] : memref<8x256xf32, #tpu.memory_space<vmem>>, vector<8x256xf32>
    %cst_27 = arith.constant 1.562500e-02 : f32
    %34 = vector.broadcast %cst_27 : f32 to vector<8x256xf32>
    %35 = arith.mulf %33, %34 : vector<8x256xf32>
    %36 = math.log %35 : vector<8x256xf32>
    %cst_28 = arith.constant 0.333333343 : f32
    %37 = vector.broadcast %cst_28 : f32 to vector<8x256xf32>
    %38 = arith.mulf %36, %37 : vector<8x256xf32>
    %39 = math.exp %38 : vector<8x256xf32>
    %c0_29 = arith.constant 0 : index
    %c0_30 = arith.constant 0 : index
    %40 = vector.load %arg3[%c0_29, %c0_30] : memref<4x384xf32, #tpu.memory_space<vmem>>, vector<4x384xf32>
    %41 = vector.extract_strided_slice %40 {offsets = [0, 0], sizes = [4, 256], strides = [1, 1]} : vector<4x384xf32> to vector<4x256xf32>
    %42 = vector.extract_strided_slice %41 {offsets = [0, 0], sizes = [1, 256], strides = [1, 1]} : vector<4x256xf32> to vector<1x256xf32>
    %43 = vector.extract_strided_slice %41 {offsets = [1, 0], sizes = [1, 256], strides = [1, 1]} : vector<4x256xf32> to vector<1x256xf32>
    %44 = vector.extract_strided_slice %41 {offsets = [2, 0], sizes = [1, 256], strides = [1, 1]} : vector<4x256xf32> to vector<1x256xf32>
    %45 = vector.extract_strided_slice %41 {offsets = [3, 0], sizes = [1, 256], strides = [1, 1]} : vector<4x256xf32> to vector<1x256xf32>
    %46 = vector.broadcast %44 : vector<1x256xf32> to vector<8x256xf32>
    %47 = arith.subf %39, %46 : vector<8x256xf32>
    %cst_31 = arith.constant 9.99999974E-6 : f32
    %48 = vector.broadcast %cst_31 : f32 to vector<1x256xf32>
    %49 = arith.addf %45, %48 : vector<1x256xf32>
    %50 = math.rsqrt %49 : vector<1x256xf32>
    %51 = vector.broadcast %50 : vector<1x256xf32> to vector<8x256xf32>
    %52 = arith.mulf %47, %51 : vector<8x256xf32>
    %53 = vector.broadcast %42 : vector<1x256xf32> to vector<8x256xf32>
    %54 = arith.mulf %52, %53 : vector<8x256xf32>
    %55 = vector.broadcast %43 : vector<1x256xf32> to vector<8x256xf32>
    %56 = arith.addf %54, %55 : vector<8x256xf32>
    %57 = vector.extract_strided_slice %40 {offsets = [0, 256], sizes = [4, 128], strides = [1, 1]} : vector<4x384xf32> to vector<4x128xf32>
    %58 = vector.extract_strided_slice %57 {offsets = [0, 0], sizes = [1, 128], strides = [1, 1]} : vector<4x128xf32> to vector<1x128xf32>
    %59 = vector.extract_strided_slice %57 {offsets = [1, 0], sizes = [1, 128], strides = [1, 1]} : vector<4x128xf32> to vector<1x128xf32>
    %60 = vector.extract_strided_slice %57 {offsets = [2, 0], sizes = [1, 128], strides = [1, 1]} : vector<4x128xf32> to vector<1x128xf32>
    %61 = vector.extract_strided_slice %57 {offsets = [3, 0], sizes = [1, 128], strides = [1, 1]} : vector<4x128xf32> to vector<1x128xf32>
    %62 = vector.broadcast %60 : vector<1x128xf32> to vector<8x128xf32>
    %63 = arith.subf %32, %62 : vector<8x128xf32>
    %cst_32 = arith.constant 9.99999974E-6 : f32
    %64 = vector.broadcast %cst_32 : f32 to vector<1x128xf32>
    %65 = arith.addf %61, %64 : vector<1x128xf32>
    %66 = math.rsqrt %65 : vector<1x128xf32>
    %67 = vector.broadcast %66 : vector<1x128xf32> to vector<8x128xf32>
    %68 = arith.mulf %63, %67 : vector<8x128xf32>
    %69 = vector.broadcast %58 : vector<1x128xf32> to vector<8x128xf32>
    %70 = arith.mulf %68, %69 : vector<8x128xf32>
    %71 = vector.broadcast %59 : vector<1x128xf32> to vector<8x128xf32>
    %72 = arith.addf %70, %71 : vector<8x128xf32>
    %c0_33 = arith.constant 0 : index
    %c0_34 = arith.constant 0 : index
    %73 = vector.load %arg4[%c0_33, %c0_34] : memref<8x384xf32, #tpu.memory_space<vmem>>, vector<8x256xf32>
    tpu.vector_store %arg4[%c0_33, %c0_34], %56 {strides = array<i32>} : memref<8x384xf32, #tpu.memory_space<vmem>>, vector<8x256xf32>,
    %c0_35 = arith.constant 0 : index
    %c256 = arith.constant 256 : index
    %74 = vector.load %arg4[%c0_35, %c256] : memref<8x384xf32, #tpu.memory_space<vmem>>, vector<8x128xf32>
    tpu.vector_store %arg4[%c0_35, %c256], %72 {strides = array<i32>} : memref<8x384xf32, #tpu.memory_space<vmem>>, vector<8x128xf32>,
    return
  }
  func.func @transform_0(%arg0: i32) -> (i32, i32, i32) {
    %c0_i32 = arith.constant 0 : i32
    %c0_i32_0 = arith.constant 0 : i32
    %c0_i32_1 = arith.constant 0 : i32
    return %arg0, %c0_i32, %c0_i32_0 : i32, i32, i32
  }
  func.func @transform_1(%arg0: i32) -> (i32, i32, i32) {
    %c0_i32 = arith.constant 0 : i32
    %c0_i32_0 = arith.constant 0 : i32
    %c0_i32_1 = arith.constant 0 : i32
    return %arg0, %c0_i32, %c0_i32_0 : i32, i32, i32
  }
  func.func @transform_2(%arg0: i32) -> (i32, i32) {
    %c0_i32 = arith.constant 0 : i32
    %c0_i32_0 = arith.constant 0 : i32
    %c0_i32_1 = arith.constant 0 : i32
    return %c0_i32, %c0_i32_0 : i32, i32
  }
  func.func @transform_3(%arg0: i32) -> (i32, i32) {
    %c0_i32 = arith.constant 0 : i32
    %c0_i32_0 = arith.constant 0 : i32
    return %arg0, %c0_i32 : i32, i32
  }
}

</mosaic_0001>

<bundles_post_ra>
// kernel: tpu_custom_call.1
= control target key start
LH: loop header
LB: loop body
LE: loop exit
PB: predicated region body
PF: predicated region fallthrough
CT: control target
= control target key end

     0   :  { %8 = vsyncpa [#allocation5], 0  ;;  %s6324_s0 = inlined_call_operand.hbm [shape: f32[8,256,128], index: 0, kind: input, shape index: {}]   ;;  %s6325_s1 = inlined_call_operand.hbm [shape: f32[8,64,256], index: 1, kind: input, shape index: {}]   ;;  %s6326_s2 = inlined_call_operand.hbm [shape: f32[4,384], index: 2, kind: input, shape index: {}]   ;;  %s6327_s3 = inlined_call_operand.hbm [shape: f32[8,384], index: 3, kind: output, shape index: {}]  }
   0x1   :  { %9 = vsyncpa [#allocation8], 0 }
   0x2   :  { %10 = vsyncpa [#allocation6], 0  ;;  %s2470_s12 = smov [#allocation7]  }
   0x3   :  { %s28_s13 = sshll.u32 %s2470_s12, 4  ;;  %s29_s13 = int_to_ptr.vmem [resolvable:$true] %s28_s13 }
   0x4   :  { %s2392_s14 = scalar_lea.vmem %s29_s13, 16384  ;;  %p2397_p1 = scmp.lt.s32.totalorder %s29_s13, %s29_s13 }
   0x5   :  { %p2393_p0 = scmp.ne.s32.totalorder %s29_s13, %s2392_s14  ;;  %p2398_p2 = scmp.lt.s32.totalorder %s2392_s14, %s2392_s14 }
   0x7   :  { %p2399_p3 = por %p2398_p2, %p2397_p1 }
   0x9   :  { %p2400_p4 = pnand %p2399_p3, %p2393_p0 }
   0xb   :  { %2403 = shalt.err (!%p2400_p4)
}
   0xc   :  { %s2471_s15 = smov 256   ;;  %s2472_s16 = smov 16  }
   0xd   :  { %34 = dma.hbm_to_vmem [thread:$0]  %s6325_s1, 16384, %s29_s13, [#allocation8], %s2471_s15, %s2471_s15, %s2472_s16  }
   0xe   :  { %s2473_s19 = smov [#allocation4]  }
   0xf   :  { %s16_s20 = sshll.u32 %s2473_s19, 4  ;;  %s17_s20 = int_to_ptr.vmem [resolvable:$true] %s16_s20 }
  0x10   :  { %s2412_s21 = scalar_lea.vmem %s17_s20, 32768  ;;  %p2417_p6 = scmp.lt.s32.totalorder %s17_s20, %s17_s20 }
  0x11   :  { %p2413_p5 = scmp.ne.s32.totalorder %s17_s20, %s2412_s21  ;;  %p2418_p7 = scmp.lt.s32.totalorder %s2412_s21, %s2412_s21 }
  0x13   :  { %p2419_p8 = por %p2418_p7, %p2417_p6 }
  0x15   :  { %p2420_p9 = pnand %p2419_p8, %p2413_p5 }
  0x17   :  { %2423 = shalt.err (!%p2420_p9)
}
  0x18   :  { %s2474_s22 = smov 128   ;;  %s2475_s23 = smov 8  }
  0x19   :  { %22 = dma.hbm_to_vmem [thread:$0]  %s6324_s0, 32768, %s17_s20, [#allocation5], %s2474_s22, %s2474_s22, %s2475_s23  }
  0x1a   :  { %s2476_s26 = smov [#allocation9]  }
  0x1b   :  { %s41_s27 = sshll.u32 %s2476_s26, 4  ;;  %s42_s27 = int_to_ptr.vmem [resolvable:$true] %s41_s27 }
  0x1c   :  { %s2432_s1 = scalar_lea.vmem %s42_s27, 192  ;;  %p2437_p11 = scmp.lt.s32.totalorder %s42_s27, %s42_s27 }
  0x1d   :  { %p2433_p10 = scmp.ne.s32.totalorder %s42_s27, %s2432_s1  ;;  %p2438_p12 = scmp.lt.s32.totalorder %s2432_s1, %s2432_s1 }
  0x1f   :  { %p2439_p13 = por %p2438_p12, %p2437_p11 }
  0x21   :  { %p2440_p0 = pnand %p2439_p13, %p2433_p10 }
  0x23   :  { %2443 = shalt.err (!%p2440_p0)
}
  0x24   :  { %44 = dma.hbm_to_vmem [thread:$0]  %s6326_s2, 192, %s42_s27, [#allocation8]  }
  0x25   :  { %2464 = dma.done.wait [#allocation5], 32768  }
  0x26   :  { %2465 = vsyncadd [#allocation5], 4294934528 }
  0x27   :  { %2466 = dma.done.wait [#allocation8], 16576  }
  0x28   :  { %2467 = vsyncadd [#allocation8], 4294950720  ;;  %v54_v0 = vld [vmem:[#allocation4] sm:$0xff]  ;;  %v55_v1 = vld [vmem:[#allocation4 + $0x8] sm:$0xff]  ;;  %vm742_vm0 = vcmask 1041409   ;;  %vm744_vm1 = vcmask 1042434  }
  0x29   :  { %v56_v2 = vld [vmem:[#allocation4 + $0x10] sm:$0xff]  ;;  %v57_v3 = vld [vmem:[#allocation4 + $0x18] sm:$0xff]  ;;  %v182_v4 = vmax.f32 %v54_v0, 1e-06  ;;  %v58_v5 = vld [vmem:[#allocation4 + $0x20] sm:$0xff]  ;;  %vm746_vm2 = vcmask 1043459  }
  0x2a   :  { %v183_v6 = vmax.f32 %v55_v1, 1e-06  ;;  %v59_v7 = vld [vmem:[#allocation4 + $0x28] sm:$0xff]  ;;  %v184_v8 = vmax.f32 %v56_v2, 1e-06  ;;  %v60_v10 = vld [vmem:[#allocation4 + $0x30] sm:$0xff] }
  0x2b   :  { %v310_v9 = vmul.f32 %v182_v4, %v182_v4  ;;  %v185_v11 = vmax.f32 %v57_v3, 1e-06  ;;  %v61_v13 = vld [vmem:[#allocation4 + $0x38] sm:$0xff]  ;;  %v186_v14 = vmax.f32 %v58_v5, 1e-06  ;;  %v62_v17 = vld [vmem:[#allocation4 + $0x40] sm:$0xff] }
  0x2c   :  { %v311_v12 = vmul.f32 %v183_v6, %v183_v6  ;;  %v312_v15 = vmul.f32 %v184_v8, %v184_v8  ;;  %v187_v18 = vmax.f32 %v59_v7, 1e-06  ;;  %v63_v21 = vld [vmem:[#allocation4 + $0x48] sm:$0xff]  ;;  %v188_v22 = vmax.f32 %v60_v10, 1e-06  ;;  %v64_v25 = vld [vmem:[#allocation4 + $0x50] sm:$0xff] }
  0x2d   :  { %v438_v16 = vmul.f32 %v310_v9, %v182_v4  ;;  %v313_v19 = vmul.f32 %v185_v11, %v185_v11  ;;  %v314_v23 = vmul.f32 %v186_v14, %v186_v14  ;;  %v189_v26 = vmax.f32 %v61_v13, 1e-06  ;;  %v65_v31 = vld [vmem:[#allocation4 + $0x58] sm:$0xff]  ;;  %v66_v37 = vld [vmem:[#allocation4 + $0x60] sm:$0xff]  ;;  %v67_v43 = vld [vmem:[#allocation4 + $0x68] sm:$0xff]  ;;  %s2477_s0 = smov [#allocation10]  }
  0x2e   :  { %v439_v20 = vmul.f32 %v311_v12, %v183_v6  ;;  %v440_v24 = vmul.f32 %v312_v15, %v184_v8  ;;  %v315_v27 = vmul.f32 %v187_v18, %v187_v18  ;;  %v190_v30 = vmax.f32 %v62_v17, 1e-06  ;;  %v70_v44 = vld [vmem:[#allocation4 + $0x100] sm:$0xff]  ;;  %v68_v48 = vld [vmem:[#allocation4 + $0x70] sm:$0xff]  ;;  %v71_v49 = vld [vmem:[#allocation4 + $0x108] sm:$0xff]  ;;  %s2350_s2 = sshll.u32 %s2477_s0, 4  ;;  %s2351_s2 = int_to_ptr.vmem [resolvable:$true] %s2350_s2 }
  0x2f   :  { %v441_v28 = vmul.f32 %v313_v19, %v185_v11  ;;  %v191_v32 = vmax.f32 %v63_v21, 1e-06  ;;  %v316_v33 = vmul.f32 %v188_v22, %v188_v22  ;;  %v442_v34 = vmul.f32 %v314_v23, %v186_v14  ;;  %v72_v52 = vld [vmem:[#allocation4 + $0x110] sm:$0xff]  ;;  %v69_v55 = vld [vmem:[#allocation4 + $0x78] sm:$0xff]  ;;  %v74_v61 = vld [vmem:[#allocation4 + $0x120] sm:$0xff]  ;;  %s2444_s30 = scalar_lea.vmem %s2351_s2, 384  ;;  %p2449_p2 = scmp.lt.s32.totalorder %s2351_s2, %s2351_s2 }
  0x30   :  { %v566_v29 = vadd.f32 %v439_v20, %v438_v16  ;;  %v192_v36 = vmax.f32 %v64_v25, 1e-06  ;;  %v317_v38 = vmul.f32 %v189_v26, %v189_v26  ;;  %v443_v39 = vmul.f32 %v315_v27, %v187_v18  ;;  %v73_v56 = vld [vmem:[#allocation4 + $0x118] sm:$0xff]  ;;  %v75_v2 = vld [vmem:[#allocation4 + $0x128] sm:$0xff]  ;;  %v76_v7 = vld [vmem:[#allocation4 + $0x130] sm:$0xff]  ;;  %p2445_p1 = scmp.ne.s32.totalorder %s2351_s2, %s2444_s30  ;;  %p2450_p3 = scmp.lt.s32.totalorder %s2444_s30, %s2444_s30 }
  0x31   :  { %v193_v41 = vmax.f32 %v65_v31, 1e-06  ;;  %v318_v42 = vmul.f32 %v190_v30, %v190_v30  ;;  %v319_v45 = vmul.f32 %v191_v32, %v191_v32  ;;  %v444_v46 = vmul.f32 %v316_v33, %v188_v22  ;;  %v77_v12 = vld [vmem:[#allocation4 + $0x138] sm:$0xff]  ;;  %v78_v17 = vld [vmem:[#allocation4 + $0x140] sm:$0xff]  ;;  %v79_v22 = vld [vmem:[#allocation4 + $0x148] sm:$0xff] }
  0x32   :  { %v567_v35 = vadd.f32 %v566_v29, %v440_v24  ;;  %v194_v50 = vmax.f32 %v66_v37, 1e-06  ;;  %v320_v51 = vmul.f32 %v192_v36, %v192_v36  ;;  %v445_v53 = vmul.f32 %v317_v38, %v189_v26  ;;  %v80_v27 = vld [vmem:[#allocation4 + $0x150] sm:$0xff]  ;;  %p2451_p4 = por %p2450_p3, %p2449_p2 }
  0x33   :  { %v195_v57 = vmax.f32 %v67_v43, 1e-06  ;;  %v198_v58 = vmax.f32 %v70_v44, 1e-06  ;;  %v321_v59 = vmul.f32 %v193_v41, %v193_v41  ;;  %v446_v60 = vmul.f32 %v318_v42, %v190_v30  ;;  %v82_v42 = vld [vmem:[#allocation4 + $0x160] sm:$0xff] }
  0x34   :  { %v568_v40 = vadd.f32 %v567_v35, %v441_v28  ;;  %v196_v62 = vmax.f32 %v68_v48, 1e-06  ;;  %v199_v63 = vmax.f32 %v71_v49, 1e-06  ;;  %v447_v0 = vmul.f32 %v319_v45, %v191_v32  ;;  %v81_v32 = vld [vmem:[#allocation4 + $0x158] sm:$0xff]  ;;  %p2452_p5 = pnand %p2451_p4, %p2445_p1 }
  0x35   :  { %v200_v3 = vmax.f32 %v72_v52, 1e-06  ;;  %v322_v4 = vmul.f32 %v194_v50, %v194_v50  ;;  %v326_v5 = vmul.f32 %v198_v58, %v198_v58  ;;  %v448_v6 = vmul.f32 %v320_v51, %v192_v36  ;;  %v84_v51 = vld [vmem:[#allocation4 + $0x170] sm:$0xff]  ;;  %v85_v52 = vld [vmem:[#allocation4 + $0x178] sm:$0xff] }
  0x36   :  { %v569_v47 = vadd.f32 %v568_v40, %v442_v34  ;;  %v197_v8 = vmax.f32 %v69_v55, 1e-06  ;;  %v201_v9 = vmax.f32 %v73_v56, 1e-06  ;;  %v327_v10 = vmul.f32 %v199_v63, %v199_v63 }
  0x37   :  { %v202_v13 = vmax.f32 %v74_v61, 1e-06  ;;  %v323_v14 = vmul.f32 %v195_v57, %v195_v57  ;;  %v328_v15 = vmul.f32 %v200_v3, %v200_v3  ;;  %v454_v16 = vmul.f32 %v326_v5, %v198_v58  ;;  %v86_v58 = vld [vmem:[#allocation4 + $0x200] sm:$0xff] }
  0x38   :  { %v570_v54 = vadd.f32 %v569_v47, %v443_v39  ;;  %v203_v18 = vmax.f32 %v75_v2, 1e-06  ;;  %v329_v19 = vmul.f32 %v201_v9, %v201_v9  ;;  %v455_v20 = vmul.f32 %v327_v10, %v199_v63  ;;  %v87_v63 = vld [vmem:[#allocation4 + $0x208] sm:$0xff] }
  0x39   :  { %v204_v23 = vmax.f32 %v76_v7, 1e-06  ;;  %v330_v24 = vmul.f32 %v202_v13, %v202_v13  ;;  %v449_v25 = vmul.f32 %v321_v59, %v193_v41  ;;  %v456_v26 = vmul.f32 %v328_v15, %v200_v3 }
  0x3a   :  { %v571_v1 = vadd.f32 %v570_v54, %v444_v46  ;;  %v205_v28 = vmax.f32 %v77_v12, 1e-06  ;;  %v324_v29 = vmul.f32 %v196_v62, %v196_v62  ;;  %v450_v30 = vmul.f32 %v322_v4, %v194_v50  ;;  %v83_v46 = vld [vmem:[#allocation4 + $0x168] sm:$0xff]  ;;  %v88_v4 = vld [vmem:[#allocation4 + $0x210] sm:$0xff] }
  0x3b   :  { %v206_v33 = vmax.f32 %v78_v17, 1e-06  ;;  %v331_v34 = vmul.f32 %v203_v18, %v203_v18  ;;  %v457_v35 = vmul.f32 %v329_v19, %v201_v9  ;;  %v587_v36 = vadd.f32 %v455_v20, %v454_v16  ;;  %v89_v9 = vld [vmem:[#allocation4 + $0x218] sm:$0xff] }
  0x3c   :  { %v572_v11 = vadd.f32 %v571_v1, %v445_v53  ;;  %v207_v37 = vmax.f32 %v79_v22, 1e-06  ;;  %v325_v38 = vmul.f32 %v197_v8, %v197_v8  ;;  %v451_v39 = vmul.f32 %v323_v14, %v195_v57  ;;  %v90_v14 = vld [vmem:[#allocation4 + $0x220] sm:$0xff] }
  0x3d   :  { %v208_v43 = vmax.f32 %v80_v27, 1e-06  ;;  %v332_v44 = vmul.f32 %v204_v23, %v204_v23  ;;  %v458_v45 = vmul.f32 %v330_v24, %v202_v13  ;;  %v588_v41 = vadd.f32 %v587_v36, %v456_v26 }
  0x3e   :  { %v573_v21 = vadd.f32 %v572_v11, %v446_v60  ;;  %v209_v47 = vmax.f32 %v81_v32, 1e-06  ;;  %v333_v48 = vmul.f32 %v205_v28, %v205_v28  ;;  %v452_v49 = vmul.f32 %v324_v29, %v196_v62 }
  0x3f   :  { %v334_v53 = vmul.f32 %v206_v33, %v206_v33  ;;  %v335_v54 = vmul.f32 %v207_v37, %v207_v37  ;;  %v459_v55 = vmul.f32 %v331_v34, %v203_v18  ;;  %v589_v56 = vadd.f32 %v588_v41, %v457_v35  ;;  %v91_v18 = vld [vmem:[#allocation4 + $0x228] sm:$0xff] }
  0x40   :  { %v574_v31 = vadd.f32 %v573_v21, %v447_v0  ;;  %v210_v59 = vmax.f32 %v82_v42, 1e-06  ;;  %v336_v57 = vmul.f32 %v208_v43, %v208_v43  ;;  %v453_v60 = vmul.f32 %v325_v38, %v197_v8  ;;  %v95_v34 = vld [vmem:[#allocation4 + $0x248] sm:$0xff]  ;;  %v98_v42 = vld [vmem:[#allocation4 + $0x260] sm:$0xff] }
  0x41   :  { %v211_v0 = vmax.f32 %v83_v46, 1e-06  ;;  %v337_v1 = vmul.f32 %v209_v47, %v209_v47  ;;  %v460_v2 = vmul.f32 %v332_v44, %v204_v23  ;;  %v590_v3 = vadd.f32 %v589_v56, %v458_v45  ;;  %v92_v23 = vld [vmem:[#allocation4 + $0x230] sm:$0xff]  ;;  %v99_v46 = vld [vmem:[#allocation4 + $0x268] sm:$0xff] }
  0x42   :  { %v575_v40 = vadd.f32 %v574_v31, %v448_v6  ;;  %v212_v5 = vmax.f32 %v84_v51, 1e-06  ;;  %v213_v62 = vmax.f32 %v85_v52, 1e-06  ;;  %v461_v6 = vmul.f32 %v333_v48, %v205_v28  ;;  %v93_v28 = vld [vmem:[#allocation4 + $0x238] sm:$0xff] }
  0x43   :  { %v214_v10 = vmax.f32 %v86_v58, 1e-06  ;;  %v462_v11 = vmul.f32 %v334_v53, %v206_v33  ;;  %v463_v12 = vmul.f32 %v335_v54, %v207_v37  ;;  %v591_v13 = vadd.f32 %v590_v3, %v459_v55  ;;  %v94_v33 = vld [vmem:[#allocation4 + $0x240] sm:$0xff]  ;;  %v101_v48 = vld [vmem:[#allocation4 + $0x278] sm:$0xff]  ;;  %v103_v54 = vld [vmem:[#allocation4 + $0x308] sm:$0xff] }
  0x44   :  { %v576_v50 = vadd.f32 %v575_v40, %v449_v25  ;;  %v215_v15 = vmax.f32 %v87_v63, 1e-06  ;;  %v338_v16 = vmul.f32 %v210_v59, %v210_v59  ;;  %v2507_v8 = vmul.f32 %v336_v57, %v208_v43  ;;  %v97_v40 = vld [vmem:[#allocation4 + $0x258] sm:$0xff]  ;;  %v102_v53 = vld [vmem:[#allocation4 + $0x300] sm:$0xff]  ;;  %v104_v55 = vld [vmem:[#allocation4 + $0x310] sm:$0xff] }
  0x45   :  { %v216_v19 = vmax.f32 %v88_v4, 1e-06  ;;  %v339_v20 = vmul.f32 %v211_v0, %v211_v0  ;;  %v2509_v21 = vmul.f32 %v337_v1, %v209_v47  ;;  %v592_v22 = vadd.f32 %v591_v13, %v460_v2  ;;  %v100_v47 = vld [vmem:[#allocation4 + $0x270] sm:$0xff]  ;;  %v107_v63 = vld [vmem:[#allocation4 + $0x328] sm:$0xff] }
  0x46   :  { %v577_v61 = vadd.f32 %v576_v50, %v450_v30  ;;  %6665 = vst [vmem:[#allocation14_spill] sm:$0xff] %v2507_v8  ;;  %v217_v24 = vmax.f32 %v89_v9, 1e-06  ;;  %v340_v25 = vmul.f32 %v212_v5, %v212_v5  ;;  %v341_v26 = vmul.f32 %v213_v62, %v213_v62  ;;  %v108_v4 = vld [vmem:[#allocation4 + $0x330] sm:$0xff] }
  0x47   :  { %6666 = vst [vmem:[#allocation15_spill] sm:$0xff] %v2509_v21  ;;  %v218_v29 = vmax.f32 %v90_v14, 1e-06  ;;  %v342_v30 = vmul.f32 %v214_v10, %v214_v10  ;;  %v343_v31 = vmul.f32 %v215_v15, %v215_v15  ;;  %v593_v32 = vadd.f32 %v592_v22, %v461_v6  ;;  %v110_v6 = vld [vmem:[#allocation4 + $0x340] sm:$0xff]  ;;  %v112_v13 = vld [vmem:[#allocation4 + $0x350] sm:$0xff]  ;;  %v113_v14 = vld [vmem:[#allocation4 + $0x358] sm:$0xff] }
  0x48   :  { %v578_v7 = vadd.f32 %v577_v61, %v451_v39  ;;  %v219_v35 = vmax.f32 %v91_v18, 1e-06  ;;  %v344_v36 = vmul.f32 %v216_v19, %v216_v19  ;;  %v345_v37 = vmul.f32 %v217_v24, %v217_v24  ;;  %v96_v39 = vld [vmem:[#allocation4 + $0x250] sm:$0xff]  ;;  %v106_v61 = vld [vmem:[#allocation4 + $0x320] sm:$0xff] }
  0x49   :  { %v2511_v43 = vmax.f32 %v92_v23, 1e-06  ;;  %v346_v44 = vmul.f32 %v218_v29, %v218_v29  ;;  %v2513_v45 = vmul.f32 %v338_v16, %v210_v59  ;;  %v594_v41 = vadd.f32 %v593_v32, %v462_v11  ;;  %v111_v11 = vld [vmem:[#allocation4 + $0x348] sm:$0xff]  ;;  %v116_v22 = vld [vmem:[#allocation4 + $0x370] sm:$0xff] }
  0x4a   :  { %v579_v17 = vadd.f32 %v578_v7, %v452_v49  ;;  %v2515_v49 = vmax.f32 %v93_v28, 1e-06  ;;  %v347_v50 = vmul.f32 %v219_v35, %v219_v35  ;;  %v2517_v51 = vmul.f32 %v339_v20, %v211_v0  ;;  %v115_v20 = vld [vmem:[#allocation4 + $0x368] sm:$0xff] }
  0x4b   :  { %6667 = vst [vmem:[#allocation16_spill] sm:$0xff] %v2511_v43  ;;  %6668 = vst [vmem:[#allocation17_spill] sm:$0xff] %v2513_v45  ;;  %v2519_v52 = vmul.f32 %v340_v25, %v212_v5  ;;  %v2521_v56 = vmax.f32 %v94_v33, 1e-06  ;;  %v2523_v58 = vmul.f32 %v341_v26, %v213_v62  ;;  %v2525_v59 = vmul.f32 %v342_v30, %v214_v10  ;;  %v109_v5 = vld [vmem:[#allocation4 + $0x338] sm:$0xff]  ;;  %v119_v28 = vld [vmem:[#allocation4 + $0x408] sm:$0xff] }
  0x4c   :  { %v580_v27 = vadd.f32 %v579_v17, %v453_v60  ;;  %6669 = vst [vmem:[#allocation18_spill] sm:$0xff] %v2515_v49  ;;  %6670 = vst [vmem:[#allocation19_spill] sm:$0xff] %v2517_v51  ;;  %v2527_v57 = vmul.f32 %v343_v31, %v215_v15  ;;  %v105_v60 = vld [vmem:[#allocation4 + $0x318] sm:$0xff]  ;;  %v2529_v1 = vmax.f32 %v95_v34, 1e-06  ;;  %v2531_v0 = vmul.f32 %v344_v36, %v216_v19  ;;  %v114_v19 = vld [vmem:[#allocation4 + $0x360] sm:$0xff] }
  0x4d   :  { %6671 = vst [vmem:[#allocation20_spill] sm:$0xff] %v2519_v52  ;;  %6672 = vst [vmem:[#allocation21_spill] sm:$0xff] %v2521_v56  ;;  %v2533_v2 = vmul.f32 %v345_v37, %v217_v24  ;;  %v2537_v62 = vmax.f32 %v96_v39, 1e-06  ;;  %v2541_v7 = vmul.f32 %v2511_v43, %v2511_v43  ;;  %v2543_v9 = vmul.f32 %v346_v44, %v218_v29  ;;  %v117_v26 = vld [vmem:[#allocation4 + $0x378] sm:$0xff]  ;;  %v120_v33 = vld [vmem:[#allocation4 + $0x410] sm:$0xff] }
  0x4e   :  { %v581_v38 = vrot.slane %v580_v27, 4  ;;  %6673 = vst [vmem:[#allocation22_spill] sm:$0xff] %v2523_v58  ;;  %6674 = vst [vmem:[#allocation23_spill] sm:$0xff] %v2525_v59  ;;  %v2545_v10 = vadd.f32 %v594_v41, %v463_v12  ;;  %v2547_v15 = vmax.f32 %v97_v40, 1e-06  ;;  %v2553_v17 = vmul.f32 %v2515_v49, %v2515_v49  ;;  %v121_v34 = vld [vmem:[#allocation4 + $0x418] sm:$0xff] }
  0x4f   :  { %6675 = vst [vmem:[#allocation24_spill] sm:$0xff] %v2527_v57  ;;  %6676 = vst [vmem:[#allocation25_spill] sm:$0xff] %v2529_v1  ;;  %v2549_v16 = vmax.f32 %v98_v42, 1e-06  ;;  %v2555_v18 = vmul.f32 %v347_v50, %v219_v35  ;;  %v2557_v23 = vmax.f32 %v99_v46, 1e-06  ;;  %v2565_v25 = vmul.f32 %v2521_v56, %v2521_v56 }
  0x50   :  { %6677 = vst [vmem:[#allocation26_spill] sm:$0xff] %v2531_v0  ;;  %6678 = vst [vmem:[#allocation27_spill] sm:$0xff] %v2533_v2  ;;  %v2535_v3 = vadd.f32 %v581_v38, %v580_v27  ;;  %v2559_v12 = vmax.f32 %v100_v47, 1e-06  ;;  %v2561_v24 = vmax.f32 %v101_v48, 1e-06  ;;  %v2575_v32 = vmul.f32 %v2529_v1, %v2529_v1 }
  0x51   :  { %6680 = vst [vmem:[#allocation29_spill] sm:$0xff] %v2537_v62  ;;  %6681 = vst [vmem:[#allocation30_spill] sm:$0xff] %v2541_v7  ;;  %v118_v27 = vld [vmem:[#allocation4 + $0x400] sm:$0xff]  ;;  %v2567_v29 = vmax.f32 %v102_v53, 1e-06  ;;  %v2585_v39 = vmul.f32 %v2537_v62, %v2537_v62  ;;  %v123_v40 = vld [vmem:[#allocation4 + $0x428] sm:$0xff]  ;;  %v2595_v48 = vmul.f32 %v2547_v15, %v2547_v15 }
  0x52   :  { %6679 = vst [vmem:[#allocation28_spill] sm:$0xff] %v2535_v3  ;;  %6682 = vst [vmem:[#allocation31_spill] sm:$0xff] %v2543_v9  ;;  %v2569_v30 = vmax.f32 %v103_v54, 1e-06  ;;  %v2571_v31 = vmax.f32 %v104_v55, 1e-06 }
  0x53   :  { %6683 = vst [vmem:[#allocation32_spill] sm:$0xff] %v2545_v10  ;;  %6684 = vst [vmem:[#allocation33_spill] sm:$0xff] %v2547_v15  ;;  %v122_v35 = vld [vmem:[#allocation4 + $0x420] sm:$0xff]  ;;  %v2577_v36 = vmax.f32 %v105_v60, 1e-06  ;;  %v124_v42 = vld [vmem:[#allocation4 + $0x430] sm:$0xff] }
  0x54   :  { %6685 = vst [vmem:[#allocation34_spill] sm:$0xff] %v2549_v16  ;;  %6686 = vst [vmem:[#allocation35_spill] sm:$0xff] %v2553_v17  ;;  %v2579_v37 = vmax.f32 %v106_v61, 1e-06  ;;  %v2581_v38 = vmax.f32 %v107_v63, 1e-06  ;;  %v2605_v63 = vmul.f32 %v2549_v16, %v2549_v16 }
  0x55   :  { %6687 = vst [vmem:[#allocation36_spill] sm:$0xff] %v2555_v18  ;;  %6688 = vst [vmem:[#allocation37_spill] sm:$0xff] %v2557_v23  ;;  %v125_v44 = vld [vmem:[#allocation4 + $0x438] sm:$0xff]  ;;  %v2587_v41 = vmax.f32 %v108_v4, 1e-06  ;;  %v126_v50 = vld [vmem:[#allocation4 + $0x440] sm:$0xff] }
  0x56   :  { %6689 = vst [vmem:[#allocation38_spill] sm:$0xff] %v2559_v12  ;;  %6690 = vst [vmem:[#allocation39_spill] sm:$0xff] %v2561_v24  ;;  %v2589_v46 = vmax.f32 %v109_v5, 1e-06  ;;  %v2591_v47 = vmax.f32 %v110_v6, 1e-06 }
  0x57   :  { %6691 = vst [vmem:[#allocation40_spill] sm:$0xff] %v2565_v25  ;;  %6692 = vst [vmem:[#allocation41_spill] sm:$0xff] %v2567_v29  ;;  %v127_v53 = vld [vmem:[#allocation4 + $0x448] sm:$0xff]  ;;  %v128_v54 = vld [vmem:[#allocation4 + $0x450] sm:$0xff]  ;;  %v2597_v55 = vmax.f32 %v111_v11, 1e-06  ;;  %v2615_v11 = vmul.f32 %v2557_v23, %v2557_v23 }
  0x58   :  { %6693 = vst [vmem:[#allocation42_spill] sm:$0xff] %v2569_v30  ;;  %6694 = vst [vmem:[#allocation43_spill] sm:$0xff] %v2571_v31  ;;  %v2599_v60 = vmax.f32 %v112_v13, 1e-06  ;;  %v2601_v61 = vmax.f32 %v113_v14, 1e-06 }
  0x59   :  { %6695 = vst [vmem:[#allocation44_spill] sm:$0xff] %v2575_v32  ;;  %6696 = vst [vmem:[#allocation45_spill] sm:$0xff] %v2577_v36  ;;  %v129_v4 = vld [vmem:[#allocation4 + $0x458] sm:$0xff]  ;;  %v130_v5 = vld [vmem:[#allocation4 + $0x460] sm:$0xff]  ;;  %v2607_v58 = vmax.f32 %v114_v19, 1e-06  ;;  %v2625_v19 = vmul.f32 %v2559_v12, %v2559_v12 }
  0x5a   :  { %6697 = vst [vmem:[#allocation46_spill] sm:$0xff] %v2579_v37  ;;  %6698 = vst [vmem:[#allocation47_spill] sm:$0xff] %v2581_v38  ;;  %v131_v6 = vld [vmem:[#allocation4 + $0x468] sm:$0xff]  ;;  %v2609_v18 = vmax.f32 %v115_v20, 1e-06  ;;  %v132_v13 = vld [vmem:[#allocation4 + $0x470] sm:$0xff] }
  0x5b   :  { %6699 = vst [vmem:[#allocation48_spill] sm:$0xff] %v2585_v39  ;;  %6700 = vst [vmem:[#allocation49_spill] sm:$0xff] %v2587_v41  ;;  %v2611_v52 = vmax.f32 %v116_v22, 1e-06  ;;  %v133_v14 = vld [vmem:[#allocation4 + $0x478] sm:$0xff]  ;;  %v134_v9 = vld [vmem:[#allocation4 + $0x500] sm:$0xff] }
  0x5c   :  { %6701 = vst [vmem:[#allocation50_spill] sm:$0xff] %v2589_v46  ;;  %6702 = vst [vmem:[#allocation51_spill] sm:$0xff] %v2591_v47  ;;  %v2617_v51 = vmax.f32 %v117_v26, 1e-06  ;;  %v2619_v3 = vmax.f32 %v118_v27, 1e-06  ;;  %v2635_v26 = vmul.f32 %v2561_v24, %v2561_v24 }
  0x5d   :  { %6703 = vst [vmem:[#allocation52_spill] sm:$0xff] %v2595_v48  ;;  %6704 = vst [vmem:[#allocation53_spill] sm:$0xff] %v2597_v55  ;;  %v2621_v2 = vmax.f32 %v119_v28, 1e-06  ;;  %v135_v20 = vld [vmem:[#allocation4 + $0x508] sm:$0xff]  ;;  %v136_v22 = vld [vmem:[#allocation4 + $0x510] sm:$0xff] }
  0x5e   :  { %6705 = vst [vmem:[#allocation54_spill] sm:$0xff] %v2599_v60  ;;  %6706 = vst [vmem:[#allocation55_spill] sm:$0xff] %v2601_v61  ;;  %v137_v45 = vld [vmem:[#allocation4 + $0x518] sm:$0xff]  ;;  %v2627_v0 = vmax.f32 %v120_v33, 1e-06  ;;  %v138_v27 = vld [vmem:[#allocation4 + $0x520] sm:$0xff]  ;;  %v2645_v33 = vmul.f32 %v2567_v29, %v2567_v29 }
  0x5f   :  { %6707 = vst [vmem:[#allocation56_spill] sm:$0xff] %v2605_v63  ;;  %6708 = vst [vmem:[#allocation57_spill] sm:$0xff] %v2607_v58  ;;  %v2629_v21 = vmax.f32 %v121_v34, 1e-06  ;;  %v2631_v57 = vmax.f32 %v122_v35, 1e-06 }
  0x60   :  { %6709 = vst [vmem:[#allocation58_spill] sm:$0xff] %v2611_v52  ;;  %6710 = vst [vmem:[#allocation59_spill] sm:$0xff] %v2615_v11  ;;  %v139_v28 = vld [vmem:[#allocation4 + $0x528] sm:$0xff]  ;;  %v140_v59 = vld [vmem:[#allocation4 + $0x530] sm:$0xff]  ;;  %v2637_v10 = vmax.f32 %v123_v40, 1e-06  ;;  %v2655_v40 = vmul.f32 %v2569_v30, %v2569_v30 }
  0x61   :  { %6711 = vst [vmem:[#allocation60_spill] sm:$0xff] %v2617_v51  ;;  %6712 = vst [vmem:[#allocation61_spill] sm:$0xff] %v2619_v3  ;;  %v2639_v8 = vmax.f32 %v124_v42, 1e-06  ;;  %v141_v34 = vld [vmem:[#allocation4 + $0x538] sm:$0xff]  ;;  %v142_v35 = vld [vmem:[#allocation4 + $0x540] sm:$0xff] }
  0x62   :  { %6713 = vst [vmem:[#allocation62_spill] sm:$0xff] %v2625_v19  ;;  %6714 = vst [vmem:[#allocation63_spill] sm:$0xff] %v2631_v57  ;;  %v2641_v19 = vmax.f32 %v125_v44, 1e-06  ;;  %v143_v12 = vld [vmem:[#allocation4 + $0x548] sm:$0xff]  ;;  %v144_v42 = vld [vmem:[#allocation4 + $0x550] sm:$0xff] }
  0x63   :  { %6715 = vst [vmem:[#allocation64_spill] sm:$0xff] %v2635_v26  ;;  %6716 = vst [vmem:[#allocation65_spill] sm:$0xff] %v2637_v10  ;;  %v2647_v11 = vmax.f32 %v126_v50, 1e-06  ;;  %v2649_v24 = vmax.f32 %v127_v53, 1e-06  ;;  %v2665_v50 = vmul.f32 %v2571_v31, %v2571_v31 }
  0x64   :  { %6717 = vst [vmem:[#allocation66_spill] sm:$0xff] %v2639_v8  ;;  %6718 = vst [vmem:[#allocation67_spill] sm:$0xff] %v2641_v19  ;;  %v2651_v26 = vmax.f32 %v128_v54, 1e-06  ;;  %v145_v44 = vld [vmem:[#allocation4 + $0x558] sm:$0xff]  ;;  %v146_v23 = vld [vmem:[#allocation4 + $0x560] sm:$0xff] }
  0x65   :  { %6719 = vst [vmem:[#allocation68_spill] sm:$0xff] %v2645_v33  ;;  %6720 = vst [vmem:[#allocation69_spill] sm:$0xff] %v2647_v11  ;;  %v2657_v63 = vmax.f32 %v129_v4, 1e-06  ;;  %v2659_v29 = vmax.f32 %v130_v5, 1e-06  ;;  %v2675_v4 = vmul.f32 %v2577_v36, %v2577_v36 }
  0x66   :  { %6721 = vst [vmem:[#allocation70_spill] sm:$0xff] %v2649_v24  ;;  %6722 = vst [vmem:[#allocation71_spill] sm:$0xff] %v2651_v26  ;;  %v2661_v33 = vmax.f32 %v131_v6, 1e-06  ;;  %v147_v53 = vld [vmem:[#allocation4 + $0x568] sm:$0xff]  ;;  %v148_v54 = vld [vmem:[#allocation4 + $0x570] sm:$0xff] }
  0x67   :  { %6723 = vst [vmem:[#allocation72_spill] sm:$0xff] %v2655_v40  ;;  %6724 = vst [vmem:[#allocation73_spill] sm:$0xff] %v2657_v63  ;;  %v149_v16 = vld [vmem:[#allocation4 + $0x578] sm:$0xff]  ;;  %v2667_v48 = vmax.f32 %v132_v13, 1e-06  ;;  %v150_v5 = vld [vmem:[#allocation4 + $0x600] sm:$0xff]  ;;  %v2685_v13 = vmul.f32 %v2579_v37, %v2579_v37 }
  0x68   :  { %6725 = vst [vmem:[#allocation74_spill] sm:$0xff] %v2659_v29  ;;  %6726 = vst [vmem:[#allocation75_spill] sm:$0xff] %v2661_v33  ;;  %v2669_v30 = vmax.f32 %v133_v14, 1e-06  ;;  %v2671_v40 = vmax.f32 %v134_v9, 1e-06 }
  0x69   :  { %6727 = vst [vmem:[#allocation76_spill] sm:$0xff] %v2665_v50  ;;  %6728 = vst [vmem:[#allocation77_spill] sm:$0xff] %v2667_v48  ;;  %v151_v6 = vld [vmem:[#allocation4 + $0x608] sm:$0xff]  ;;  %v152_v15 = vld [vmem:[#allocation4 + $0x610] sm:$0xff]  ;;  %v2677_v39 = vmax.f32 %v135_v20, 1e-06  ;;  %v2695_v20 = vmul.f32 %v2581_v38, %v2581_v38 }
  0x6a   :  { %6729 = vst [vmem:[#allocation78_spill] sm:$0xff] %v2669_v30  ;;  %6730 = vst [vmem:[#allocation79_spill] sm:$0xff] %v2671_v40  ;;  %v2679_v31 = vmax.f32 %v136_v22, 1e-06  ;;  %v2681_v50 = vmax.f32 %v137_v45, 1e-06 }
  0x6b   :  { %6731 = vst [vmem:[#allocation80_spill] sm:$0xff] %v2675_v4  ;;  %6732 = vst [vmem:[#allocation81_spill] sm:$0xff] %v2677_v39  ;;  %v153_v14 = vld [vmem:[#allocation4 + $0x618] sm:$0xff]  ;;  %v154_v9 = vld [vmem:[#allocation4 + $0x620] sm:$0xff]  ;;  %v2687_v32 = vmax.f32 %v138_v27, 1e-06  ;;  %v2705_v27 = vmul.f32 %v2587_v41, %v2587_v41 }
  0x6c   :  { %6733 = vst [vmem:[#allocation82_spill] sm:$0xff] %v2679_v31  ;;  %6734 = vst [vmem:[#allocation83_spill] sm:$0xff] %v2681_v50  ;;  %v155_v62 = vld [vmem:[#allocation4 + $0x628] sm:$0xff]  ;;  %v2689_v36 = vmax.f32 %v139_v28, 1e-06  ;;  %v156_v22 = vld [vmem:[#allocation4 + $0x630] sm:$0xff] }
  0x6d   :  { %6735 = vst [vmem:[#allocation84_spill] sm:$0xff] %v2685_v13  ;;  %6736 = vst [vmem:[#allocation85_spill] sm:$0xff] %v2687_v32  ;;  %v2691_v4 = vmax.f32 %v140_v59, 1e-06  ;;  %v157_v45 = vld [vmem:[#allocation4 + $0x638] sm:$0xff]  ;;  %v158_v1 = vld [vmem:[#allocation4 + $0x640] sm:$0xff] }
  0x6e   :  { %6737 = vst [vmem:[#allocation86_spill] sm:$0xff] %v2689_v36  ;;  %6739 = vst [vmem:[#allocation88_spill] sm:$0xff] %v2695_v20  ;;  %v2697_v25 = vmax.f32 %v141_v34, 1e-06  ;;  %v2699_v37 = vmax.f32 %v142_v35, 1e-06  ;;  %v2715_v34 = vmul.f32 %v2589_v46, %v2589_v46 }
  0x6f   :  { %6738 = vst [vmem:[#allocation87_spill] sm:$0xff] %v2691_v4  ;;  %v2701_v13 = vmax.f32 %v143_v12, 1e-06  ;;  %6743 = vst [vmem:[#allocation92_spill] sm:$0xff] %v2705_v27  ;;  %v159_v28 = vld [vmem:[#allocation4 + $0x648] sm:$0xff]  ;;  %v160_v59 = vld [vmem:[#allocation4 + $0x650] sm:$0xff] }
  0x70   :  { %6740 = vst [vmem:[#allocation89_spill] sm:$0xff] %v2697_v25  ;;  %6741 = vst [vmem:[#allocation90_spill] sm:$0xff] %v2699_v37  ;;  %v161_v56 = vld [vmem:[#allocation4 + $0x658] sm:$0xff]  ;;  %v2707_v17 = vmax.f32 %v144_v42, 1e-06  ;;  %v162_v35 = vld [vmem:[#allocation4 + $0x660] sm:$0xff]  ;;  %v2725_v42 = vmul.f32 %v2591_v47, %v2591_v47 }
  0x71   :  { %6742 = vst [vmem:[#allocation91_spill] sm:$0xff] %v2701_v13  ;;  %v2709_v38 = vmax.f32 %v145_v44, 1e-06  ;;  %v2711_v20 = vmax.f32 %v146_v23, 1e-06  ;;  %6747 = vst [vmem:[#allocation96_spill] sm:$0xff] %v2715_v34 }
  0x72   :  { %6744 = vst [vmem:[#allocation93_spill] sm:$0xff] %v2707_v17  ;;  %v163_v12 = vld [vmem:[#allocation4 + $0x668] sm:$0xff]  ;;  %v164_v49 = vld [vmem:[#allocation4 + $0x670] sm:$0xff]  ;;  %v2717_v7 = vmax.f32 %v147_v53, 1e-06  ;;  %6751 = vst [vmem:[#allocation100_spill] sm:$0xff] %v2725_v42  ;;  %v2735_v53 = vmul.f32 %v2597_v55, %v2597_v55 }
  0x73   :  { %6745 = vst [vmem:[#allocation94_spill] sm:$0xff] %v2709_v38  ;;  %6746 = vst [vmem:[#allocation95_spill] sm:$0xff] %v2711_v20  ;;  %v2719_v41 = vmax.f32 %v148_v54, 1e-06  ;;  %v2721_v27 = vmax.f32 %v149_v16, 1e-06 }
  0x74   :  { %6748 = vst [vmem:[#allocation97_spill] sm:$0xff] %v2717_v7  ;;  %v165_v44 = vld [vmem:[#allocation4 + $0x678] sm:$0xff]  ;;  %v166_v23 = vld [vmem:[#allocation4 + $0x700] sm:$0xff]  ;;  %v167_v43 = vld [vmem:[#allocation4 + $0x708] sm:$0xff]  ;;  %v2727_v20 = vmax.f32 %v150_v5, 1e-06  ;;  %v2745_v5 = vmul.f32 %v2599_v60, %v2599_v60 }
  0x75   :  { %6749 = vst [vmem:[#allocation98_spill] sm:$0xff] %v2719_v41  ;;  %6750 = vst [vmem:[#allocation99_spill] sm:$0xff] %v2721_v27  ;;  %v2729_v46 = vmax.f32 %v151_v6, 1e-06  ;;  %v2731_v34 = vmax.f32 %v152_v15, 1e-06 }
  0x76   :  { %6752 = vst [vmem:[#allocation101_spill] sm:$0xff] %v2727_v20  ;;  %6755 = vst [vmem:[#allocation104_spill] sm:$0xff] %v2735_v53  ;;  %v168_v54 = vld [vmem:[#allocation4 + $0x710] sm:$0xff]  ;;  %v169_v16 = vld [vmem:[#allocation4 + $0x718] sm:$0xff]  ;;  %v2737_v41 = vmax.f32 %v153_v14, 1e-06  ;;  %v2755_v14 = vmul.f32 %v2601_v61, %v2601_v61 }
  0x77   :  { %6753 = vst [vmem:[#allocation102_spill] sm:$0xff] %v2729_v46  ;;  %6754 = vst [vmem:[#allocation103_spill] sm:$0xff] %v2731_v34  ;;  %v170_v27 = vld [vmem:[#allocation4 + $0x720] sm:$0xff]  ;;  %v2739_v47 = vmax.f32 %v154_v9, 1e-06  ;;  %v171_v6 = vld [vmem:[#allocation4 + $0x728] sm:$0xff] }
  0x78   :  { %6756 = vst [vmem:[#allocation105_spill] sm:$0xff] %v2737_v41  ;;  %v2741_v42 = vmax.f32 %v155_v62, 1e-06  ;;  %6759 = vst [vmem:[#allocation108_spill] sm:$0xff] %v2745_v5  ;;  %v172_v15 = vld [vmem:[#allocation4 + $0x730] sm:$0xff]  ;;  %v173_v34 = vld [vmem:[#allocation4 + $0x738] sm:$0xff] }
  0x79   :  { %6757 = vst [vmem:[#allocation106_spill] sm:$0xff] %v2739_v47  ;;  %v2747_v46 = vmax.f32 %v156_v22, 1e-06  ;;  %v2749_v55 = vmax.f32 %v157_v45, 1e-06  ;;  %6763 = vst [vmem:[#allocation112_spill] sm:$0xff] %v2755_v14  ;;  %v2765_v22 = vmul.f32 %v2607_v58, %v2607_v58 }
  0x7a   :  { %6758 = vst [vmem:[#allocation107_spill] sm:$0xff] %v2741_v42  ;;  %v2751_v53 = vmax.f32 %v158_v1, 1e-06  ;;  %v174_v9 = vld [vmem:[#allocation4 + $0x740] sm:$0xff]  ;;  %v175_v62 = vld [vmem:[#allocation4 + $0x748] sm:$0xff]  ;;  %v176_v42 = vld [vmem:[#allocation4 + $0x750] sm:$0xff] }
  0x7b   :  { %6760 = vst [vmem:[#allocation109_spill] sm:$0xff] %v2747_v46  ;;  %6761 = vst [vmem:[#allocation110_spill] sm:$0xff] %v2749_v55  ;;  %v2757_v47 = vmax.f32 %v159_v28, 1e-06  ;;  %v2759_v60 = vmax.f32 %v160_v59, 1e-06  ;;  %v2775_v28 = vmul.f32 %v2609_v18, %v2609_v18 }
  0x7c   :  { %6762 = vst [vmem:[#allocation111_spill] sm:$0xff] %v2751_v53  ;;  %v2761_v5 = vmax.f32 %v161_v56, 1e-06  ;;  %6767 = vst [vmem:[#allocation116_spill] sm:$0xff] %v2765_v22  ;;  %v177_v45 = vld [vmem:[#allocation4 + $0x758] sm:$0xff]  ;;  %v178_v1 = vld [vmem:[#allocation4 + $0x760] sm:$0xff] }
  0x7d   :  { %6764 = vst [vmem:[#allocation113_spill] sm:$0xff] %v2757_v47  ;;  %6765 = vst [vmem:[#allocation114_spill] sm:$0xff] %v2759_v60  ;;  %v179_v53 = vld [vmem:[#allocation4 + $0x768] sm:$0xff]  ;;  %v2767_v55 = vmax.f32 %v162_v35, 1e-06  ;;  %v180_v59 = vld [vmem:[#allocation4 + $0x770] sm:$0xff]  ;;  %v2785_v35 = vmul.f32 %v2611_v52, %v2611_v52  ;;  %v2805_v52 = vmul.f32 %v2619_v3, %v2619_v3  ;;  %v2825_v3 = vmul.f32 %v2627_v0, %v2627_v0 }
  0x7e   :  { %6766 = vst [vmem:[#allocation115_spill] sm:$0xff] %v2761_v5  ;;  %v2769_v61 = vmax.f32 %v163_v12, 1e-06  ;;  %v2771_v14 = vmax.f32 %v164_v49, 1e-06  ;;  %6771 = vst [vmem:[#allocation120_spill] sm:$0xff] %v2775_v28  ;;  %v2795_v28 = vmul.f32 %v2617_v51, %v2617_v51  ;;  %v2815_v51 = vmul.f32 %v2621_v2, %v2621_v2 }
  0x7f   :  { %6768 = vst [vmem:[#allocation117_spill] sm:$0xff] %v2767_v55  ;;  %v181_v56 = vld [vmem:[#allocation4 + $0x778] sm:$0xff]  ;;  %v2777_v5 = vmax.f32 %v165_v44, 1e-06  ;;  %v2779_v60 = vmax.f32 %v166_v23, 1e-06 }
  0x80   :  { %6769 = vst [vmem:[#allocation118_spill] sm:$0xff] %v2769_v61  ;;  %6770 = vst [vmem:[#allocation119_spill] sm:$0xff] %v2771_v14  ;;  %v2781_v22 = vmax.f32 %v167_v43, 1e-06  ;;  %v2787_v12 = vmax.f32 %v168_v54, 1e-06 }
  0x81   :  { %6772 = vst [vmem:[#allocation121_spill] sm:$0xff] %v2777_v5  ;;  %6773 = vst [vmem:[#allocation122_spill] sm:$0xff] %v2779_v60  ;;  %v2789_v49 = vmax.f32 %v169_v16, 1e-06  ;;  %v2791_v58 = vmax.f32 %v170_v27, 1e-06 }
  0x82   :  { %6774 = vst [vmem:[#allocation123_spill] sm:$0xff] %v2781_v22  ;;  %6775 = vst [vmem:[#allocation124_spill] sm:$0xff] %v2787_v12  ;;  %v2797_v44 = vmax.f32 %v171_v6, 1e-06  ;;  %v2799_v23 = vmax.f32 %v172_v15, 1e-06 }
  0x83   :  { %6776 = vst [vmem:[#allocation125_spill] sm:$0xff] %v2789_v49  ;;  %6777 = vst [vmem:[#allocation126_spill] sm:$0xff] %v2791_v58  ;;  %v2801_v43 = vmax.f32 %v173_v34, 1e-06  ;;  %v2807_v54 = vmax.f32 %v174_v9, 1e-06 }
  0x84   :  { %6778 = vst [vmem:[#allocation127_spill] sm:$0xff] %v2797_v44  ;;  %6779 = vst [vmem:[#allocation128_spill] sm:$0xff] %v2799_v23  ;;  %v2809_v16 = vmax.f32 %v175_v62, 1e-06  ;;  %v2811_v27 = vmax.f32 %v176_v42, 1e-06  ;;  %v2833_v42 = vmul.f32 %v2629_v21, %v2629_v21 }
  0x85   :  { %6780 = vst [vmem:[#allocation129_spill] sm:$0xff] %v2801_v43  ;;  %6781 = vst [vmem:[#allocation130_spill] sm:$0xff] %v2807_v54  ;;  %v2817_v6 = vmax.f32 %v177_v45, 1e-06  ;;  %v2819_v15 = vmax.f32 %v178_v1, 1e-06  ;;  %v2837_v45 = vmul.f32 %v2631_v57, %v2631_v57  ;;  %v2845_v1 = vmul.f32 %v2639_v8, %v2639_v8 }
  0x86   :  { %6782 = vst [vmem:[#allocation131_spill] sm:$0xff] %v2809_v16  ;;  %6783 = vst [vmem:[#allocation132_spill] sm:$0xff] %v2811_v27  ;;  %v2821_v34 = vmax.f32 %v179_v53, 1e-06  ;;  %v2827_v9 = vmax.f32 %v180_v59, 1e-06  ;;  %v2841_v53 = vmul.f32 %v2637_v10, %v2637_v10  ;;  %v2849_v59 = vmul.f32 %v2641_v19, %v2641_v19 }
  0x87   :  { %6784 = vst [vmem:[#allocation133_spill] sm:$0xff] %v2817_v6  ;;  %6785 = vst [vmem:[#allocation134_spill] sm:$0xff] %v2819_v15  ;;  %v2829_v62 = vmax.f32 %v181_v56, 1e-06  ;;  %v2853_v56 = vmul.f32 %v2647_v11, %v2647_v11  ;;  %v2857_v57 = vmul.f32 %v2649_v24, %v2649_v24  ;;  %v2861_v10 = vmul.f32 %v2651_v26, %v2651_v26 }
  0x88   :  { %6786 = vst [vmem:[#allocation135_spill] sm:$0xff] %v2821_v34  ;;  %6787 = vst [vmem:[#allocation136_spill] sm:$0xff] %v2827_v9  ;;  %v2865_v8 = vmul.f32 %v2657_v63, %v2657_v63  ;;  %v2869_v19 = vmul.f32 %v2659_v29, %v2659_v29  ;;  %v2873_v11 = vmul.f32 %v2661_v33, %v2661_v33  ;;  %vm748_vm3 = vcmask 1044484  }
  0x89   :  { %6788 = vst [vmem:[#allocation137_spill] sm:$0xff] %v2829_v62  ;;  %v2877_v24 = vmul.f32 %v2667_v48, %v2667_v48  ;;  %v2881_v26 = vmul.f32 %v2669_v30, %v2669_v30  ;;  %v2885_v63 = vmul.f32 %v2671_v40, %v2671_v40  ;;  %v2889_v29 = vmul.f32 %v2677_v39, %v2677_v39 }
  0x8a   :  { %v2893_v33 = vmul.f32 %v2679_v31, %v2679_v31  ;;  %v2897_v48 = vmul.f32 %v2681_v50, %v2681_v50  ;;  %v2901_v30 = vmul.f32 %v2687_v32, %v2687_v32  ;;  %v2905_v40 = vmul.f32 %v2689_v36, %v2689_v36 }
  0x8b   :  { %v2909_v39 = vmul.f32 %v2691_v4, %v2691_v4  ;;  %v2913_v31 = vmul.f32 %v2697_v25, %v2697_v25  ;;  %v2917_v50 = vmul.f32 %v2699_v37, %v2699_v37  ;;  %v2921_v32 = vmul.f32 %v2701_v13, %v2701_v13 }
  0x8c   :  { %v2925_v36 = vmul.f32 %v2707_v17, %v2707_v17  ;;  %v2929_v4 = vmul.f32 %v2709_v38, %v2709_v38  ;;  %v2937_v37 = vmul.f32 %v2717_v7, %v2717_v7  ;;  %v2949_v38 = vmul.f32 %v2727_v20, %v2727_v20 }
  0x8d   :  { %6789 = vst [vmem:[#allocation138_spill] sm:$0xff] %v2909_v39  ;;  %6790 = vst [vmem:[#allocation139_spill] sm:$0xff] %v2917_v50  ;;  %v6793_v39 = vld [vmem:[#allocation95_spill] sm:$0xff]  ;;  %v6795_v50 = vld [vmem:[#allocation98_spill] sm:$0xff]  ;;  %vm750_vm4 = vcmask 1045509   ;;  %vm752_vm5 = vcmask 1046534  }
  0x8e   :  { %6791 = vst [vmem:[#allocation140_spill] sm:$0xff] %v2921_v32  ;;  %6792 = vst [vmem:[#allocation141_spill] sm:$0xff] %v2929_v4  ;;  %v2933_v25 = vmul.f32 %v6793_v39, %v6793_v39  ;;  %v2941_v13 = vmul.f32 %v6795_v50, %v6795_v50  ;;  %v6797_v32 = vld [vmem:[#allocation99_spill] sm:$0xff]  ;;  %v6799_v4 = vld [vmem:[#allocation102_spill] sm:$0xff]  ;;  %v2961_v50 = vmul.f32 %v2737_v41, %v2737_v41  ;;  %vm754_vm6 = vcmask 1047559  }
  0x8f   :  { %v2945_v17 = vmul.f32 %v6797_v32, %v6797_v32  ;;  %v2953_v39 = vmul.f32 %v6799_v4, %v6799_v4  ;;  %v2973_v4 = vmul.f32 %v2747_v46, %v2747_v46 }
  0x90   :  { %6794 = vst [vmem:[#allocation142_spill] sm:$0xff] %v2933_v25  ;;  %6796 = vst [vmem:[#allocation143_spill] sm:$0xff] %v2941_v13  ;;  %v6801_v25 = vld [vmem:[#allocation103_spill] sm:$0xff]  ;;  %v6803_v13 = vld [vmem:[#allocation106_spill] sm:$0xff] }
  0x91   :  { %6798 = vst [vmem:[#allocation144_spill] sm:$0xff] %v2945_v17  ;;  %6800 = vst [vmem:[#allocation145_spill] sm:$0xff] %v2953_v39  ;;  %v2957_v7 = vmul.f32 %v6801_v25, %v6801_v25  ;;  %v2965_v32 = vmul.f32 %v6803_v13, %v6803_v13  ;;  %v6805_v17 = vld [vmem:[#allocation107_spill] sm:$0xff]  ;;  %v6807_v39 = vld [vmem:[#allocation110_spill] sm:$0xff]  ;;  %v2985_v13 = vmul.f32 %v2757_v47, %v2757_v47 }
  0x92   :  { %v2969_v20 = vmul.f32 %v6805_v17, %v6805_v17  ;;  %v2977_v25 = vmul.f32 %v6807_v39, %v6807_v39  ;;  %v2997_v39 = vmul.f32 %v2767_v55, %v2767_v55  ;;  %v3005_v47 = vmul.f32 %v2771_v14, %v2771_v14 }
  0x93   :  { %6802 = vst [vmem:[#allocation146_spill] sm:$0xff] %v2957_v7  ;;  %6804 = vst [vmem:[#allocation147_spill] sm:$0xff] %v2965_v32  ;;  %v6808_v7 = vld [vmem:[#allocation111_spill] sm:$0xff]  ;;  %v6809_v32 = vld [vmem:[#allocation114_spill] sm:$0xff]  ;;  %v3017_v55 = vmul.f32 %v2781_v22, %v2781_v22  ;;  %v3025_v14 = vmul.f32 %v2789_v49, %v2789_v49  ;;  %v3037_v22 = vmul.f32 %v2799_v23, %v2799_v23 }
  0x94   :  { %6806 = vst [vmem:[#allocation148_spill] sm:$0xff] %v2969_v20  ;;  %v2981_v41 = vmul.f32 %v6808_v7, %v6808_v7  ;;  %v2989_v17 = vmul.f32 %v6809_v32, %v6809_v32  ;;  %v6810_v20 = vld [vmem:[#allocation115_spill] sm:$0xff]  ;;  %v3001_v7 = vmul.f32 %v2769_v61, %v2769_v61  ;;  %v3009_v32 = vmul.f32 %v2777_v5, %v2777_v5 }
  0x95   :  { %v2993_v46 = vmul.f32 %v6810_v20, %v6810_v20  ;;  %v3013_v20 = vmul.f32 %v2779_v60, %v2779_v60  ;;  %v3021_v61 = vmul.f32 %v2787_v12, %v2787_v12  ;;  %v3029_v5 = vmul.f32 %v2791_v58, %v2791_v58  ;;  %6813 = vst [vmem:[#allocation151_spill] sm:$0xff] %v3037_v22  ;;  %v6833_v22 = vld [vmem:[#allocation44_spill] sm:$0xff] }
  0x96   :  { %v3033_v60 = vmul.f32 %v2797_v44, %v2797_v44  ;;  %v3041_v12 = vmul.f32 %v2801_v43, %v2801_v43  ;;  %v3045_v49 = vmul.f32 %v2807_v54, %v2807_v54  ;;  %v3049_v58 = vmul.f32 %v2809_v16, %v2809_v16 }
  0x97   :  { %6811 = vst [vmem:[#allocation149_spill] sm:$0xff] %v3029_v5  ;;  %v3053_v44 = vmul.f32 %v2811_v27, %v2811_v27  ;;  %v3057_v23 = vmul.f32 %v2817_v6, %v2817_v6  ;;  %v3061_v43 = vmul.f32 %v2819_v15, %v2819_v15  ;;  %v3065_v54 = vmul.f32 %v2821_v34, %v2821_v34  ;;  %v6839_v5 = vld [vmem:[#allocation52_spill] sm:$0xff] }
  0x98   :  { %6812 = vst [vmem:[#allocation150_spill] sm:$0xff] %v3033_v60  ;;  %6814 = vst [vmem:[#allocation152_spill] sm:$0xff] %v3041_v12  ;;  %v3069_v16 = vmul.f32 %v2827_v9, %v2827_v9  ;;  %v3073_v27 = vmul.f32 %v2829_v62, %v2829_v62  ;;  %v6830_v12 = vld [vmem:[#allocation40_spill] sm:$0xff] }
  0x99   :  { %6815 = vst [vmem:[#allocation153_spill] sm:$0xff] %v3045_v49  ;;  %6816 = vst [vmem:[#allocation154_spill] sm:$0xff] %v3049_v58  ;;  %v6824_v58 = vld [vmem:[#allocation30_spill] sm:$0xff]  ;;  %v6827_v49 = vld [vmem:[#allocation35_spill] sm:$0xff] }
  0x9a   :  { %6817 = vst [vmem:[#allocation155_spill] sm:$0xff] %v3053_v44  ;;  %6818 = vst [vmem:[#allocation156_spill] sm:$0xff] %v3057_v23  ;;  %v6823_v44 = vld [vmem:[#allocation16_spill] sm:$0xff]  ;;  %v6826_v23 = vld [vmem:[#allocation18_spill] sm:$0xff] }
  0x9b   :  { %6819 = vst [vmem:[#allocation157_spill] sm:$0xff] %v3061_v43  ;;  %6820 = vst [vmem:[#allocation158_spill] sm:$0xff] %v3065_v54  ;;  %v3077_v6 = vmul.f32 %v6824_v58, %v6823_v44  ;;  %v3081_v15 = vmul.f32 %v6827_v49, %v6826_v23  ;;  %v6829_v43 = vld [vmem:[#allocation21_spill] sm:$0xff]  ;;  %v6836_v60 = vld [vmem:[#allocation48_spill] sm:$0xff] }
  0x9c   :  { %6821 = vst [vmem:[#allocation159_spill] sm:$0xff] %v3069_v16  ;;  %6822 = vst [vmem:[#allocation160_spill] sm:$0xff] %v3073_v27  ;;  %v3085_v34 = vmul.f32 %v6830_v12, %v6829_v43  ;;  %v6832_v54 = vld [vmem:[#allocation25_spill] sm:$0xff]  ;;  %v6841_v44 = vld [vmem:[#allocation34_spill] sm:$0xff] }
  0x9d   :  { %6825 = vst [vmem:[#allocation16_spill] sm:$0xff] %v3077_v6  ;;  %6828 = vst [vmem:[#allocation30_spill] sm:$0xff] %v3081_v15  ;;  %v3089_v9 = vmul.f32 %v6833_v22, %v6832_v54  ;;  %v6835_v16 = vld [vmem:[#allocation29_spill] sm:$0xff]  ;;  %v6842_v6 = vld [vmem:[#allocation56_spill] sm:$0xff] }
  0x9e   :  { %6831 = vst [vmem:[#allocation18_spill] sm:$0xff] %v3085_v34  ;;  %v3093_v62 = vmul.f32 %v6836_v60, %v6835_v16  ;;  %v6838_v27 = vld [vmem:[#allocation33_spill] sm:$0xff]  ;;  %v3101_v49 = vmul.f32 %v6842_v6, %v6841_v44  ;;  %v6845_v15 = vld [vmem:[#allocation59_spill] sm:$0xff]  ;;  %v6847_v43 = vld [vmem:[#allocation38_spill] sm:$0xff] }
  0x9f   :  { %6834 = vst [vmem:[#allocation35_spill] sm:$0xff] %v3089_v9  ;;  %v3097_v58 = vmul.f32 %v6839_v5, %v6838_v27  ;;  %v6844_v23 = vld [vmem:[#allocation37_spill] sm:$0xff]  ;;  %v6848_v34 = vld [vmem:[#allocation62_spill] sm:$0xff]  ;;  %v6850_v54 = vld [vmem:[#allocation39_spill] sm:$0xff] }
  0xa0   :  { %6837 = vst [vmem:[#allocation21_spill] sm:$0xff] %v3093_v62  ;;  %6843 = vst [vmem:[#allocation25_spill] sm:$0xff] %v3101_v49  ;;  %v3105_v12 = vmul.f32 %v6845_v15, %v6844_v23  ;;  %v3109_v22 = vmul.f32 %v6848_v34, %v6847_v43  ;;  %v6851_v9 = vld [vmem:[#allocation64_spill] sm:$0xff]  ;;  %v6853_v16 = vld [vmem:[#allocation41_spill] sm:$0xff] }
  0xa1   :  { %6840 = vst [vmem:[#allocation40_spill] sm:$0xff] %v3097_v58  ;;  %v3113_v60 = vmul.f32 %v6851_v9, %v6850_v54  ;;  %v6854_v62 = vld [vmem:[#allocation68_spill] sm:$0xff]  ;;  %v6856_v27 = vld [vmem:[#allocation42_spill] sm:$0xff]  ;;  %v6859_v44 = vld [vmem:[#allocation43_spill] sm:$0xff] }
  0xa2   :  { %6846 = vst [vmem:[#allocation44_spill] sm:$0xff] %v3105_v12  ;;  %6849 = vst [vmem:[#allocation29_spill] sm:$0xff] %v3109_v22  ;;  %v3117_v5 = vmul.f32 %v6854_v62, %v6853_v16  ;;  %v6857_v58 = vld [vmem:[#allocation72_spill] sm:$0xff]  ;;  %v6862_v23 = vld [vmem:[#allocation45_spill] sm:$0xff] }
  0xa3   :  { %6852 = vst [vmem:[#allocation48_spill] sm:$0xff] %v3113_v60  ;;  %v3121_v6 = vmul.f32 %v6857_v58, %v6856_v27  ;;  %v6860_v49 = vld [vmem:[#allocation76_spill] sm:$0xff]  ;;  %v6865_v43 = vld [vmem:[#allocation46_spill] sm:$0xff]  ;;  %v6868_v54 = vld [vmem:[#allocation47_spill] sm:$0xff] }
  0xa4   :  { %6855 = vst [vmem:[#allocation33_spill] sm:$0xff] %v3117_v5  ;;  %v3125_v15 = vmul.f32 %v6860_v49, %v6859_v44  ;;  %v6863_v12 = vld [vmem:[#allocation80_spill] sm:$0xff]  ;;  %v6871_v16 = vld [vmem:[#allocation49_spill] sm:$0xff]  ;;  %v6874_v27 = vld [vmem:[#allocation50_spill] sm:$0xff] }
  0xa5   :  { %6858 = vst [vmem:[#allocation52_spill] sm:$0xff] %v3121_v6  ;;  %v3129_v34 = vmul.f32 %v6863_v12, %v6862_v23  ;;  %v6866_v22 = vld [vmem:[#allocation84_spill] sm:$0xff]  ;;  %v6876_v44 = vld [vmem:[#allocation51_spill] sm:$0xff]  ;;  %v6878_v23 = vld [vmem:[#allocation53_spill] sm:$0xff] }
  0xa6   :  { %6861 = vst [vmem:[#allocation34_spill] sm:$0xff] %v3125_v15  ;;  %v3133_v9 = vmul.f32 %v6866_v22, %v6865_v43  ;;  %v6869_v60 = vld [vmem:[#allocation88_spill] sm:$0xff]  ;;  %v6880_v43 = vld [vmem:[#allocation54_spill] sm:$0xff] }
  0xa7   :  { %6864 = vst [vmem:[#allocation56_spill] sm:$0xff] %v3129_v34  ;;  %v3137_v62 = vmul.f32 %v6869_v60, %v6868_v54  ;;  %v6872_v5 = vld [vmem:[#allocation92_spill] sm:$0xff]  ;;  %v6883_v54 = vld [vmem:[#allocation55_spill] sm:$0xff] }
  0xa8   :  { %6867 = vst [vmem:[#allocation37_spill] sm:$0xff] %v3133_v9  ;;  %v3141_v58 = vmul.f32 %v6872_v5, %v6871_v16  ;;  %v6875_v6 = vld [vmem:[#allocation96_spill] sm:$0xff]  ;;  %v6886_v16 = vld [vmem:[#allocation57_spill] sm:$0xff] }
  0xa9   :  { %6870 = vst [vmem:[#allocation59_spill] sm:$0xff] %v3137_v62  ;;  %v3145_v49 = vmul.f32 %v6875_v6, %v6874_v27  ;;  %v6877_v15 = vld [vmem:[#allocation100_spill] sm:$0xff] }
  0xaa   :  { %6873 = vst [vmem:[#allocation38_spill] sm:$0xff] %v3141_v58  ;;  %v3149_v12 = vmul.f32 %v6877_v15, %v6876_v44  ;;  %v6879_v34 = vld [vmem:[#allocation104_spill] sm:$0xff]  ;;  %v6891_v44 = vld [vmem:[#allocation58_spill] sm:$0xff] }
  0xab   :  { %v3153_v22 = vmul.f32 %v6879_v34, %v6878_v23  ;;  %v6881_v9 = vld [vmem:[#allocation108_spill] sm:$0xff]  ;;  %v3173_v34 = vmul.f32 %v2785_v35, %v6891_v44  ;;  %v6896_v35 = vld [vmem:[#allocation63_spill] sm:$0xff] }
  0xac   :  { %v3157_v60 = vmul.f32 %v6881_v9, %v6880_v43  ;;  %v6884_v62 = vld [vmem:[#allocation112_spill] sm:$0xff]  ;;  %v6895_v43 = vld [vmem:[#allocation61_spill] sm:$0xff] }
  0xad   :  { %v3161_v5 = vmul.f32 %v6884_v62, %v6883_v54  ;;  %v6887_v58 = vld [vmem:[#allocation116_spill] sm:$0xff]  ;;  %6892 = vst [vmem:[#allocation68_spill] sm:$0xff] %v3173_v34  ;;  %v502_v62 = vmul.f32 %v2805_v52, %v6895_v43  ;;  %v503_v54 = vmul.f32 %v2815_v51, %v2621_v2  ;;  %v6898_v52 = vld [vmem:[#allocation66_spill] sm:$0xff]  ;;  %v6899_v51 = vld [vmem:[#allocation67_spill] sm:$0xff] }
  0xae   :  { %6882 = vst [vmem:[#allocation62_spill] sm:$0xff] %v3157_v60  ;;  %v3165_v6 = vmul.f32 %v6887_v58, %v6886_v16  ;;  %v6889_v27 = vld [vmem:[#allocation120_spill] sm:$0xff]  ;;  %v3185_v58 = vmul.f32 %v2825_v3, %v2627_v0  ;;  %v3193_v16 = vmul.f32 %v2837_v45, %v6896_v35  ;;  %v3201_v44 = vmul.f32 %v2845_v1, %v6898_v52  ;;  %v6900_v2 = vld [vmem:[#allocation69_spill] sm:$0xff]  ;;  %v6901_v3 = vld [vmem:[#allocation70_spill] sm:$0xff] }
  0xaf   :  { %6885 = vst [vmem:[#allocation39_spill] sm:$0xff] %v3161_v5  ;;  %v3169_v15 = vmul.f32 %v6889_v27, %v2609_v18  ;;  %v6893_v23 = vld [vmem:[#allocation60_spill] sm:$0xff]  ;;  %v3189_v18 = vmul.f32 %v2833_v42, %v2629_v21  ;;  %v3205_v0 = vmul.f32 %v2849_v59, %v6899_v51  ;;  %v3209_v21 = vmul.f32 %v2853_v56, %v6900_v2  ;;  %v6902_v45 = vld [vmem:[#allocation71_spill] sm:$0xff]  ;;  %v6906_v43 = vld [vmem:[#allocation74_spill] sm:$0xff] }
  0xb0   :  { %6888 = vst [vmem:[#allocation64_spill] sm:$0xff] %v3165_v6  ;;  %v3177_v9 = vmul.f32 %v2795_v28, %v6893_v23  ;;  %v6897_v28 = vld [vmem:[#allocation65_spill] sm:$0xff]  ;;  %v3213_v42 = vmul.f32 %v2857_v57, %v6901_v3  ;;  %v3225_v59 = vmul.f32 %v2869_v19, %v6906_v43  ;;  %v6908_v35 = vld [vmem:[#allocation75_spill] sm:$0xff]  ;;  %v6912_v52 = vld [vmem:[#allocation78_spill] sm:$0xff]  ;;  %v650_v5 = vadd.f32 %v503_v54, %v502_v62 }
  0xb1   :  { %6890 = vst [vmem:[#allocation41_spill] sm:$0xff] %v3169_v15  ;;  %v3197_v27 = vmul.f32 %v2841_v53, %v6897_v28  ;;  %v3217_v53 = vmul.f32 %v2861_v10, %v6902_v45  ;;  %v6904_v23 = vld [vmem:[#allocation73_spill] sm:$0xff]  ;;  %v3229_v56 = vmul.f32 %v2873_v11, %v6908_v35  ;;  %v3237_v10 = vmul.f32 %v2881_v26, %v6912_v52  ;;  %v6914_v51 = vld [vmem:[#allocation79_spill] sm:$0xff]  ;;  %v6916_v19 = vld [vmem:[#allocation82_spill] sm:$0xff] }
  0xb2   :  { %6894 = vst [vmem:[#allocation42_spill] sm:$0xff] %v3177_v9  ;;  %v3221_v1 = vmul.f32 %v2865_v8, %v6904_v23  ;;  %6907 = vst [vmem:[#allocation76_spill] sm:$0xff] %v3225_v59  ;;  %v6910_v28 = vld [vmem:[#allocation77_spill] sm:$0xff]  ;;  %v518_v8 = vmul.f32 %v2885_v63, %v6914_v51  ;;  %v520_v45 = vmul.f32 %v2893_v33, %v6916_v19  ;;  %v6917_v23 = vld [vmem:[#allocation83_spill] sm:$0xff] }
  0xb3   :  { %6903 = vst [vmem:[#allocation72_spill] sm:$0xff] %v3217_v53  ;;  %6909 = vst [vmem:[#allocation45_spill] sm:$0xff] %v3229_v56  ;;  %v3233_v57 = vmul.f32 %v2877_v24, %v6910_v28  ;;  %v6915_v2 = vld [vmem:[#allocation81_spill] sm:$0xff]  ;;  %v521_v11 = vmul.f32 %v2897_v48, %v6917_v23  ;;  %v6919_v35 = vld [vmem:[#allocation86_spill] sm:$0xff] }
  0xb4   :  { %6905 = vst [vmem:[#allocation43_spill] sm:$0xff] %v3221_v1  ;;  %6913 = vst [vmem:[#allocation46_spill] sm:$0xff] %v3237_v10  ;;  %v519_v3 = vmul.f32 %v2889_v29, %v6915_v2  ;;  %v6918_v43 = vld [vmem:[#allocation85_spill] sm:$0xff]  ;;  %v3253_v26 = vmul.f32 %v2905_v40, %v6919_v35  ;;  %v6920_v28 = vld [vmem:[#allocation87_spill] sm:$0xff] }
  0xb5   :  { %6911 = vst [vmem:[#allocation80_spill] sm:$0xff] %v3233_v57  ;;  %v3249_v24 = vmul.f32 %v2901_v30, %v6918_v43  ;;  %v6921_v52 = vld [vmem:[#allocation138_spill] sm:$0xff]  ;;  %v6922_v51 = vld [vmem:[#allocation89_spill] sm:$0xff]  ;;  %v6924_v2 = vld [vmem:[#allocation139_spill] sm:$0xff] }
  0xb6   :  { %v3257_v63 = vmul.f32 %v6921_v52, %v6920_v28  ;;  %v3261_v29 = vmul.f32 %v2913_v31, %v6922_v51  ;;  %v6923_v33 = vld [vmem:[#allocation90_spill] sm:$0xff]  ;;  %v6925_v48 = vld [vmem:[#allocation91_spill] sm:$0xff]  ;;  %v6926_v23 = vld [vmem:[#allocation140_spill] sm:$0xff] }
  0xb7   :  { %v3265_v19 = vmul.f32 %v6924_v2, %v6923_v33  ;;  %v3269_v30 = vmul.f32 %v6926_v23, %v6925_v48  ;;  %v6927_v43 = vld [vmem:[#allocation93_spill] sm:$0xff]  ;;  %v6929_v35 = vld [vmem:[#allocation94_spill] sm:$0xff]  ;;  %v6932_v52 = vld [vmem:[#allocation95_spill] sm:$0xff] }
  0xb8   :  { %v3273_v40 = vmul.f32 %v2925_v36, %v6927_v43  ;;  %v6930_v10 = vld [vmem:[#allocation141_spill] sm:$0xff]  ;;  %v6933_v9 = vld [vmem:[#allocation142_spill] sm:$0xff]  ;;  %v6938_v57 = vld [vmem:[#allocation143_spill] sm:$0xff] }
  0xb9   :  { %v3277_v28 = vmul.f32 %v6930_v10, %v6929_v35  ;;  %v3281_v31 = vmul.f32 %v6933_v9, %v6932_v52  ;;  %v6935_v51 = vld [vmem:[#allocation97_spill] sm:$0xff]  ;;  %v6937_v2 = vld [vmem:[#allocation98_spill] sm:$0xff]  ;;  %v6940_v23 = vld [vmem:[#allocation99_spill] sm:$0xff] }
  0xba   :  { %6928 = vst [vmem:[#allocation84_spill] sm:$0xff] %v3273_v40  ;;  %v3285_v33 = vmul.f32 %v2937_v37, %v6935_v51  ;;  %v3289_v48 = vmul.f32 %v6938_v57, %v6937_v2  ;;  %v6941_v34 = vld [vmem:[#allocation144_spill] sm:$0xff]  ;;  %v6943_v43 = vld [vmem:[#allocation101_spill] sm:$0xff]  ;;  %v6944_v35 = vld [vmem:[#allocation102_spill] sm:$0xff] }
  0xbb   :  { %6931 = vst [vmem:[#allocation47_spill] sm:$0xff] %v3277_v28  ;;  %6934 = vst [vmem:[#allocation88_spill] sm:$0xff] %v3281_v31  ;;  %v3293_v36 = vmul.f32 %v6941_v34, %v6940_v23  ;;  %v534_v10 = vmul.f32 %v2949_v38, %v6943_v43  ;;  %v6945_v56 = vld [vmem:[#allocation145_spill] sm:$0xff]  ;;  %v6946_v9 = vld [vmem:[#allocation103_spill] sm:$0xff] }
  0xbc   :  { %6936 = vst [vmem:[#allocation49_spill] sm:$0xff] %v3285_v33  ;;  %6939 = vst [vmem:[#allocation92_spill] sm:$0xff] %v3289_v48  ;;  %v535_v15 = vmul.f32 %v6945_v56, %v6944_v35  ;;  %v6947_v52 = vld [vmem:[#allocation146_spill] sm:$0xff]  ;;  %v6948_v59 = vld [vmem:[#allocation105_spill] sm:$0xff] }
  0xbd   :  { %6942 = vst [vmem:[#allocation50_spill] sm:$0xff] %v3293_v36  ;;  %v536_v31 = vmul.f32 %v6947_v52, %v6946_v9  ;;  %v537_v37 = vmul.f32 %v2961_v50, %v6948_v59  ;;  %v6949_v51 = vld [vmem:[#allocation106_spill] sm:$0xff]  ;;  %v6950_v33 = vld [vmem:[#allocation147_spill] sm:$0xff]  ;;  %v6952_v48 = vld [vmem:[#allocation148_spill] sm:$0xff] }
  0xbe   :  { %v538_v57 = vmul.f32 %v6950_v33, %v6949_v51  ;;  %v6951_v2 = vld [vmem:[#allocation107_spill] sm:$0xff]  ;;  %v6953_v34 = vld [vmem:[#allocation109_spill] sm:$0xff]  ;;  %v6954_v38 = vld [vmem:[#allocation110_spill] sm:$0xff] }
  0xbf   :  { %v539_v6 = vmul.f32 %v6952_v48, %v6951_v2  ;;  %v3309_v23 = vmul.f32 %v2973_v4, %v6953_v34  ;;  %v3313_v43 = vmul.f32 %v2977_v25, %v6954_v38  ;;  %v6955_v56 = vld [vmem:[#allocation111_spill] sm:$0xff]  ;;  %v6956_v9 = vld [vmem:[#allocation113_spill] sm:$0xff]  ;;  %v6957_v59 = vld [vmem:[#allocation114_spill] sm:$0xff] }
  0xc0   :  { %v3317_v35 = vmul.f32 %v2981_v41, %v6955_v56  ;;  %v3321_v50 = vmul.f32 %v2985_v13, %v6956_v9  ;;  %v3325_v33 = vmul.f32 %v2989_v17, %v6957_v59  ;;  %v6959_v48 = vld [vmem:[#allocation115_spill] sm:$0xff]  ;;  %v6961_v52 = vld [vmem:[#allocation117_spill] sm:$0xff]  ;;  %v6963_v51 = vld [vmem:[#allocation118_spill] sm:$0xff] }
  0xc1   :  { %v3329_v4 = vmul.f32 %v2993_v46, %v6959_v48  ;;  %v3333_v25 = vmul.f32 %v2997_v39, %v6961_v52  ;;  %v3337_v41 = vmul.f32 %v3001_v7, %v6963_v51  ;;  %v6965_v2 = vld [vmem:[#allocation119_spill] sm:$0xff]  ;;  %v6967_v34 = vld [vmem:[#allocation121_spill] sm:$0xff]  ;;  %v6969_v38 = vld [vmem:[#allocation122_spill] sm:$0xff] }
  0xc2   :  { %6958 = vst [vmem:[#allocation96_spill] sm:$0xff] %v3325_v33  ;;  %v3341_v13 = vmul.f32 %v3005_v47, %v6965_v2  ;;  %v3345_v17 = vmul.f32 %v3009_v32, %v6967_v34  ;;  %v550_v46 = vmul.f32 %v3013_v20, %v6969_v38  ;;  %v6970_v56 = vld [vmem:[#allocation123_spill] sm:$0xff]  ;;  %v6971_v39 = vld [vmem:[#allocation124_spill] sm:$0xff]  ;;  %v6972_v48 = vld [vmem:[#allocation125_spill] sm:$0xff] }
  0xc3   :  { %6960 = vst [vmem:[#allocation51_spill] sm:$0xff] %v3329_v4  ;;  %6962 = vst [vmem:[#allocation100_spill] sm:$0xff] %v3333_v25  ;;  %v551_v9 = vmul.f32 %v3017_v55, %v6970_v56  ;;  %v552_v59 = vmul.f32 %v3021_v61, %v6971_v39  ;;  %v553_v7 = vmul.f32 %v3025_v14, %v6972_v48  ;;  %v6973_v52 = vld [vmem:[#allocation126_spill] sm:$0xff]  ;;  %v6974_v51 = vld [vmem:[#allocation149_spill] sm:$0xff] }
  0xc4   :  { %6964 = vst [vmem:[#allocation53_spill] sm:$0xff] %v3337_v41  ;;  %6966 = vst [vmem:[#allocation104_spill] sm:$0xff] %v3341_v13  ;;  %v554_v47 = vmul.f32 %v6974_v51, %v6973_v52  ;;  %v6975_v2 = vld [vmem:[#allocation127_spill] sm:$0xff]  ;;  %v6976_v36 = vld [vmem:[#allocation150_spill] sm:$0xff] }
  0xc5   :  { %6968 = vst [vmem:[#allocation54_spill] sm:$0xff] %v3345_v17  ;;  %v555_v13 = vmul.f32 %v6976_v36, %v6975_v2  ;;  %v6977_v32 = vld [vmem:[#allocation128_spill] sm:$0xff]  ;;  %v6978_v34 = vld [vmem:[#allocation151_spill] sm:$0xff]  ;;  %v6979_v41 = vld [vmem:[#allocation129_spill] sm:$0xff]  ;;  %v713_v40 = vadd.f32 %v551_v9, %v550_v46 }
  0xc6   :  { %v556_v17 = vmul.f32 %v6978_v34, %v6977_v32  ;;  %v6980_v20 = vld [vmem:[#allocation152_spill] sm:$0xff]  ;;  %v6981_v25 = vld [vmem:[#allocation130_spill] sm:$0xff]  ;;  %v6982_v55 = vld [vmem:[#allocation153_spill] sm:$0xff] }
  0xc7   :  { %v557_v38 = vmul.f32 %v6980_v20, %v6979_v41  ;;  %v3365_v56 = vmul.f32 %v6982_v55, %v6981_v25  ;;  %v6983_v61 = vld [vmem:[#allocation131_spill] sm:$0xff]  ;;  %v6984_v39 = vld [vmem:[#allocation154_spill] sm:$0xff]  ;;  %v6986_v14 = vld [vmem:[#allocation132_spill] sm:$0xff] }
  0xc8   :  { %v3369_v4 = vmul.f32 %v6984_v39, %v6983_v61  ;;  %v6987_v48 = vld [vmem:[#allocation155_spill] sm:$0xff]  ;;  %v6989_v51 = vld [vmem:[#allocation14_spill] sm:$0xff]  ;;  %v6990_v36 = vld [vmem:[#allocation32_spill] sm:$0xff]  ;;  %v671_v61 = vadd.f32 %v519_v3, %v518_v8  ;;  %v692_v39 = vadd.f32 %v535_v15, %v534_v10 }
  0xc9   :  { %v3373_v52 = vmul.f32 %v6987_v48, %v6986_v14  ;;  %v596_v2 = vadd.f32 %v6990_v36, %v6989_v51  ;;  %v6991_v28 = vld [vmem:[#allocation23_spill] sm:$0xff]  ;;  %v6992_v32 = vld [vmem:[#allocation24_spill] sm:$0xff]  ;;  %v6993_v1 = vld [vmem:[#allocation33_spill] sm:$0xff]  ;;  %v651_v36 = vadd.f32 %v650_v5, %v3185_v58 }
  0xca   :  { %6985 = vst [vmem:[#allocation108_spill] sm:$0xff] %v3369_v4  ;;  %v608_v34 = vadd.f32 %v6992_v32, %v6991_v28  ;;  %v6994_v41 = vld [vmem:[#allocation52_spill] sm:$0xff]  ;;  %v6995_v25 = vld [vmem:[#allocation133_spill] sm:$0xff]  ;;  %v6997_v53 = vld [vmem:[#allocation15_spill] sm:$0xff]  ;;  %v672_v62 = vadd.f32 %v671_v61, %v520_v45  ;;  %v693_v54 = vadd.f32 %v692_v39, %v536_v31 }
  0xcb   :  { %6988 = vst [vmem:[#allocation55_spill] sm:$0xff] %v3373_v52  ;;  %v629_v20 = vadd.f32 %v6994_v41, %v6993_v1  ;;  %v6996_v55 = vld [vmem:[#allocation156_spill] sm:$0xff]  ;;  %v597_v14 = vadd.f32 %v596_v2, %v6997_v53  ;;  %v6998_v48 = vld [vmem:[#allocation26_spill] sm:$0xff]  ;;  %v7001_v32 = vld [vmem:[#allocation157_spill] sm:$0xff]  ;;  %v714_v1 = vadd.f32 %v713_v40, %v552_v59  ;;  %v652_v53 = vadd.f32 %v651_v36, %v3189_v18 }
  0xcc   :  { %v3383_v33 = vmul.f32 %v6996_v55, %v6995_v25  ;;  %v609_v52 = vadd.f32 %v608_v34, %v6998_v48  ;;  %v6999_v60 = vld [vmem:[#allocation34_spill] sm:$0xff]  ;;  %v7002_v41 = vld [vmem:[#allocation17_spill] sm:$0xff]  ;;  %v7003_v8 = vld [vmem:[#allocation27_spill] sm:$0xff]  ;;  %v694_v2 = vadd.f32 %v693_v54, %v537_v37 }
  0xcd   :  { %v630_v51 = vadd.f32 %v629_v20, %v6999_v60  ;;  %v7000_v28 = vld [vmem:[#allocation134_spill] sm:$0xff]  ;;  %v598_v25 = vadd.f32 %v597_v14, %v7002_v41  ;;  %v7004_v3 = vld [vmem:[#allocation56_spill] sm:$0xff]  ;;  %v673_v60 = vadd.f32 %v672_v62, %v521_v11  ;;  %v715_v5 = vadd.f32 %v714_v1, %v553_v7  ;;  %v7006_v58 = vld [vmem:[#allocation19_spill] sm:$0xff] }
  0xce   :  { %v3391_v4 = vmul.f32 %v7001_v32, %v7000_v28  ;;  %v610_v15 = vadd.f32 %v609_v52, %v7003_v8  ;;  %v7005_v46 = vld [vmem:[#allocation28_spill] sm:$0xff]  ;;  %v7007_v20 = vld [vmem:[#allocation31_spill] sm:$0xff]  ;;  %v7008_v45 = vld [vmem:[#allocation37_spill] sm:$0xff]  ;;  %v653_v40 = vadd.f32 %v652_v53, %v3193_v16  ;;  %v695_v18 = vadd.f32 %v694_v2, %v538_v57 }
  0xcf   :  { %v631_v10 = vadd.f32 %v630_v51, %v7004_v3  ;;  %v583_v9 = vrot.slane %v7005_v46, 2  ;;  %v599_v34 = vadd.f32 %v598_v25, %v7006_v58  ;;  %v7009_v59 = vld [vmem:[#allocation135_spill] sm:$0xff]  ;;  %v7010_v61 = vld [vmem:[#allocation158_spill] sm:$0xff]  ;;  %v674_v39 = vadd.f32 %v673_v60, %v3249_v24  ;;  %v7011_v48 = vld [vmem:[#allocation20_spill] sm:$0xff] }
  0xd0   :  { %v611_v55 = vadd.f32 %v610_v15, %v7007_v20  ;;  %v3404_v52 = vmul.f32 %v7010_v61, %v7009_v59  ;;  %v716_v14 = vadd.f32 %v715_v5, %v554_v47  ;;  %v7012_v37 = vld [vmem:[#allocation36_spill] sm:$0xff]  ;;  %v7013_v51 = vld [vmem:[#allocation59_spill] sm:$0xff]  ;;  %v654_v28 = vadd.f32 %v653_v40, %v3197_v27  ;;  %v7014_v1 = vld [vmem:[#allocation22_spill] sm:$0xff] }
  0xd1   :  { %v632_v31 = vadd.f32 %v631_v10, %v7008_v45  ;;  %v600_v11 = vadd.f32 %v599_v34, %v7011_v48  ;;  %v584_v32 = vadd.f32 %v583_v9, %v7005_v46  ;;  %v675_v16 = vadd.f32 %v674_v39, %v3253_v26  ;;  %v7015_v25 = vld [vmem:[#allocation16_spill] sm:$0xff]  ;;  %v7016_v57 = vld [vmem:[#allocation38_spill] sm:$0xff]  ;;  %v7018_v3 = vld [vmem:[#allocation159_spill] sm:$0xff] }
  0xd2   :  { %v612_v7 = vadd.f32 %v611_v55, %v7012_v37  ;;  %v696_v62 = vadd.f32 %v695_v18, %v539_v6  ;;  %v717_v54 = vadd.f32 %v716_v14, %v555_v13  ;;  %v655_v8 = vadd.f32 %v654_v28, %v3201_v44  ;;  %v7017_v15 = vld [vmem:[#allocation136_spill] sm:$0xff]  ;;  %v7019_v6 = vld [vmem:[#allocation30_spill] sm:$0xff] }
  0xd3   :  { %v633_v36 = vadd.f32 %v632_v31, %v7013_v51  ;;  %v601_v41 = vadd.f32 %v600_v11, %v7014_v1  ;;  %v3419_v10 = vmul.f32 %v7018_v3, %v7017_v15  ;;  %v676_v27 = vadd.f32 %v675_v16, %v3257_v63  ;;  %v7020_v20 = vld [vmem:[#allocation18_spill] sm:$0xff]  ;;  %v7022_v45 = vld [vmem:[#allocation160_spill] sm:$0xff]  ;;  %v7025_v11 = vld [vmem:[#allocation21_spill] sm:$0xff] }
  0xd4   :  { %v613_v24 = vadd.f32 %v612_v7, %v7015_v25  ;;  %v697_v53 = vadd.f32 %v696_v62, %v3309_v23  ;;  %v718_v46 = vadd.f32 %v717_v54, %v556_v17  ;;  %v656_v60 = vadd.f32 %v655_v8, %v3205_v0  ;;  %v7021_v17 = vld [vmem:[#allocation137_spill] sm:$0xff]  ;;  %v7024_v14 = vld [vmem:[#allocation108_spill] sm:$0xff]  ;;  %v7026_v37 = vld [vmem:[#allocation62_spill] sm:$0xff] }
  0xd5   :  { %v634_v47 = vadd.f32 %v633_v36, %v7016_v57  ;;  %v602_v26 = vrot.slane %v601_v41, 4  ;;  %v585_v2 = vrot.slane %v584_v32, 1  ;;  %v677_v5 = vadd.f32 %v676_v27, %v3261_v29  ;;  %v760_v61 = vld [vmem:[#allocation4 + $0x80] sm:$0xff]  ;;  %v7027_v7 = vld [vmem:[#allocation72_spill] sm:$0xff]  ;;  %v761_v36 = vld [vmem:[#allocation4 + $0x88] sm:$0xff] }
  0xd6   :  { %v614_v13 = vadd.f32 %v613_v24, %v7019_v6  ;;  %v698_v44 = vadd.f32 %v697_v53, %v3313_v43  ;;  %v719_v58 = vadd.f32 %v718_v46, %v557_v38  ;;  %v657_v23 = vadd.f32 %v656_v60, %v3209_v21  ;;  %v7023_v38 = vld [vmem:[#allocation35_spill] sm:$0xff]  ;;  %v7028_v28 = vld [vmem:[#allocation84_spill] sm:$0xff] }
  0xd7   :  { %v635_v9 = vadd.f32 %v634_v47, %v3145_v49  ;;  %v603_v34 = vadd.f32 %v602_v26, %v601_v41  ;;  %v3433_v31 = vmul.f32 %v7022_v45, %v7021_v17  ;;  %v678_v49 = vadd.f32 %v677_v5, %v3265_v19  ;;  %v7029_v16 = vld [vmem:[#allocation96_spill] sm:$0xff]  ;;  %v7030_v62 = vld [vmem:[#allocation55_spill] sm:$0xff] }
  0xd8   :  { %v615_v55 = vadd.f32 %v614_v13, %v7020_v20  ;;  %v699_v0 = vadd.f32 %v698_v44, %v3317_v35  ;;  %v720_v29 = vadd.f32 %v719_v58, %v3365_v56  ;;  %v586_v21 = vadd.f32 %v585_v2, %v584_v32  ;;  %v7033_v41 = vld [vmem:[#allocation39_spill] sm:$0xff]  ;;  %v763_v46 = vld [vmem:[#allocation4 + $0x98] sm:$0xff] }
  0xd9   :  { %v636_v63 = vadd.f32 %v635_v9, %v3149_v12  ;;  %v604_v43 = vrot.slane %v603_v34, 2  ;;  %v658_v12 = vadd.f32 %v657_v23, %v3213_v42  ;;  %v679_v39 = vadd.f32 %v678_v49, %v3269_v30  ;;  %v7034_v24 = vld [vmem:[#allocation43_spill] sm:$0xff]  ;;  %v7038_v13 = vld [vmem:[#allocation25_spill] sm:$0xff]  ;;  %v7039_v60 = vld [vmem:[#allocation64_spill] sm:$0xff] }
  0xda   :  { %v616_v40 = vadd.f32 %v615_v55, %v7023_v38  ;;  %v700_v18 = vadd.f32 %v699_v0, %v3321_v50  ;;  %v721_v48 = vadd.f32 %v720_v29, %v7024_v14  ;;  %v3450_v54 = vmax.f32 %v760_v61, 1e-06  ;;  %v7032_v50 = vld [vmem:[#allocation40_spill] sm:$0xff]  ;;  %v7035_v8 = vld [vmem:[#allocation47_spill] sm:$0xff]  ;;  %v764_v23 = vld [vmem:[#allocation4 + $0xa0] sm:$0xff] }
  0xdb   :  { %v637_v59 = vadd.f32 %v636_v63, %v3153_v22  ;;  %v605_v19 = vadd.f32 %v604_v43, %v603_v34  ;;  %v659_v51 = vadd.f32 %v658_v12, %v7027_v7  ;;  %v680_v22 = vadd.f32 %v679_v39, %v7028_v28  ;;  %v762_v47 = vld [vmem:[#allocation4 + $0x90] sm:$0xff]  ;;  %v7045_v49 = vld [vmem:[#allocation41_spill] sm:$0xff]  ;;  %v765_v38 = vld [vmem:[#allocation4 + $0xa8] sm:$0xff] }
  0xdc   :  { %v617_v35 = vadd.f32 %v616_v40, %v7025_v11  ;;  %v701_v42 = vadd.f32 %v700_v18, %v7029_v16  ;;  %v722_v32 = vadd.f32 %v721_v48, %v7030_v62  ;;  %7031 = vst [vmem:[#allocation112_spill] sm:$0xff] %v3450_v54  ;;  %v7036_v3 = vld [vmem:[#allocation51_spill] sm:$0xff]  ;;  %v3458_v26 = vmax.f32 %v761_v36, 1e-06  ;;  %v7040_v5 = vld [vmem:[#allocation76_spill] sm:$0xff]  ;;  %v7046_v29 = vld [vmem:[#allocation45_spill] sm:$0xff] }
  0xdd   :  { %v638_v56 = vadd.f32 %v637_v59, %v7026_v37  ;;  %v606_v30 = vrot.slane %v605_v19, 1  ;;  %v660_v57 = vadd.f32 %v659_v51, %v7034_v24  ;;  %v681_v15 = vadd.f32 %v680_v22, %v7035_v8  ;;  %v7041_v58 = vld [vmem:[#allocation88_spill] sm:$0xff]  ;;  %v7048_v59 = vld [vmem:[#allocation49_spill] sm:$0xff]  ;;  %v7062_v8 = vld [vmem:[#allocation54_spill] sm:$0xff] }
  0xde   :  { %v618_v1 = vadd.f32 %v617_v35, %v7032_v50  ;;  %v702_v27 = vadd.f32 %v701_v42, %v7036_v3  ;;  %v723_v53 = vadd.f32 %v722_v32, %v3383_v33  ;;  %7037 = vst [vmem:[#allocation57_spill] sm:$0xff] %v3458_v26  ;;  %v7042_v20 = vld [vmem:[#allocation100_spill] sm:$0xff]  ;;  %v3466_v17 = vmax.f32 %v762_v47, 1e-06  ;;  %v7049_v61 = vld [vmem:[#allocation53_spill] sm:$0xff] }
  0xdf   :  { %v639_v25 = vadd.f32 %v638_v56, %v7033_v41  ;;  %v607_v6 = vadd.f32 %v606_v30, %v605_v19  ;;  %v661_v44 = vadd.f32 %v660_v57, %v7040_v5  ;;  %v682_v34 = vadd.f32 %v681_v15, %v7041_v58  ;;  %v7044_v33 = vld [vmem:[#allocation44_spill] sm:$0xff]  ;;  %v7050_v48 = vld [vmem:[#allocation29_spill] sm:$0xff]  ;;  %v7058_v30 = vld [vmem:[#allocation42_spill] sm:$0xff] }
  0xe0   :  { %v619_v9 = vadd.f32 %v618_v1, %v7038_v13  ;;  %v703_v55 = vadd.f32 %v702_v27, %v7042_v20  ;;  %v724_v63 = vadd.f32 %v723_v53, %v3391_v4  ;;  %7043 = vst [vmem:[#allocation116_spill] sm:$0xff] %v3466_v17  ;;  %v3471_v40 = vmax.f32 %v763_v46, 1e-06  ;;  %v766_v14 = vld [vmem:[#allocation4 + $0xb0] sm:$0xff]  ;;  %v767_v7 = vld [vmem:[#allocation4 + $0xb8] sm:$0xff]  ;;  %v7059_v1 = vld [vmem:[#allocation46_spill] sm:$0xff] }
  0xe1   :  { %v640_v2 = vadd.f32 %v639_v25, %v7039_v60  ;;  %v662_v43 = vadd.f32 %v661_v44, %v7046_v29  ;;  %v683_v12 = vadd.f32 %v682_v34, %v7048_v59  ;;  %v3477_v4 = vsel %vm742_vm0, %v607_v6, %v586_v21  ;;  %v7051_v11 = vld [vmem:[#allocation68_spill] sm:$0xff]  ;;  %v769_v25 = vld [vmem:[#allocation4 + $0xc8] sm:$0xff]  ;;  %v772_v44 = vld [vmem:[#allocation4 + $0xe0] sm:$0xff] }
  0xe2   :  { %v620_v45 = vadd.f32 %v619_v9, %v7044_v33  ;;  %7047 = vst [vmem:[#allocation120_spill] sm:$0xff] %v3471_v40  ;;  %v704_v39 = vadd.f32 %v703_v55, %v7049_v61  ;;  %v725_v18 = vadd.f32 %v724_v63, %v3404_v52  ;;  %v7052_v37 = vld [vmem:[#allocation80_spill] sm:$0xff]  ;;  %v3482_v51 = vmax.f32 %v764_v23, 1e-06  ;;  %v768_v52 = vld [vmem:[#allocation4 + $0xc0] sm:$0xff] }
  0xe3   :  { %v641_v0 = vadd.f32 %v640_v2, %v7045_v49  ;;  %v663_v56 = vadd.f32 %v662_v43, %v7052_v37  ;;  %v7054_v36 = vld [vmem:[#allocation92_spill] sm:$0xff]  ;;  %v3487_v62 = vmax.f32 %v765_v38, 1e-06  ;;  %v3492_v24 = vmax.f32 %v766_v14, 1e-06  ;;  %v7061_v57 = vld [vmem:[#allocation50_spill] sm:$0xff] }
  0xe4   :  { %v621_v19 = vadd.f32 %v620_v45, %v7050_v48  ;;  %7053 = vst [vmem:[#allocation58_spill] sm:$0xff] %v3482_v51  ;;  %v684_v28 = vadd.f32 %v683_v12, %v7054_v36  ;;  %v7055_v22 = vld [vmem:[#allocation104_spill] sm:$0xff]  ;;  %v726_v42 = vadd.f32 %v725_v18, %v3419_v10  ;;  %v3497_v10 = vmax.f32 %v767_v7, 1e-06  ;;  %v776_v12 = vld [vmem:[#allocation4 + $0x180] sm:$0xff]  ;;  %v777_v48 = vld [vmem:[#allocation4 + $0x188] sm:$0xff] }
  0xe5   :  { %v642_v35 = vadd.f32 %v641_v0, %v7051_v11  ;;  %v705_v16 = vadd.f32 %v704_v39, %v7055_v22  ;;  %7056 = vst [vmem:[#allocation60_spill] sm:$0xff] %v3487_v62  ;;  %v7057_v21 = vld [vmem:[#allocation48_spill] sm:$0xff]  ;;  %v664_v41 = vadd.f32 %v663_v56, %v7059_v1  ;;  %7060 = vst [vmem:[#allocation61_spill] sm:$0xff] %v3492_v24  ;;  %v3499_v9 = vmax.f32 %v768_v52, 1e-06  ;;  %v780_v36 = vld [vmem:[#allocation4 + $0x1a0] sm:$0xff] }
  0xe6   :  { %v622_v32 = vadd.f32 %v621_v19, %v7057_v21  ;;  %v685_v47 = vadd.f32 %v684_v28, %v7061_v57  ;;  %v727_v3 = vadd.f32 %v726_v42, %v3433_v31  ;;  %v770_v27 = vld [vmem:[#allocation4 + $0xd0] sm:$0xff]  ;;  %7063 = vst [vmem:[#allocation63_spill] sm:$0xff] %v3497_v10  ;;  %v771_v13 = vld [vmem:[#allocation4 + $0xd8] sm:$0xff]  ;;  %v3501_v58 = vmax.f32 %v769_v25, 1e-06  ;;  %v773_v31 = vld [vmem:[#allocation4 + $0xe8] sm:$0xff] }
  0xe7   :  { %v643_v50 = vadd.f32 %v642_v35, %v7058_v30  ;;  %v706_v15 = vadd.f32 %v705_v16, %v7062_v8  ;;  %v665_v6 = vrot.slane %v664_v41, 4  ;;  %7064 = vst [vmem:[#allocation65_spill] sm:$0xff] %v3499_v9  ;;  %v3503_v63 = vmax.f32 %v770_v27, 1e-06  ;;  %v774_v49 = vld [vmem:[#allocation4 + $0xf0] sm:$0xff]  ;;  %v775_v0 = vld [vmem:[#allocation4 + $0xf8] sm:$0xff] }
  0xe8   :  { %v623_v53 = vrot.slane %v622_v32, 4  ;;  %v686_v60 = vrot.slane %v685_v47, 4  ;;  %v728_v5 = vrot.slane %v727_v3, 4  ;;  %7065 = vst [vmem:[#allocation66_spill] sm:$0xff] %v3501_v58  ;;  %v3505_v29 = vmax.f32 %v771_v13, 1e-06 }
  0xe9   :  { %v644_v46 = vrot.slane %v643_v50, 4  ;;  %v707_v2 = vrot.slane %v706_v15, 4  ;;  %v666_v55 = vadd.f32 %v665_v6, %v664_v41  ;;  %7066 = vst [vmem:[#allocation67_spill] sm:$0xff] %v3503_v63  ;;  %v3507_v61 = vmax.f32 %v772_v44, 1e-06  ;;  %v778_v56 = vld [vmem:[#allocation4 + $0x190] sm:$0xff] }
  0xea   :  { %v624_v34 = vadd.f32 %v623_v53, %v622_v32  ;;  %v687_v23 = vadd.f32 %v686_v60, %v685_v47  ;;  %v729_v45 = vadd.f32 %v728_v5, %v727_v3  ;;  %7067 = vst [vmem:[#allocation69_spill] sm:$0xff] %v3505_v29  ;;  %v3509_v19 = vmax.f32 %v773_v31, 1e-06  ;;  %v779_v7 = vld [vmem:[#allocation4 + $0x198] sm:$0xff]  ;;  %v781_v52 = vld [vmem:[#allocation4 + $0x1a8] sm:$0xff]  ;;  %v782_v21 = vld [vmem:[#allocation4 + $0x1b0] sm:$0xff] }
  0xeb   :  { %v645_v20 = vadd.f32 %v644_v46, %v643_v50  ;;  %v708_v33 = vadd.f32 %v707_v2, %v706_v15  ;;  %v667_v59 = vrot.slane %v666_v55, 2  ;;  %7068 = vst [vmem:[#allocation70_spill] sm:$0xff] %v3507_v61  ;;  %v3511_v28 = vmax.f32 %v774_v49, 1e-06  ;;  %v783_v32 = vld [vmem:[#allocation4 + $0x1b8] sm:$0xff]  ;;  %v784_v25 = vld [vmem:[#allocation4 + $0x1c0] sm:$0xff] }
  0xec   :  { %v625_v43 = vrot.slane %v624_v34, 2  ;;  %v688_v39 = vrot.slane %v687_v23, 2  ;;  %v730_v14 = vrot.slane %v729_v45, 2  ;;  %7069 = vst [vmem:[#allocation71_spill] sm:$0xff] %v3509_v19  ;;  %v3513_v30 = vmax.f32 %v775_v0, 1e-06 }
  0xed   :  { %v646_v38 = vrot.slane %v645_v20, 2  ;;  %v709_v18 = vrot.slane %v708_v33, 2  ;;  %v668_v37 = vadd.f32 %v667_v59, %v666_v55  ;;  %7070 = vst [vmem:[#allocation73_spill] sm:$0xff] %v3511_v28  ;;  %v785_v57 = vld [vmem:[#allocation4 + $0x1c8] sm:$0xff]  ;;  %v786_v47 = vld [vmem:[#allocation4 + $0x1d0] sm:$0xff]  ;;  %v787_v53 = vld [vmem:[#allocation4 + $0x1d8] sm:$0xff] }
  0xee   :  { %v626_v11 = vadd.f32 %v625_v43, %v624_v34  ;;  %v689_v22 = vadd.f32 %v688_v39, %v687_v23  ;;  %v731_v42 = vadd.f32 %v730_v14, %v729_v45  ;;  %7071 = vst [vmem:[#allocation74_spill] sm:$0xff] %v3513_v30  ;;  %v3515_v8 = vmax.f32 %v776_v12, 1e-06  ;;  %v788_v46 = vld [vmem:[#allocation4 + $0x1e0] sm:$0xff]  ;;  %v789_v6 = vld [vmem:[#allocation4 + $0x1e8] sm:$0xff]  ;;  %v790_v44 = vld [vmem:[#allocation4 + $0x1f0] sm:$0xff] }
  0xef   :  { %v647_v35 = vadd.f32 %v646_v38, %v645_v20  ;;  %v710_v16 = vadd.f32 %v709_v18, %v708_v33  ;;  %v669_v41 = vrot.slane %v668_v37, 1  ;;  %v3517_v13 = vmax.f32 %v777_v48, 1e-06  ;;  %v791_v34 = vld [vmem:[#allocation4 + $0x1f8] sm:$0xff]  ;;  %v792_v20 = vld [vmem:[#allocation4 + $0x280] sm:$0xff]  ;;  %v793_v33 = vld [vmem:[#allocation4 + $0x288] sm:$0xff] }
  0xf0   :  { %v627_v50 = vrot.slane %v626_v11, 1  ;;  %7072 = vst [vmem:[#allocation75_spill] sm:$0xff] %v3515_v8  ;;  %v690_v15 = vrot.slane %v689_v22, 1  ;;  %v732_v27 = vrot.slane %v731_v42, 1  ;;  %v3519_v55 = vmax.f32 %v778_v56, 1e-06 }
  0xf1   :  { %v648_v1 = vrot.slane %v647_v35, 1  ;;  %v711_v3 = vrot.slane %v710_v16, 1  ;;  %7073 = vst [vmem:[#allocation77_spill] sm:$0xff] %v3517_v13  ;;  %v670_v5 = vadd.f32 %v669_v41, %v668_v37  ;;  %v794_v45 = vld [vmem:[#allocation4 + $0x290] sm:$0xff]  ;;  %v795_v49 = vld [vmem:[#allocation4 + $0x298] sm:$0xff]  ;;  %v796_v59 = vld [vmem:[#allocation4 + $0x2a0] sm:$0xff] }
  0xf2   :  { %v628_v60 = vadd.f32 %v627_v50, %v626_v11  ;;  %7074 = vst [vmem:[#allocation78_spill] sm:$0xff] %v3519_v55  ;;  %v691_v31 = vadd.f32 %v690_v15, %v689_v22  ;;  %v3521_v0 = vmax.f32 %v779_v7, 1e-06  ;;  %v3523_v43 = vmax.f32 %v780_v36, 1e-06  ;;  %v797_v12 = vld [vmem:[#allocation4 + $0x2a8] sm:$0xff] }
  0xf3   :  { %v649_v2 = vadd.f32 %v648_v1, %v647_v35  ;;  %v712_v23 = vadd.f32 %v711_v3, %v710_v16  ;;  %v798_v39 = vld [vmem:[#allocation4 + $0x2b0] sm:$0xff]  ;;  %v3527_v18 = vmax.f32 %v781_v52, 1e-06  ;;  %v3529_v14 = vmax.f32 %v782_v21, 1e-06  ;;  %v799_v35 = vld [vmem:[#allocation4 + $0x2b8] sm:$0xff] }
  0xf4   :  { %7075 = vst [vmem:[#allocation79_spill] sm:$0xff] %v3521_v0  ;;  %7076 = vst [vmem:[#allocation81_spill] sm:$0xff] %v3523_v43  ;;  %v745_v38 = vsel %vm744_vm1, %v628_v60, %v3477_v4  ;;  %v3531_v48 = vmax.f32 %v783_v32, 1e-06  ;;  %v800_v37 = vld [vmem:[#allocation4 + $0x2c0] sm:$0xff]  ;;  %v801_v56 = vld [vmem:[#allocation4 + $0x2c8] sm:$0xff] }
  0xf5   :  { %7077 = vst [vmem:[#allocation82_spill] sm:$0xff] %v3527_v18  ;;  %7078 = vst [vmem:[#allocation83_spill] sm:$0xff] %v3529_v14  ;;  %v747_v11 = vsel %vm746_vm2, %v649_v2, %v745_v38  ;;  %v3534_v7 = vmax.f32 %v784_v25, 1e-06  ;;  %v3536_v36 = vmax.f32 %v785_v57, 1e-06  ;;  %v3554_v2 = vadd.f32 %v732_v27, %v731_v42 }
  0xf6   :  { %v3538_v22 = vmax.f32 %v786_v47, 1e-06  ;;  %v749_v4 = vsel %vm748_vm3, %v670_v5, %v747_v11  ;;  %v802_v16 = vld [vmem:[#allocation4 + $0x2d0] sm:$0xff]  ;;  %v803_v52 = vld [vmem:[#allocation4 + $0x2d8] sm:$0xff]  ;;  %v804_v50 = vld [vmem:[#allocation4 + $0x2e0] sm:$0xff] }
  0xf7   :  { %7079 = vst [vmem:[#allocation85_spill] sm:$0xff] %v3534_v7  ;;  %7080 = vst [vmem:[#allocation86_spill] sm:$0xff] %v3536_v36  ;;  %v3541_v21 = vmax.f32 %v787_v53, 1e-06  ;;  %v3543_v32 = vmax.f32 %v788_v46, 1e-06  ;;  %v751_v41 = vsel %vm750_vm4, %v691_v31, %v749_v4 }
  0xf8   :  { %7081 = vst [vmem:[#allocation87_spill] sm:$0xff] %v3538_v22  ;;  %v3545_v1 = vmax.f32 %v789_v6, 1e-06  ;;  %v805_v15 = vld [vmem:[#allocation4 + $0x2e8] sm:$0xff]  ;;  %v806_v25 = vld [vmem:[#allocation4 + $0x2f0] sm:$0xff]  ;;  %v807_v3 = vld [vmem:[#allocation4 + $0x2f8] sm:$0xff]  ;;  %v3563_v31 = vsel %vm752_vm5, %v712_v23, %v751_v41  ;;  %v3579_v23 = vmul.f32 %v3450_v54, %v3450_v54 }
  0xf9   :  { %7082 = vst [vmem:[#allocation138_spill] sm:$0xff] %v3543_v32  ;;  %v3548_v57 = vmax.f32 %v790_v44, 1e-06  ;;  %v3550_v47 = vmax.f32 %v791_v34, 1e-06  ;;  %7087 = vst [vmem:[#allocation140_spill] sm:$0xff] %v3554_v2 }
  0xfa   :  { %7083 = vst [vmem:[#allocation89_spill] sm:$0xff] %v3545_v1  ;;  %v3552_v60 = vmax.f32 %v792_v20, 1e-06  ;;  %v808_v5 = vld [vmem:[#allocation4 + $0x380] sm:$0xff]  ;;  %v809_v53 = vld [vmem:[#allocation4 + $0x388] sm:$0xff]  ;;  %v810_v38 = vld [vmem:[#allocation4 + $0x390] sm:$0xff] }
  0xfb   :  { %7084 = vst [vmem:[#allocation90_spill] sm:$0xff] %v3548_v57  ;;  %7085 = vst [vmem:[#allocation139_spill] sm:$0xff] %v3550_v47  ;;  %v3556_v46 = vmax.f32 %v793_v33, 1e-06  ;;  %v3558_v6 = vmax.f32 %v794_v45, 1e-06 }
  0xfc   :  { %7086 = vst [vmem:[#allocation91_spill] sm:$0xff] %v3552_v60  ;;  %v3560_v11 = vmax.f32 %v795_v49, 1e-06  ;;  %7091 = vst [vmem:[#allocation95_spill] sm:$0xff] %v3563_v31  ;;  %v811_v44 = vld [vmem:[#allocation4 + $0x398] sm:$0xff]  ;;  %v812_v4 = vld [vmem:[#allocation4 + $0x3a0] sm:$0xff] }
  0xfd   :  { %7088 = vst [vmem:[#allocation93_spill] sm:$0xff] %v3556_v46  ;;  %7089 = vst [vmem:[#allocation94_spill] sm:$0xff] %v3558_v6  ;;  %v813_v34 = vld [vmem:[#allocation4 + $0x3a8] sm:$0xff]  ;;  %v3565_v47 = vmax.f32 %v796_v59, 1e-06  ;;  %v814_v27 = vld [vmem:[#allocation4 + $0x3b0] sm:$0xff] }
  0xfe   :  { %7090 = vst [vmem:[#allocation141_spill] sm:$0xff] %v3560_v11  ;;  %v3567_v20 = vmax.f32 %v797_v12, 1e-06  ;;  %v3569_v42 = vmax.f32 %v798_v39, 1e-06  ;;  %v815_v2 = vld [vmem:[#allocation4 + $0x3b8] sm:$0xff] }
  0xff   :  { %7092 = vst [vmem:[#allocation142_spill] sm:$0xff] %v3565_v47  ;;  %v816_v33 = vld [vmem:[#allocation4 + $0x3c0] sm:$0xff]  ;;  %v3571_v46 = vmax.f32 %v799_v35, 1e-06  ;;  %v3573_v45 = vmax.f32 %v800_v37, 1e-06  ;;  %v3589_v35 = vmul.f32 %v3458_v26, %v3458_v26 }
 0x100   :  { %7093 = vst [vmem:[#allocation97_spill] sm:$0xff] %v3567_v20  ;;  %7094 = vst [vmem:[#allocation98_spill] sm:$0xff] %v3569_v42  ;;  %v3575_v49 = vmax.f32 %v801_v56, 1e-06  ;;  %v817_v41 = vld [vmem:[#allocation4 + $0x3c8] sm:$0xff]  ;;  %v818_v59 = vld [vmem:[#allocation4 + $0x3d0] sm:$0xff] }
 0x101   :  { %7095 = vst [vmem:[#allocation143_spill] sm:$0xff] %v3571_v46  ;;  %7096 = vst [vmem:[#allocation99_spill] sm:$0xff] %v3573_v45  ;;  %v819_v31 = vld [vmem:[#allocation4 + $0x3d8] sm:$0xff]  ;;  %v3581_v12 = vmax.f32 %v802_v16, 1e-06  ;;  %v820_v37 = vld [vmem:[#allocation4 + $0x3e0] sm:$0xff]  ;;  %v3599_v16 = vmul.f32 %v3466_v17, %v3466_v17 }
 0x102   :  { %7097 = vst [vmem:[#allocation144_spill] sm:$0xff] %v3575_v49  ;;  %7098 = vst [vmem:[#allocation101_spill] sm:$0xff] %v3579_v23  ;;  %v3583_v39 = vmax.f32 %v803_v52, 1e-06  ;;  %v3585_v42 = vmax.f32 %v804_v50, 1e-06 }
 0x103   :  { %7099 = vst [vmem:[#allocation102_spill] sm:$0xff] %v3581_v12  ;;  %7102 = vst [vmem:[#allocation146_spill] sm:$0xff] %v3589_v35  ;;  %v821_v56 = vld [vmem:[#allocation4 + $0x3e8] sm:$0xff]  ;;  %v822_v49 = vld [vmem:[#allocation4 + $0x3f0] sm:$0xff]  ;;  %v3591_v45 = vmax.f32 %v805_v15, 1e-06  ;;  %v3609_v15 = vmul.f32 %v3471_v40, %v3471_v40 }
 0x104   :  { %7100 = vst [vmem:[#allocation145_spill] sm:$0xff] %v3583_v39  ;;  %7101 = vst [vmem:[#allocation103_spill] sm:$0xff] %v3585_v42  ;;  %v3593_v54 = vmax.f32 %v806_v25, 1e-06  ;;  %v3595_v23 = vmax.f32 %v807_v3, 1e-06 }
 0x105   :  { %7103 = vst [vmem:[#allocation105_spill] sm:$0xff] %v3591_v45  ;;  %7106 = vst [vmem:[#allocation107_spill] sm:$0xff] %v3599_v16  ;;  %v823_v52 = vld [vmem:[#allocation4 + $0x3f8] sm:$0xff]  ;;  %v824_v50 = vld [vmem:[#allocation4 + $0x480] sm:$0xff]  ;;  %v3601_v39 = vmax.f32 %v808_v5, 1e-06  ;;  %v3619_v5 = vmul.f32 %v3482_v51, %v3482_v51 }
 0x106   :  { %7104 = vst [vmem:[#allocation106_spill] sm:$0xff] %v3593_v54  ;;  %7105 = vst [vmem:[#allocation147_spill] sm:$0xff] %v3595_v23  ;;  %v825_v42 = vld [vmem:[#allocation4 + $0x488] sm:$0xff]  ;;  %v3603_v26 = vmax.f32 %v809_v53, 1e-06  ;;  %v826_v25 = vld [vmem:[#allocation4 + $0x490] sm:$0xff] }
 0x107   :  { %7107 = vst [vmem:[#allocation148_spill] sm:$0xff] %v3601_v39  ;;  %v3605_v35 = vmax.f32 %v810_v38, 1e-06  ;;  %7110 = vst [vmem:[#allocation111_spill] sm:$0xff] %v3609_v15  ;;  %v827_v3 = vld [vmem:[#allocation4 + $0x498] sm:$0xff]  ;;  %v828_v23 = vld [vmem:[#allocation4 + $0x4a0] sm:$0xff] }
 0x108   :  { %7108 = vst [vmem:[#allocation109_spill] sm:$0xff] %v3603_v26  ;;  %v3611_v54 = vmax.f32 %v811_v44, 1e-06  ;;  %v3613_v17 = vmax.f32 %v812_v4, 1e-06  ;;  %7114 = vst [vmem:[#allocation117_spill] sm:$0xff] %v3619_v5  ;;  %v3629_v44 = vmul.f32 %v3487_v62, %v3487_v62 }
 0x109   :  { %7109 = vst [vmem:[#allocation110_spill] sm:$0xff] %v3605_v35  ;;  %v3615_v16 = vmax.f32 %v813_v34, 1e-06  ;;  %v829_v53 = vld [vmem:[#allocation4 + $0x4a8] sm:$0xff]  ;;  %v830_v38 = vld [vmem:[#allocation4 + $0x4b0] sm:$0xff]  ;;  %v831_v35 = vld [vmem:[#allocation4 + $0x4b8] sm:$0xff] }
 0x10a   :  { %7111 = vst [vmem:[#allocation113_spill] sm:$0xff] %v3611_v54  ;;  %7112 = vst [vmem:[#allocation114_spill] sm:$0xff] %v3613_v17  ;;  %v3621_v26 = vmax.f32 %v814_v27, 1e-06  ;;  %v3623_v40 = vmax.f32 %v815_v2, 1e-06  ;;  %v3639_v27 = vmul.f32 %v3492_v24, %v3492_v24 }
 0x10b   :  { %7113 = vst [vmem:[#allocation115_spill] sm:$0xff] %v3615_v16  ;;  %v3625_v15 = vmax.f32 %v816_v33, 1e-06  ;;  %7118 = vst [vmem:[#allocation122_spill] sm:$0xff] %v3629_v44  ;;  %v832_v4 = vld [vmem:[#allocation4 + $0x4c0] sm:$0xff]  ;;  %v833_v34 = vld [vmem:[#allocation4 + $0x4c8] sm:$0xff] }
 0x10c   :  { %7115 = vst [vmem:[#allocation118_spill] sm:$0xff] %v3621_v26  ;;  %7116 = vst [vmem:[#allocation119_spill] sm:$0xff] %v3623_v40  ;;  %v834_v16 = vld [vmem:[#allocation4 + $0x4d0] sm:$0xff]  ;;  %v3631_v17 = vmax.f32 %v817_v41, 1e-06  ;;  %v835_v2 = vld [vmem:[#allocation4 + $0x4d8] sm:$0xff]  ;;  %v3649_v41 = vmul.f32 %v3497_v10, %v3497_v10 }
 0x10d   :  { %7117 = vst [vmem:[#allocation121_spill] sm:$0xff] %v3625_v15  ;;  %v3633_v51 = vmax.f32 %v818_v59, 1e-06  ;;  %v3635_v5 = vmax.f32 %v819_v31, 1e-06  ;;  %7122 = vst [vmem:[#allocation126_spill] sm:$0xff] %v3639_v27 }
 0x10e   :  { %7119 = vst [vmem:[#allocation123_spill] sm:$0xff] %v3631_v17  ;;  %v836_v33 = vld [vmem:[#allocation4 + $0x4e0] sm:$0xff]  ;;  %v837_v15 = vld [vmem:[#allocation4 + $0x4e8] sm:$0xff]  ;;  %v3641_v40 = vmax.f32 %v820_v37, 1e-06  ;;  %7126 = vst [vmem:[#allocation128_spill] sm:$0xff] %v3649_v41  ;;  %v3659_v37 = vmul.f32 %v3499_v9, %v3499_v9 }
 0x10f   :  { %7120 = vst [vmem:[#allocation124_spill] sm:$0xff] %v3633_v51  ;;  %7121 = vst [vmem:[#allocation125_spill] sm:$0xff] %v3635_v5  ;;  %v3643_v62 = vmax.f32 %v821_v56, 1e-06  ;;  %v3645_v44 = vmax.f32 %v822_v49, 1e-06 }
 0x110   :  { %7123 = vst [vmem:[#allocation149_spill] sm:$0xff] %v3641_v40  ;;  %v838_v59 = vld [vmem:[#allocation4 + $0x4f0] sm:$0xff]  ;;  %v839_v31 = vld [vmem:[#allocation4 + $0x4f8] sm:$0xff]  ;;  %v840_v5 = vld [vmem:[#allocation4 + $0x580] sm:$0xff]  ;;  %v3651_v51 = vmax.f32 %v823_v52, 1e-06  ;;  %v3669_v52 = vmul.f32 %v3501_v58, %v3501_v58 }
 0x111   :  { %7124 = vst [vmem:[#allocation127_spill] sm:$0xff] %v3643_v62  ;;  %7125 = vst [vmem:[#allocation150_spill] sm:$0xff] %v3645_v44  ;;  %v3653_v24 = vmax.f32 %v824_v50, 1e-06  ;;  %v3655_v27 = vmax.f32 %v825_v42, 1e-06 }
 0x112   :  { %7127 = vst [vmem:[#allocation151_spill] sm:$0xff] %v3651_v51  ;;  %7130 = vst [vmem:[#allocation130_spill] sm:$0xff] %v3659_v37  ;;  %v841_v56 = vld [vmem:[#allocation4 + $0x588] sm:$0xff]  ;;  %v842_v49 = vld [vmem:[#allocation4 + $0x590] sm:$0xff]  ;;  %v3661_v62 = vmax.f32 %v826_v25, 1e-06  ;;  %v3679_v25 = vmul.f32 %v3503_v63, %v3503_v63 }
 0x113   :  { %7128 = vst [vmem:[#allocation129_spill] sm:$0xff] %v3653_v24  ;;  %7129 = vst [vmem:[#allocation152_spill] sm:$0xff] %v3655_v27  ;;  %v843_v44 = vld [vmem:[#allocation4 + $0x598] sm:$0xff]  ;;  %v3663_v10 = vmax.f32 %v827_v3, 1e-06  ;;  %v844_v50 = vld [vmem:[#allocation4 + $0x5a0] sm:$0xff] }
 0x114   :  { %7131 = vst [vmem:[#allocation153_spill] sm:$0xff] %v3661_v62  ;;  %v3665_v41 = vmax.f32 %v828_v23, 1e-06  ;;  %7134 = vst [vmem:[#allocation132_spill] sm:$0xff] %v3669_v52  ;;  %v845_v42 = vld [vmem:[#allocation4 + $0x5a8] sm:$0xff]  ;;  %v846_v27 = vld [vmem:[#allocation4 + $0x5b0] sm:$0xff] }
 0x115   :  { %7132 = vst [vmem:[#allocation131_spill] sm:$0xff] %v3663_v10  ;;  %v3671_v24 = vmax.f32 %v829_v53, 1e-06  ;;  %v3673_v9 = vmax.f32 %v830_v38, 1e-06  ;;  %7138 = vst [vmem:[#allocation23_spill] sm:$0xff] %v3679_v25  ;;  %v3689_v53 = vmul.f32 %v3505_v29, %v3505_v29 }
 0x116   :  { %7133 = vst [vmem:[#allocation154_spill] sm:$0xff] %v3665_v41  ;;  %v3675_v37 = vmax.f32 %v831_v35, 1e-06  ;;  %v847_v3 = vld [vmem:[#allocation4 + $0x5b8] sm:$0xff]  ;;  %v848_v23 = vld [vmem:[#allocation4 + $0x5c0] sm:$0xff]  ;;  %v849_v41 = vld [vmem:[#allocation4 + $0x5c8] sm:$0xff] }
 0x117   :  { %7135 = vst [vmem:[#allocation155_spill] sm:$0xff] %v3671_v24  ;;  %7136 = vst [vmem:[#allocation14_spill] sm:$0xff] %v3673_v9  ;;  %v3681_v10 = vmax.f32 %v832_v4, 1e-06  ;;  %v3683_v58 = vmax.f32 %v833_v34, 1e-06  ;;  %v3699_v4 = vmul.f32 %v3507_v61, %v3507_v61 }
 0x118   :  { %7137 = vst [vmem:[#allocation32_spill] sm:$0xff] %v3675_v37  ;;  %v3685_v52 = vmax.f32 %v834_v16, 1e-06  ;;  %7142 = vst [vmem:[#allocation133_spill] sm:$0xff] %v3689_v53  ;;  %v850_v38 = vld [vmem:[#allocation4 + $0x5d0] sm:$0xff]  ;;  %v851_v35 = vld [vmem:[#allocation4 + $0x5d8] sm:$0xff] }
 0x119   :  { %7139 = vst [vmem:[#allocation24_spill] sm:$0xff] %v3681_v10  ;;  %7140 = vst [vmem:[#allocation33_spill] sm:$0xff] %v3683_v58  ;;  %v852_v37 = vld [vmem:[#allocation4 + $0x5e0] sm:$0xff]  ;;  %v3691_v9 = vmax.f32 %v835_v2, 1e-06  ;;  %v853_v34 = vld [vmem:[#allocation4 + $0x5e8] sm:$0xff]  ;;  %v3709_v2 = vmul.f32 %v3509_v19, %v3509_v19 }
 0x11a   :  { %7141 = vst [vmem:[#allocation52_spill] sm:$0xff] %v3685_v52  ;;  %v3693_v63 = vmax.f32 %v836_v33, 1e-06  ;;  %v3695_v25 = vmax.f32 %v837_v15, 1e-06  ;;  %7146 = vst [vmem:[#allocation34_spill] sm:$0xff] %v3699_v4 }
 0x11b   :  { %7143 = vst [vmem:[#allocation156_spill] sm:$0xff] %v3691_v9  ;;  %v854_v16 = vld [vmem:[#allocation4 + $0x5f0] sm:$0xff]  ;;  %v855_v52 = vld [vmem:[#allocation4 + $0x5f8] sm:$0xff]  ;;  %v3701_v58 = vmax.f32 %v838_v59, 1e-06  ;;  %7150 = vst [vmem:[#allocation27_spill] sm:$0xff] %v3709_v2  ;;  %v3719_v59 = vmul.f32 %v3511_v28, %v3511_v28 }
 0x11c   :  { %7144 = vst [vmem:[#allocation15_spill] sm:$0xff] %v3693_v63  ;;  %7145 = vst [vmem:[#allocation26_spill] sm:$0xff] %v3695_v25  ;;  %v3703_v29 = vmax.f32 %v839_v31, 1e-06  ;;  %v3705_v53 = vmax.f32 %v840_v5, 1e-06 }
 0x11d   :  { %7147 = vst [vmem:[#allocation134_spill] sm:$0xff] %v3701_v58  ;;  %v856_v33 = vld [vmem:[#allocation4 + $0x680] sm:$0xff]  ;;  %v857_v15 = vld [vmem:[#allocation4 + $0x688] sm:$0xff]  ;;  %v858_v25 = vld [vmem:[#allocation4 + $0x690] sm:$0xff]  ;;  %v3711_v63 = vmax.f32 %v841_v56, 1e-06  ;;  %v3729_v56 = vmul.f32 %v3513_v30, %v3513_v30 }
 0x11e   :  { %7148 = vst [vmem:[#allocation157_spill] sm:$0xff] %v3703_v29  ;;  %7149 = vst [vmem:[#allocation17_spill] sm:$0xff] %v3705_v53  ;;  %v3713_v61 = vmax.f32 %v842_v49, 1e-06  ;;  %v3715_v4 = vmax.f32 %v843_v44, 1e-06 }
 0x11f   :  { %7151 = vst [vmem:[#allocation56_spill] sm:$0xff] %v3711_v63  ;;  %7154 = vst [vmem:[#allocation31_spill] sm:$0xff] %v3719_v59  ;;  %v859_v31 = vld [vmem:[#allocation4 + $0x698] sm:$0xff]  ;;  %v860_v5 = vld [vmem:[#allocation4 + $0x6a0] sm:$0xff]  ;;  %v3721_v29 = vmax.f32 %v844_v50, 1e-06  ;;  %v3739_v50 = vmul.f32 %v3515_v8, %v3515_v8 }
 0x120   :  { %7152 = vst [vmem:[#allocation28_spill] sm:$0xff] %v3713_v61  ;;  %7153 = vst [vmem:[#allocation19_spill] sm:$0xff] %v3715_v4  ;;  %v861_v53 = vld [vmem:[#allocation4 + $0x6a8] sm:$0xff]  ;;  %v3723_v19 = vmax.f32 %v845_v42, 1e-06  ;;  %v862_v49 = vld [vmem:[#allocation4 + $0x6b0] sm:$0xff] }
 0x121   :  { %7155 = vst [vmem:[#allocation37_spill] sm:$0xff] %v3721_v29  ;;  %v3725_v2 = vmax.f32 %v846_v27, 1e-06  ;;  %7158 = vst [vmem:[#allocation20_spill] sm:$0xff] %v3729_v56  ;;  %v863_v44 = vld [vmem:[#allocation4 + $0x6b8] sm:$0xff]  ;;  %v864_v4 = vld [vmem:[#allocation4 + $0x6c0] sm:$0xff] }
 0x122   :  { %7156 = vst [vmem:[#allocation135_spill] sm:$0xff] %v3723_v19  ;;  %v3731_v61 = vmax.f32 %v847_v3, 1e-06  ;;  %v3733_v28 = vmax.f32 %v848_v23, 1e-06  ;;  %7162 = vst [vmem:[#allocation16_spill] sm:$0xff] %v3739_v50  ;;  %v3749_v3 = vmul.f32 %v3517_v13, %v3517_v13 }
 0x123   :  { %7157 = vst [vmem:[#allocation158_spill] sm:$0xff] %v3725_v2  ;;  %v3735_v59 = vmax.f32 %v849_v41, 1e-06  ;;  %v865_v42 = vld [vmem:[#allocation4 + $0x6c8] sm:$0xff]  ;;  %v866_v27 = vld [vmem:[#allocation4 + $0x6d0] sm:$0xff]  ;;  %v867_v2 = vld [vmem:[#allocation4 + $0x6d8] sm:$0xff] }
 0x124   :  { %7159 = vst [vmem:[#allocation36_spill] sm:$0xff] %v3731_v61  ;;  %7160 = vst [vmem:[#allocation59_spill] sm:$0xff] %v3733_v28  ;;  %v3741_v19 = vmax.f32 %v850_v38, 1e-06  ;;  %v3743_v30 = vmax.f32 %v851_v35, 1e-06  ;;  %v3759_v38 = vmul.f32 %v3519_v55, %v3519_v55 }
 0x125   :  { %7161 = vst [vmem:[#allocation22_spill] sm:$0xff] %v3735_v59  ;;  %v3745_v56 = vmax.f32 %v852_v37, 1e-06  ;;  %7166 = vst [vmem:[#allocation30_spill] sm:$0xff] %v3749_v3  ;;  %v868_v23 = vld [vmem:[#allocation4 + $0x6e0] sm:$0xff]  ;;  %v869_v41 = vld [vmem:[#allocation4 + $0x6e8] sm:$0xff] }
 0x126   :  { %7163 = vst [vmem:[#allocation38_spill] sm:$0xff] %v3741_v19  ;;  %7164 = vst [vmem:[#allocation136_spill] sm:$0xff] %v3743_v30  ;;  %v870_v59 = vld [vmem:[#allocation4 + $0x6f0] sm:$0xff]  ;;  %v3751_v28 = vmax.f32 %v853_v34, 1e-06  ;;  %v871_v35 = vld [vmem:[#allocation4 + $0x6f8] sm:$0xff]  ;;  %v3769_v34 = vmul.f32 %v3521_v0, %v3521_v0 }
 0x127   :  { %7165 = vst [vmem:[#allocation159_spill] sm:$0xff] %v3745_v56  ;;  %v3753_v8 = vmax.f32 %v854_v16, 1e-06  ;;  %v3755_v50 = vmax.f32 %v855_v52, 1e-06  ;;  %7170 = vst [vmem:[#allocation35_spill] sm:$0xff] %v3759_v38 }
 0x128   :  { %7167 = vst [vmem:[#allocation18_spill] sm:$0xff] %v3751_v28  ;;  %v872_v37 = vld [vmem:[#allocation4 + $0x780] sm:$0xff]  ;;  %v873_v56 = vld [vmem:[#allocation4 + $0x788] sm:$0xff]  ;;  %v3761_v30 = vmax.f32 %v856_v33, 1e-06  ;;  %7174 = vst [vmem:[#allocation72_spill] sm:$0xff] %v3769_v34  ;;  %v3779_v33 = vmul.f32 %v3523_v43, %v3523_v43 }
 0x129   :  { %7168 = vst [vmem:[#allocation137_spill] sm:$0xff] %v3753_v8  ;;  %7169 = vst [vmem:[#allocation160_spill] sm:$0xff] %v3755_v50  ;;  %v3763_v13 = vmax.f32 %v857_v15, 1e-06  ;;  %v3765_v3 = vmax.f32 %v858_v25, 1e-06 }
 0x12a   :  { %7171 = vst [vmem:[#allocation108_spill] sm:$0xff] %v3761_v30  ;;  %v874_v16 = vld [vmem:[#allocation4 + $0x790] sm:$0xff]  ;;  %v875_v52 = vld [vmem:[#allocation4 + $0x798] sm:$0xff]  ;;  %v876_v50 = vld [vmem:[#allocation4 + $0x7a0] sm:$0xff]  ;;  %v3771_v8 = vmax.f32 %v859_v31, 1e-06  ;;  %v3789_v31 = vmul.f32 %v3527_v18, %v3527_v18 }
 0x12b   :  { %7172 = vst [vmem:[#allocation21_spill] sm:$0xff] %v3763_v13  ;;  %7173 = vst [vmem:[#allocation62_spill] sm:$0xff] %v3765_v3  ;;  %v3773_v55 = vmax.f32 %v860_v5, 1e-06  ;;  %v3775_v38 = vmax.f32 %v861_v53, 1e-06 }
 0x12c   :  { %7175 = vst [vmem:[#allocation84_spill] sm:$0xff] %v3771_v8  ;;  %7178 = vst [vmem:[#allocation40_spill] sm:$0xff] %v3779_v33  ;;  %v877_v15 = vld [vmem:[#allocation4 + $0x7a8] sm:$0xff]  ;;  %v878_v25 = vld [vmem:[#allocation4 + $0x7b0] sm:$0xff]  ;;  %v3781_v13 = vmax.f32 %v862_v49, 1e-06  ;;  %v3799_v49 = vmul.f32 %v3529_v14, %v3529_v14 }
 0x12d   :  { %7176 = vst [vmem:[#allocation96_spill] sm:$0xff] %v3773_v55  ;;  %7177 = vst [vmem:[#allocation55_spill] sm:$0xff] %v3775_v38  ;;  %v879_v3 = vld [vmem:[#allocation4 + $0x7b8] sm:$0xff]  ;;  %v3783_v0 = vmax.f32 %v863_v44, 1e-06  ;;  %v880_v5 = vld [vmem:[#allocation4 + $0x7c0] sm:$0xff] }
 0x12e   :  { %7179 = vst [vmem:[#allocation39_spill] sm:$0xff] %v3781_v13  ;;  %v3785_v34 = vmax.f32 %v864_v4, 1e-06  ;;  %7182 = vst [vmem:[#allocation51_spill] sm:$0xff] %v3789_v31  ;;  %v881_v53 = vld [vmem:[#allocation4 + $0x7c8] sm:$0xff]  ;;  %v882_v38 = vld [vmem:[#allocation4 + $0x7d0] sm:$0xff] }
 0x12f   :  { %7180 = vst [vmem:[#allocation43_spill] sm:$0xff] %v3783_v0  ;;  %v3791_v55 = vmax.f32 %v865_v42, 1e-06  ;;  %v3793_v43 = vmax.f32 %v866_v27, 1e-06  ;;  %7186 = vst [vmem:[#allocation88_spill] sm:$0xff] %v3799_v49  ;;  %v3809_v42 = vmul.f32 %v3531_v48, %v3531_v48 }
 0x130   :  { %7181 = vst [vmem:[#allocation47_spill] sm:$0xff] %v3785_v34  ;;  %v3795_v33 = vmax.f32 %v867_v2, 1e-06  ;;  %v883_v44 = vld [vmem:[#allocation4 + $0x7d8] sm:$0xff]  ;;  %v884_v4 = vld [vmem:[#allocation4 + $0x7e0] sm:$0xff]  ;;  %v885_v34 = vld [vmem:[#allocation4 + $0x7e8] sm:$0xff] }
 0x131   :  { %7183 = vst [vmem:[#allocation25_spill] sm:$0xff] %v3791_v55  ;;  %7184 = vst [vmem:[#allocation64_spill] sm:$0xff] %v3793_v43  ;;  %v3801_v0 = vmax.f32 %v868_v23, 1e-06  ;;  %v3803_v18 = vmax.f32 %v869_v41, 1e-06  ;;  %v3819_v23 = vmul.f32 %v3534_v7, %v3534_v7  ;;  %v3839_v7 = vmul.f32 %v3538_v22, %v3538_v22 }
 0x132   :  { %7185 = vst [vmem:[#allocation76_spill] sm:$0xff] %v3795_v33  ;;  %v3805_v31 = vmax.f32 %v870_v59, 1e-06  ;;  %7190 = vst [vmem:[#allocation45_spill] sm:$0xff] %v3809_v42  ;;  %v886_v27 = vld [vmem:[#allocation4 + $0x7f0] sm:$0xff]  ;;  %v887_v2 = vld [vmem:[#allocation4 + $0x7f8] sm:$0xff]  ;;  %v3829_v42 = vmul.f32 %v3536_v36, %v3536_v36  ;;  %v3849_v36 = vmul.f32 %v3541_v21, %v3541_v21  ;;  %v3859_v22 = vmul.f32 %v3543_v32, %v3543_v32 }
 0x133   :  { %7187 = vst [vmem:[#allocation100_spill] sm:$0xff] %v3801_v0  ;;  %7188 = vst [vmem:[#allocation44_spill] sm:$0xff] %v3803_v18  ;;  %v3811_v33 = vmax.f32 %v871_v35, 1e-06  ;;  %v3813_v43 = vmax.f32 %v872_v37, 1e-06  ;;  %v3879_v32 = vmul.f32 %v3552_v60, %v3552_v60  ;;  %v3899_v60 = vmul.f32 %v3567_v20, %v3567_v20 }
 0x134   :  { %7189 = vst [vmem:[#allocation41_spill] sm:$0xff] %v3805_v31  ;;  %v3815_v49 = vmax.f32 %v873_v56, 1e-06  ;;  %v3821_v41 = vmax.f32 %v874_v16, 1e-06  ;;  %v3919_v20 = vmul.f32 %v3581_v12, %v3581_v12 }
 0x135   :  { %7191 = vst [vmem:[#allocation49_spill] sm:$0xff] %v3811_v33  ;;  %7192 = vst [vmem:[#allocation53_spill] sm:$0xff] %v3813_v43  ;;  %v3823_v59 = vmax.f32 %v875_v52, 1e-06  ;;  %v3825_v14 = vmax.f32 %v876_v50, 1e-06 }
 0x136   :  { %7193 = vst [vmem:[#allocation29_spill] sm:$0xff] %v3815_v49  ;;  %7194 = vst [vmem:[#allocation68_spill] sm:$0xff] %v3821_v41  ;;  %v3831_v35 = vmax.f32 %v877_v15, 1e-06  ;;  %v3833_v37 = vmax.f32 %v878_v25, 1e-06 }
 0x137   :  { %7195 = vst [vmem:[#allocation80_spill] sm:$0xff] %v3823_v59  ;;  %7196 = vst [vmem:[#allocation92_spill] sm:$0xff] %v3825_v14  ;;  %v3835_v56 = vmax.f32 %v879_v3, 1e-06  ;;  %v3841_v16 = vmax.f32 %v880_v5, 1e-06 }
 0x138   :  { %7197 = vst [vmem:[#allocation104_spill] sm:$0xff] %v3831_v35  ;;  %7198 = vst [vmem:[#allocation48_spill] sm:$0xff] %v3833_v37  ;;  %v3843_v52 = vmax.f32 %v881_v53, 1e-06  ;;  %v3845_v50 = vmax.f32 %v882_v38, 1e-06  ;;  %v3867_v38 = vmul.f32 %v3545_v1, %v3545_v1  ;;  %v3887_v1 = vmul.f32 %v3558_v6, %v3558_v6 }
 0x139   :  { %7199 = vst [vmem:[#allocation42_spill] sm:$0xff] %v3835_v56  ;;  %7200 = vst [vmem:[#allocation46_spill] sm:$0xff] %v3841_v16  ;;  %v3851_v15 = vmax.f32 %v883_v44, 1e-06  ;;  %v3853_v25 = vmax.f32 %v884_v4, 1e-06  ;;  %v3871_v44 = vmul.f32 %v3548_v57, %v3548_v57  ;;  %v3891_v57 = vmul.f32 %v3560_v11, %v3560_v11 }
 0x13a   :  { %7201 = vst [vmem:[#allocation50_spill] sm:$0xff] %v3843_v52  ;;  %7202 = vst [vmem:[#allocation54_spill] sm:$0xff] %v3845_v50  ;;  %v3855_v3 = vmax.f32 %v885_v34, 1e-06  ;;  %v3861_v5 = vmax.f32 %v886_v27, 1e-06  ;;  %v3907_v6 = vmul.f32 %v3571_v46, %v3571_v46 }
 0x13b   :  { %7203 = vst [vmem:[#allocation161_spill] sm:$0xff] %v3851_v15  ;;  %7204 = vst [vmem:[#allocation162_spill] sm:$0xff] %v3853_v25  ;;  %v3863_v53 = vmax.f32 %v887_v2, 1e-06  ;;  %v7208_v4 = vld [vmem:[#allocation139_spill] sm:$0xff]  ;;  %v7210_v27 = vld [vmem:[#allocation93_spill] sm:$0xff] }
 0x13c   :  { %7205 = vst [vmem:[#allocation163_spill] sm:$0xff] %v3855_v3  ;;  %7206 = vst [vmem:[#allocation164_spill] sm:$0xff] %v3861_v5  ;;  %v3875_v34 = vmul.f32 %v7208_v4, %v7208_v4  ;;  %v3883_v2 = vmul.f32 %v7210_v27, %v7210_v27  ;;  %v3895_v4 = vmul.f32 %v3565_v47, %v3565_v47 }
 0x13d   :  { %7207 = vst [vmem:[#allocation165_spill] sm:$0xff] %v3863_v53  ;;  %7209 = vst [vmem:[#allocation166_spill] sm:$0xff] %v3879_v32  ;;  %v7214_v32 = vld [vmem:[#allocation98_spill] sm:$0xff] }
 0x13e   :  { %7211 = vst [vmem:[#allocation167_spill] sm:$0xff] %v3887_v1  ;;  %7212 = vst [vmem:[#allocation168_spill] sm:$0xff] %v3891_v57  ;;  %v3903_v27 = vmul.f32 %v7214_v32, %v7214_v32  ;;  %v7216_v1 = vld [vmem:[#allocation99_spill] sm:$0xff]  ;;  %v7218_v57 = vld [vmem:[#allocation144_spill] sm:$0xff] }
 0x13f   :  { %7213 = vst [vmem:[#allocation169_spill] sm:$0xff] %v3899_v60  ;;  %v3911_v11 = vmul.f32 %v7216_v1, %v7216_v1  ;;  %v3915_v47 = vmul.f32 %v7218_v57, %v7218_v57  ;;  %v7220_v60 = vld [vmem:[#allocation145_spill] sm:$0xff]  ;;  %v3931_v1 = vmul.f32 %v3591_v45, %v3591_v45 }
 0x140   :  { %7215 = vst [vmem:[#allocation170_spill] sm:$0xff] %v3903_v27  ;;  %v3923_v32 = vmul.f32 %v7220_v60, %v7220_v60  ;;  %v7222_v27 = vld [vmem:[#allocation103_spill] sm:$0xff]  ;;  %v3943_v60 = vmul.f32 %v3601_v39, %v3601_v39 }
 0x141   :  { %7217 = vst [vmem:[#allocation171_spill] sm:$0xff] %v3911_v11  ;;  %7219 = vst [vmem:[#allocation172_spill] sm:$0xff] %v3915_v47  ;;  %v3927_v46 = vmul.f32 %v7222_v27, %v7222_v27  ;;  %v7224_v11 = vld [vmem:[#allocation106_spill] sm:$0xff]  ;;  %v7226_v47 = vld [vmem:[#allocation147_spill] sm:$0xff] }
 0x142   :  { %7221 = vst [vmem:[#allocation173_spill] sm:$0xff] %v3923_v32  ;;  %v3935_v57 = vmul.f32 %v7224_v11, %v7224_v11  ;;  %v3939_v12 = vmul.f32 %v7226_v47, %v7226_v47  ;;  %v7228_v32 = vld [vmem:[#allocation109_spill] sm:$0xff]  ;;  %v3955_v11 = vmul.f32 %v3611_v54, %v3611_v54 }
 0x143   :  { %7223 = vst [vmem:[#allocation174_spill] sm:$0xff] %v3927_v46  ;;  %v3947_v27 = vmul.f32 %v7228_v32, %v7228_v32  ;;  %v7230_v46 = vld [vmem:[#allocation110_spill] sm:$0xff]  ;;  %v3967_v32 = vmul.f32 %v3621_v26, %v3621_v26 }
 0x144   :  { %7225 = vst [vmem:[#allocation175_spill] sm:$0xff] %v3935_v57  ;;  %7227 = vst [vmem:[#allocation176_spill] sm:$0xff] %v3939_v12  ;;  %v3951_v45 = vmul.f32 %v7230_v46, %v7230_v46  ;;  %v7232_v57 = vld [vmem:[#allocation114_spill] sm:$0xff]  ;;  %v7234_v12 = vld [vmem:[#allocation115_spill] sm:$0xff] }
 0x145   :  { %7229 = vst [vmem:[#allocation177_spill] sm:$0xff] %v3947_v27  ;;  %v3959_v47 = vmul.f32 %v7232_v57, %v7232_v57  ;;  %v3963_v39 = vmul.f32 %v7234_v12, %v7234_v12  ;;  %v7236_v27 = vld [vmem:[#allocation119_spill] sm:$0xff]  ;;  %v3979_v57 = vmul.f32 %v3631_v17, %v3631_v17 }
 0x146   :  { %7231 = vst [vmem:[#allocation178_spill] sm:$0xff] %v3951_v45  ;;  %v3971_v46 = vmul.f32 %v7236_v27, %v7236_v27  ;;  %v7238_v45 = vld [vmem:[#allocation121_spill] sm:$0xff]  ;;  %v3991_v27 = vmul.f32 %v3641_v40, %v3641_v40 }
 0x147   :  { %7233 = vst [vmem:[#allocation179_spill] sm:$0xff] %v3959_v47  ;;  %7235 = vst [vmem:[#allocation180_spill] sm:$0xff] %v3963_v39  ;;  %v3975_v54 = vmul.f32 %v7238_v45, %v7238_v45  ;;  %v7240_v47 = vld [vmem:[#allocation124_spill] sm:$0xff]  ;;  %v7242_v39 = vld [vmem:[#allocation125_spill] sm:$0xff] }
 0x148   :  { %7237 = vst [vmem:[#allocation181_spill] sm:$0xff] %v3971_v46  ;;  %v3983_v12 = vmul.f32 %v7240_v47, %v7240_v47  ;;  %v3987_v26 = vmul.f32 %v7242_v39, %v7242_v39  ;;  %v7244_v46 = vld [vmem:[#allocation127_spill] sm:$0xff]  ;;  %v4003_v47 = vmul.f32 %v3651_v51, %v3651_v51 }
 0x149   :  { %7239 = vst [vmem:[#allocation182_spill] sm:$0xff] %v3975_v54  ;;  %v3995_v45 = vmul.f32 %v7244_v46, %v7244_v46  ;;  %v7246_v54 = vld [vmem:[#allocation150_spill] sm:$0xff]  ;;  %v4015_v46 = vmul.f32 %v3661_v62, %v3661_v62 }
 0x14a   :  { %7241 = vst [vmem:[#allocation183_spill] sm:$0xff] %v3983_v12  ;;  %7243 = vst [vmem:[#allocation184_spill] sm:$0xff] %v3987_v26  ;;  %v3999_v17 = vmul.f32 %v7246_v54, %v7246_v54  ;;  %v7248_v12 = vld [vmem:[#allocation129_spill] sm:$0xff]  ;;  %v7250_v26 = vld [vmem:[#allocation152_spill] sm:$0xff] }
 0x14b   :  { %7245 = vst [vmem:[#allocation185_spill] sm:$0xff] %v3995_v45  ;;  %v4007_v39 = vmul.f32 %v7248_v12, %v7248_v12  ;;  %v4011_v40 = vmul.f32 %v7250_v26, %v7250_v26  ;;  %v7252_v45 = vld [vmem:[#allocation131_spill] sm:$0xff]  ;;  %v4027_v12 = vmul.f32 %v3671_v24, %v3671_v24 }
 0x14c   :  { %7247 = vst [vmem:[#allocation186_spill] sm:$0xff] %v3999_v17  ;;  %v4019_v54 = vmul.f32 %v7252_v45, %v7252_v45  ;;  %v7254_v17 = vld [vmem:[#allocation154_spill] sm:$0xff]  ;;  %v4039_v45 = vmul.f32 %v3681_v10, %v3681_v10 }
 0x14d   :  { %7249 = vst [vmem:[#allocation187_spill] sm:$0xff] %v4007_v39  ;;  %7251 = vst [vmem:[#allocation188_spill] sm:$0xff] %v4011_v40  ;;  %v4023_v51 = vmul.f32 %v7254_v17, %v7254_v17  ;;  %v7256_v39 = vld [vmem:[#allocation14_spill] sm:$0xff]  ;;  %v7258_v40 = vld [vmem:[#allocation32_spill] sm:$0xff] }
 0x14e   :  { %7253 = vst [vmem:[#allocation189_spill] sm:$0xff] %v4019_v54  ;;  %v4031_v26 = vmul.f32 %v7256_v39, %v7256_v39  ;;  %v4035_v62 = vmul.f32 %v7258_v40, %v7258_v40  ;;  %v7260_v54 = vld [vmem:[#allocation33_spill] sm:$0xff]  ;;  %v4051_v39 = vmul.f32 %v3691_v9, %v3691_v9 }
 0x14f   :  { %7255 = vst [vmem:[#allocation190_spill] sm:$0xff] %v4023_v51  ;;  %v4043_v17 = vmul.f32 %v7260_v54, %v7260_v54  ;;  %v7262_v51 = vld [vmem:[#allocation52_spill] sm:$0xff]  ;;  %v4063_v54 = vmul.f32 %v3701_v58, %v3701_v58 }
 0x150   :  { %7257 = vst [vmem:[#allocation191_spill] sm:$0xff] %v4031_v26  ;;  %7259 = vst [vmem:[#allocation192_spill] sm:$0xff] %v4035_v62  ;;  %v4047_v24 = vmul.f32 %v7262_v51, %v7262_v51  ;;  %v7264_v26 = vld [vmem:[#allocation15_spill] sm:$0xff]  ;;  %v7266_v62 = vld [vmem:[#allocation26_spill] sm:$0xff] }
 0x151   :  { %7261 = vst [vmem:[#allocation193_spill] sm:$0xff] %v4043_v17  ;;  %v4055_v40 = vmul.f32 %v7264_v26, %v7264_v26  ;;  %v4059_v10 = vmul.f32 %v7266_v62, %v7266_v62  ;;  %v7268_v17 = vld [vmem:[#allocation157_spill] sm:$0xff]  ;;  %v4075_v26 = vmul.f32 %v3711_v63, %v3711_v63 }
 0x152   :  { %7263 = vst [vmem:[#allocation194_spill] sm:$0xff] %v4047_v24  ;;  %v4067_v51 = vmul.f32 %v7268_v17, %v7268_v17  ;;  %v7270_v24 = vld [vmem:[#allocation17_spill] sm:$0xff]  ;;  %v4087_v17 = vmul.f32 %v3721_v29, %v3721_v29 }
 0x153   :  { %7265 = vst [vmem:[#allocation195_spill] sm:$0xff] %v4055_v40  ;;  %7267 = vst [vmem:[#allocation196_spill] sm:$0xff] %v4059_v10  ;;  %v4071_v9 = vmul.f32 %v7270_v24, %v7270_v24  ;;  %v7272_v40 = vld [vmem:[#allocation28_spill] sm:$0xff]  ;;  %v7274_v10 = vld [vmem:[#allocation19_spill] sm:$0xff] }
 0x154   :  { %7269 = vst [vmem:[#allocation197_spill] sm:$0xff] %v4067_v51  ;;  %v4079_v62 = vmul.f32 %v7272_v40, %v7272_v40  ;;  %v4083_v58 = vmul.f32 %v7274_v10, %v7274_v10  ;;  %v7276_v51 = vld [vmem:[#allocation135_spill] sm:$0xff]  ;;  %v4099_v40 = vmul.f32 %v3731_v61, %v3731_v61 }
 0x155   :  { %7271 = vst [vmem:[#allocation198_spill] sm:$0xff] %v4071_v9  ;;  %v4091_v24 = vmul.f32 %v7276_v51, %v7276_v51  ;;  %v7278_v9 = vld [vmem:[#allocation158_spill] sm:$0xff]  ;;  %v4111_v51 = vmul.f32 %v3741_v19, %v3741_v19 }
 0x156   :  { %7273 = vst [vmem:[#allocation199_spill] sm:$0xff] %v4079_v62  ;;  %7275 = vst [vmem:[#allocation200_spill] sm:$0xff] %v4083_v58  ;;  %v4095_v63 = vmul.f32 %v7278_v9, %v7278_v9  ;;  %v7280_v62 = vld [vmem:[#allocation59_spill] sm:$0xff]  ;;  %v7282_v58 = vld [vmem:[#allocation22_spill] sm:$0xff] }
 0x157   :  { %7277 = vst [vmem:[#allocation201_spill] sm:$0xff] %v4091_v24  ;;  %v4103_v10 = vmul.f32 %v7280_v62, %v7280_v62  ;;  %v4107_v29 = vmul.f32 %v7282_v58, %v7282_v58  ;;  %v7284_v24 = vld [vmem:[#allocation136_spill] sm:$0xff]  ;;  %v4123_v62 = vmul.f32 %v3751_v28, %v3751_v28 }
 0x158   :  { %7279 = vst [vmem:[#allocation202_spill] sm:$0xff] %v4095_v63  ;;  %v4115_v9 = vmul.f32 %v7284_v24, %v7284_v24  ;;  %v7286_v63 = vld [vmem:[#allocation159_spill] sm:$0xff]  ;;  %v4135_v24 = vmul.f32 %v3761_v30, %v3761_v30 }
 0x159   :  { %7281 = vst [vmem:[#allocation203_spill] sm:$0xff] %v4103_v10  ;;  %7283 = vst [vmem:[#allocation204_spill] sm:$0xff] %v4107_v29  ;;  %v4119_v61 = vmul.f32 %v7286_v63, %v7286_v63  ;;  %v7288_v10 = vld [vmem:[#allocation137_spill] sm:$0xff]  ;;  %v7290_v29 = vld [vmem:[#allocation160_spill] sm:$0xff] }
 0x15a   :  { %7285 = vst [vmem:[#allocation205_spill] sm:$0xff] %v4115_v9  ;;  %v4127_v58 = vmul.f32 %v7288_v10, %v7288_v10  ;;  %v4131_v19 = vmul.f32 %v7290_v29, %v7290_v29  ;;  %v7292_v9 = vld [vmem:[#allocation21_spill] sm:$0xff]  ;;  %v4147_v10 = vmul.f32 %v3771_v8, %v3771_v8 }
 0x15b   :  { %7287 = vst [vmem:[#allocation206_spill] sm:$0xff] %v4119_v61  ;;  %v4139_v63 = vmul.f32 %v7292_v9, %v7292_v9  ;;  %v7294_v61 = vld [vmem:[#allocation62_spill] sm:$0xff]  ;;  %v4159_v9 = vmul.f32 %v3781_v13, %v3781_v13 }
 0x15c   :  { %7289 = vst [vmem:[#allocation207_spill] sm:$0xff] %v4127_v58  ;;  %7291 = vst [vmem:[#allocation208_spill] sm:$0xff] %v4131_v19  ;;  %v4143_v28 = vmul.f32 %v7294_v61, %v7294_v61  ;;  %v7296_v58 = vld [vmem:[#allocation96_spill] sm:$0xff]  ;;  %v7298_v19 = vld [vmem:[#allocation55_spill] sm:$0xff] }
 0x15d   :  { %7293 = vst [vmem:[#allocation209_spill] sm:$0xff] %v4139_v63  ;;  %v4151_v29 = vmul.f32 %v7296_v58, %v7296_v58  ;;  %v4155_v30 = vmul.f32 %v7298_v19, %v7298_v19  ;;  %v7300_v63 = vld [vmem:[#allocation43_spill] sm:$0xff]  ;;  %v4171_v58 = vmul.f32 %v3791_v55, %v3791_v55  ;;  %v4191_v55 = vmul.f32 %v3805_v31, %v3805_v31 }
 0x15e   :  { %7295 = vst [vmem:[#allocation210_spill] sm:$0xff] %v4143_v28  ;;  %v4163_v61 = vmul.f32 %v7300_v63, %v7300_v63  ;;  %v7301_v28 = vld [vmem:[#allocation47_spill] sm:$0xff]  ;;  %v4183_v63 = vmul.f32 %v3801_v0, %v3801_v0  ;;  %v4203_v0 = vmul.f32 %v3815_v49, %v3815_v49  ;;  %v4211_v31 = vmul.f32 %v3823_v59, %v3823_v59 }
 0x15f   :  { %7297 = vst [vmem:[#allocation211_spill] sm:$0xff] %v4151_v29  ;;  %7299 = vst [vmem:[#allocation212_spill] sm:$0xff] %v4155_v30  ;;  %v4167_v8 = vmul.f32 %v7301_v28, %v7301_v28  ;;  %v7302_v29 = vld [vmem:[#allocation64_spill] sm:$0xff]  ;;  %v4187_v28 = vmul.f32 %v3803_v18, %v3803_v18  ;;  %v4207_v18 = vmul.f32 %v3821_v41, %v3821_v41 }
 0x160   :  { %v4175_v19 = vmul.f32 %v7302_v29, %v7302_v29  ;;  %v7303_v30 = vld [vmem:[#allocation76_spill] sm:$0xff]  ;;  %v4195_v29 = vmul.f32 %v3811_v33, %v3811_v33  ;;  %v4215_v33 = vmul.f32 %v3825_v14, %v3825_v14  ;;  %v4223_v49 = vmul.f32 %v3833_v37, %v3833_v37 }
 0x161   :  { %v4179_v13 = vmul.f32 %v7303_v30, %v7303_v30  ;;  %v4199_v30 = vmul.f32 %v3813_v43, %v3813_v43  ;;  %v4219_v43 = vmul.f32 %v3831_v35, %v3831_v35  ;;  %v4227_v41 = vmul.f32 %v3835_v56, %v3835_v56 }
 0x162   :  { %7304 = vst [vmem:[#allocation213_spill] sm:$0xff] %v4215_v33  ;;  %7306 = vst [vmem:[#allocation215_spill] sm:$0xff] %v4223_v49  ;;  %v4231_v59 = vmul.f32 %v3841_v16, %v3841_v16  ;;  %v4235_v14 = vmul.f32 %v3843_v52, %v3843_v52  ;;  %v4239_v35 = vmul.f32 %v3845_v50, %v3845_v50  ;;  %v7326_v49 = vld [vmem:[#allocation111_spill] sm:$0xff]  ;;  %v7332_v33 = vld [vmem:[#allocation122_spill] sm:$0xff] }
 0x163   :  { %7305 = vst [vmem:[#allocation214_spill] sm:$0xff] %v4219_v43  ;;  %7307 = vst [vmem:[#allocation216_spill] sm:$0xff] %v4227_v41  ;;  %v4243_v37 = vmul.f32 %v3851_v15, %v3851_v15  ;;  %v4247_v56 = vmul.f32 %v3853_v25, %v3853_v25  ;;  %v4251_v16 = vmul.f32 %v3855_v3, %v3855_v3  ;;  %v7323_v41 = vld [vmem:[#allocation107_spill] sm:$0xff]  ;;  %v7329_v43 = vld [vmem:[#allocation117_spill] sm:$0xff] }
 0x164   :  { %7308 = vst [vmem:[#allocation217_spill] sm:$0xff] %v4231_v59  ;;  %7309 = vst [vmem:[#allocation218_spill] sm:$0xff] %v4235_v14  ;;  %v4255_v52 = vmul.f32 %v3861_v5, %v3861_v5  ;;  %v4259_v50 = vmul.f32 %v3863_v53, %v3863_v53  ;;  %v7317_v14 = vld [vmem:[#allocation101_spill] sm:$0xff]  ;;  %v7320_v59 = vld [vmem:[#allocation146_spill] sm:$0xff] }
 0x165   :  { %7310 = vst [vmem:[#allocation219_spill] sm:$0xff] %v4239_v35  ;;  %7311 = vst [vmem:[#allocation220_spill] sm:$0xff] %v4243_v37  ;;  %v7316_v35 = vld [vmem:[#allocation112_spill] sm:$0xff]  ;;  %v7319_v37 = vld [vmem:[#allocation57_spill] sm:$0xff] }
 0x166   :  { %7312 = vst [vmem:[#allocation221_spill] sm:$0xff] %v4247_v56  ;;  %7313 = vst [vmem:[#allocation222_spill] sm:$0xff] %v4251_v16  ;;  %v4263_v15 = vmul.f32 %v7317_v14, %v7316_v35  ;;  %v4267_v25 = vmul.f32 %v7320_v59, %v7319_v37  ;;  %v7322_v56 = vld [vmem:[#allocation116_spill] sm:$0xff]  ;;  %v7334_v35 = vld [vmem:[#allocation61_spill] sm:$0xff] }
 0x167   :  { %7314 = vst [vmem:[#allocation223_spill] sm:$0xff] %v4255_v52  ;;  %7315 = vst [vmem:[#allocation224_spill] sm:$0xff] %v4259_v50  ;;  %v4271_v3 = vmul.f32 %v7323_v41, %v7322_v56  ;;  %v7325_v16 = vld [vmem:[#allocation120_spill] sm:$0xff]  ;;  %v7328_v52 = vld [vmem:[#allocation58_spill] sm:$0xff] }
 0x168   :  { %7318 = vst [vmem:[#allocation112_spill] sm:$0xff] %v4263_v15  ;;  %7321 = vst [vmem:[#allocation101_spill] sm:$0xff] %v4267_v25  ;;  %v4275_v5 = vmul.f32 %v7326_v49, %v7325_v16  ;;  %v4279_v53 = vmul.f32 %v7329_v43, %v7328_v52  ;;  %v7331_v50 = vld [vmem:[#allocation60_spill] sm:$0xff]  ;;  %v7335_v15 = vld [vmem:[#allocation126_spill] sm:$0xff] }
 0x169   :  { %7324 = vst [vmem:[#allocation57_spill] sm:$0xff] %v4271_v3  ;;  %v4283_v14 = vmul.f32 %v7332_v33, %v7331_v50  ;;  %v4287_v59 = vmul.f32 %v7335_v15, %v7334_v35  ;;  %v7337_v37 = vld [vmem:[#allocation63_spill] sm:$0xff]  ;;  %v7338_v25 = vld [vmem:[#allocation128_spill] sm:$0xff]  ;;  %v7340_v56 = vld [vmem:[#allocation65_spill] sm:$0xff] }
 0x16a   :  { %7327 = vst [vmem:[#allocation146_spill] sm:$0xff] %v4275_v5  ;;  %7330 = vst [vmem:[#allocation116_spill] sm:$0xff] %v4279_v53  ;;  %v4291_v41 = vmul.f32 %v7338_v25, %v7337_v37  ;;  %v7341_v3 = vld [vmem:[#allocation130_spill] sm:$0xff]  ;;  %v7344_v5 = vld [vmem:[#allocation132_spill] sm:$0xff] }
 0x16b   :  { %7333 = vst [vmem:[#allocation107_spill] sm:$0xff] %v4283_v14  ;;  %7336 = vst [vmem:[#allocation120_spill] sm:$0xff] %v4287_v59  ;;  %v4295_v49 = vmul.f32 %v7341_v3, %v7340_v56  ;;  %v7343_v16 = vld [vmem:[#allocation66_spill] sm:$0xff]  ;;  %v7346_v52 = vld [vmem:[#allocation67_spill] sm:$0xff] }
 0x16c   :  { %7339 = vst [vmem:[#allocation111_spill] sm:$0xff] %v4291_v41  ;;  %v4299_v43 = vmul.f32 %v7344_v5, %v7343_v16  ;;  %v7347_v53 = vld [vmem:[#allocation23_spill] sm:$0xff]  ;;  %v7349_v50 = vld [vmem:[#allocation69_spill] sm:$0xff]  ;;  %v7352_v35 = vld [vmem:[#allocation70_spill] sm:$0xff] }
 0x16d   :  { %7342 = vst [vmem:[#allocation58_spill] sm:$0xff] %v4295_v49  ;;  %v4303_v33 = vmul.f32 %v7347_v53, %v7346_v52  ;;  %v7350_v14 = vld [vmem:[#allocation133_spill] sm:$0xff]  ;;  %v7353_v59 = vld [vmem:[#allocation34_spill] sm:$0xff]  ;;  %v7355_v37 = vld [vmem:[#allocation71_spill] sm:$0xff] }
 0x16e   :  { %7345 = vst [vmem:[#allocation117_spill] sm:$0xff] %v4299_v43  ;;  %v4307_v15 = vmul.f32 %v7350_v14, %v7349_v50  ;;  %v4311_v25 = vmul.f32 %v7353_v59, %v7352_v35  ;;  %v7356_v41 = vld [vmem:[#allocation27_spill] sm:$0xff]  ;;  %v7358_v56 = vld [vmem:[#allocation73_spill] sm:$0xff]  ;;  %v7361_v16 = vld [vmem:[#allocation74_spill] sm:$0xff] }
 0x16f   :  { %7348 = vst [vmem:[#allocation60_spill] sm:$0xff] %v4303_v33  ;;  %v4315_v3 = vmul.f32 %v7356_v41, %v7355_v37  ;;  %v7359_v49 = vld [vmem:[#allocation31_spill] sm:$0xff]  ;;  %v7362_v43 = vld [vmem:[#allocation20_spill] sm:$0xff]  ;;  %v7367_v50 = vld [vmem:[#allocation77_spill] sm:$0xff] }
 0x170   :  { %7351 = vst [vmem:[#allocation122_spill] sm:$0xff] %v4307_v15  ;;  %7354 = vst [vmem:[#allocation61_spill] sm:$0xff] %v4311_v25  ;;  %v4319_v5 = vmul.f32 %v7359_v49, %v7358_v56  ;;  %v4323_v53 = vmul.f32 %v7362_v43, %v7361_v16  ;;  %v7364_v52 = vld [vmem:[#allocation75_spill] sm:$0xff]  ;;  %v7365_v33 = vld [vmem:[#allocation16_spill] sm:$0xff] }
 0x171   :  { %7357 = vst [vmem:[#allocation126_spill] sm:$0xff] %v4315_v3  ;;  %v4327_v14 = vmul.f32 %v7365_v33, %v7364_v52  ;;  %v7368_v15 = vld [vmem:[#allocation30_spill] sm:$0xff]  ;;  %v7370_v25 = vld [vmem:[#allocation35_spill] sm:$0xff]  ;;  %v7372_v3 = vld [vmem:[#allocation72_spill] sm:$0xff] }
 0x172   :  { %7360 = vst [vmem:[#allocation63_spill] sm:$0xff] %v4319_v5  ;;  %7363 = vst [vmem:[#allocation128_spill] sm:$0xff] %v4323_v53  ;;  %v4331_v59 = vmul.f32 %v7368_v15, %v7367_v50  ;;  %v7369_v35 = vld [vmem:[#allocation78_spill] sm:$0xff]  ;;  %v7371_v37 = vld [vmem:[#allocation79_spill] sm:$0xff] }
 0x173   :  { %7366 = vst [vmem:[#allocation65_spill] sm:$0xff] %v4327_v14  ;;  %v4335_v41 = vmul.f32 %v7370_v25, %v7369_v35  ;;  %v4339_v49 = vmul.f32 %v7372_v3, %v7371_v37  ;;  %v7373_v56 = vld [vmem:[#allocation81_spill] sm:$0xff]  ;;  %v7374_v5 = vld [vmem:[#allocation40_spill] sm:$0xff]  ;;  %v7375_v16 = vld [vmem:[#allocation82_spill] sm:$0xff] }
 0x174   :  { %v4343_v43 = vmul.f32 %v7374_v5, %v7373_v56  ;;  %v7376_v53 = vld [vmem:[#allocation51_spill] sm:$0xff]  ;;  %v7378_v14 = vld [vmem:[#allocation88_spill] sm:$0xff]  ;;  %v7380_v50 = vld [vmem:[#allocation45_spill] sm:$0xff] }
 0x175   :  { %v4347_v33 = vmul.f32 %v7376_v53, %v7375_v16  ;;  %v7377_v52 = vld [vmem:[#allocation83_spill] sm:$0xff]  ;;  %v4355_v25 = vmul.f32 %v7380_v50, %v3531_v48  ;;  %v7382_v35 = vld [vmem:[#allocation85_spill] sm:$0xff]  ;;  %v7384_v37 = vld [vmem:[#allocation86_spill] sm:$0xff] }
 0x176   :  { %v4351_v15 = vmul.f32 %v7378_v14, %v7377_v52  ;;  %v4359_v3 = vmul.f32 %v3819_v23, %v7382_v35  ;;  %v4363_v5 = vmul.f32 %v3829_v42, %v7384_v37  ;;  %v7386_v56 = vld [vmem:[#allocation87_spill] sm:$0xff]  ;;  %v4371_v14 = vmul.f32 %v3849_v36, %v3541_v21  ;;  %v7389_v16 = vld [vmem:[#allocation138_spill] sm:$0xff]  ;;  %v7391_v52 = vld [vmem:[#allocation89_spill] sm:$0xff] }
 0x177   :  { %7381 = vst [vmem:[#allocation66_spill] sm:$0xff] %v4355_v25  ;;  %v4367_v53 = vmul.f32 %v3839_v7, %v7386_v56  ;;  %v4375_v48 = vmul.f32 %v3859_v22, %v7389_v16  ;;  %v4379_v23 = vmul.f32 %v3867_v38, %v7391_v52  ;;  %v7393_v50 = vld [vmem:[#allocation90_spill] sm:$0xff]  ;;  %v7395_v35 = vld [vmem:[#allocation139_spill] sm:$0xff]  ;;  %v7399_v21 = vld [vmem:[#allocation93_spill] sm:$0xff] }
 0x178   :  { %7379 = vst [vmem:[#allocation130_spill] sm:$0xff] %v4351_v15  ;;  %7383 = vst [vmem:[#allocation132_spill] sm:$0xff] %v4359_v3  ;;  %v4383_v42 = vmul.f32 %v3871_v44, %v7393_v50  ;;  %v4387_v7 = vmul.f32 %v3875_v34, %v7395_v35  ;;  %v7397_v37 = vld [vmem:[#allocation91_spill] sm:$0xff]  ;;  %v7398_v56 = vld [vmem:[#allocation166_spill] sm:$0xff]  ;;  %v4395_v22 = vmul.f32 %v3883_v2, %v7399_v21 }
 0x179   :  { %7385 = vst [vmem:[#allocation67_spill] sm:$0xff] %v4363_v5  ;;  %7387 = vst [vmem:[#allocation23_spill] sm:$0xff] %v4367_v53  ;;  %v4391_v36 = vmul.f32 %v7398_v56, %v7397_v37  ;;  %v7400_v16 = vld [vmem:[#allocation94_spill] sm:$0xff]  ;;  %v7402_v52 = vld [vmem:[#allocation141_spill] sm:$0xff] }
 0x17a   :  { %7388 = vst [vmem:[#allocation69_spill] sm:$0xff] %v4371_v14  ;;  %7390 = vst [vmem:[#allocation133_spill] sm:$0xff] %v4375_v48  ;;  %v7401_v48 = vld [vmem:[#allocation167_spill] sm:$0xff]  ;;  %v7404_v50 = vld [vmem:[#allocation142_spill] sm:$0xff] }
 0x17b   :  { %7392 = vst [vmem:[#allocation70_spill] sm:$0xff] %v4379_v23  ;;  %7394 = vst [vmem:[#allocation34_spill] sm:$0xff] %v4383_v42  ;;  %v4399_v38 = vmul.f32 %v7401_v48, %v7400_v16  ;;  %v7403_v23 = vld [vmem:[#allocation168_spill] sm:$0xff]  ;;  %v4407_v34 = vmul.f32 %v3895_v4, %v7404_v50  ;;  %v7405_v35 = vld [vmem:[#allocation97_spill] sm:$0xff] }
 0x17c   :  { %7396 = vst [vmem:[#allocation71_spill] sm:$0xff] %v4387_v7  ;;  %v4403_v44 = vmul.f32 %v7403_v23, %v7402_v52  ;;  %v7406_v7 = vld [vmem:[#allocation169_spill] sm:$0xff]  ;;  %v7407_v56 = vld [vmem:[#allocation98_spill] sm:$0xff]  ;;  %v7410_v21 = vld [vmem:[#allocation143_spill] sm:$0xff] }
 0x17d   :  { %v4411_v37 = vmul.f32 %v7406_v7, %v7405_v35  ;;  %v7408_v42 = vld [vmem:[#allocation170_spill] sm:$0xff]  ;;  %v4419_v48 = vmul.f32 %v3907_v6, %v7410_v21  ;;  %v7412_v16 = vld [vmem:[#allocation99_spill] sm:$0xff]  ;;  %v7415_v52 = vld [vmem:[#allocation144_spill] sm:$0xff] }
 0x17e   :  { %v4415_v2 = vmul.f32 %v7408_v42, %v7407_v56  ;;  %v7413_v14 = vld [vmem:[#allocation171_spill] sm:$0xff]  ;;  %v7416_v53 = vld [vmem:[#allocation172_spill] sm:$0xff]  ;;  %v7418_v50 = vld [vmem:[#allocation102_spill] sm:$0xff] }
 0x17f   :  { %7411 = vst [vmem:[#allocation73_spill] sm:$0xff] %v4419_v48  ;;  %v4423_v23 = vmul.f32 %v7413_v14, %v7412_v16  ;;  %v4427_v4 = vmul.f32 %v7416_v53, %v7415_v52  ;;  %v4431_v7 = vmul.f32 %v3919_v20, %v7418_v50  ;;  %v7420_v35 = vld [vmem:[#allocation145_spill] sm:$0xff]  ;;  %v7423_v56 = vld [vmem:[#allocation103_spill] sm:$0xff]  ;;  %v7424_v3 = vld [vmem:[#allocation174_spill] sm:$0xff] }
 0x180   :  { %7409 = vst [vmem:[#allocation27_spill] sm:$0xff] %v4415_v2  ;;  %v7421_v5 = vld [vmem:[#allocation173_spill] sm:$0xff]  ;;  %v4439_v6 = vmul.f32 %v7424_v3, %v7423_v56  ;;  %v7428_v16 = vld [vmem:[#allocation106_spill] sm:$0xff]  ;;  %v7431_v52 = vld [vmem:[#allocation147_spill] sm:$0xff] }
 0x181   :  { %7414 = vst [vmem:[#allocation31_spill] sm:$0xff] %v4423_v23  ;;  %7417 = vst [vmem:[#allocation74_spill] sm:$0xff] %v4427_v4  ;;  %v4435_v42 = vmul.f32 %v7421_v5, %v7420_v35  ;;  %v7426_v21 = vld [vmem:[#allocation105_spill] sm:$0xff]  ;;  %v7429_v23 = vld [vmem:[#allocation175_spill] sm:$0xff] }
 0x182   :  { %7419 = vst [vmem:[#allocation20_spill] sm:$0xff] %v4431_v7  ;;  %7425 = vst [vmem:[#allocation16_spill] sm:$0xff] %v4439_v6  ;;  %v4443_v14 = vmul.f32 %v3931_v1, %v7426_v21  ;;  %v4447_v53 = vmul.f32 %v7429_v23, %v7428_v16  ;;  %v7432_v4 = vld [vmem:[#allocation176_spill] sm:$0xff]  ;;  %v7435_v35 = vld [vmem:[#allocation109_spill] sm:$0xff] }
 0x183   :  { %7422 = vst [vmem:[#allocation75_spill] sm:$0xff] %v4435_v42  ;;  %v4451_v20 = vmul.f32 %v7432_v4, %v7431_v52  ;;  %v7434_v50 = vld [vmem:[#allocation148_spill] sm:$0xff]  ;;  %v7436_v42 = vld [vmem:[#allocation177_spill] sm:$0xff]  ;;  %v7437_v56 = vld [vmem:[#allocation110_spill] sm:$0xff] }
 0x184   :  { %7427 = vst [vmem:[#allocation77_spill] sm:$0xff] %v4443_v14  ;;  %7430 = vst [vmem:[#allocation30_spill] sm:$0xff] %v4447_v53  ;;  %v4455_v5 = vmul.f32 %v3943_v60, %v7434_v50  ;;  %v4459_v3 = vmul.f32 %v7436_v42, %v7435_v35  ;;  %v7438_v6 = vld [vmem:[#allocation178_spill] sm:$0xff]  ;;  %v7439_v21 = vld [vmem:[#allocation113_spill] sm:$0xff] }
 0x185   :  { %7433 = vst [vmem:[#allocation78_spill] sm:$0xff] %v4451_v20  ;;  %v4463_v1 = vmul.f32 %v7438_v6, %v7437_v56  ;;  %v4467_v23 = vmul.f32 %v3955_v11, %v7439_v21  ;;  %v7440_v16 = vld [vmem:[#allocation114_spill] sm:$0xff]  ;;  %v7441_v53 = vld [vmem:[#allocation179_spill] sm:$0xff]  ;;  %v7443_v20 = vld [vmem:[#allocation180_spill] sm:$0xff] }
 0x186   :  { %v4471_v4 = vmul.f32 %v7441_v53, %v7440_v16  ;;  %v7442_v52 = vld [vmem:[#allocation115_spill] sm:$0xff]  ;;  %v7444_v50 = vld [vmem:[#allocation118_spill] sm:$0xff]  ;;  %v7447_v14 = vld [vmem:[#allocation181_spill] sm:$0xff] }
 0x187   :  { %v4475_v60 = vmul.f32 %v7443_v20, %v7442_v52  ;;  %v4479_v42 = vmul.f32 %v3967_v32, %v7444_v50  ;;  %v7446_v35 = vld [vmem:[#allocation119_spill] sm:$0xff]  ;;  %v7449_v56 = vld [vmem:[#allocation121_spill] sm:$0xff]  ;;  %v7450_v7 = vld [vmem:[#allocation182_spill] sm:$0xff] }
 0x188   :  { %v4483_v6 = vmul.f32 %v7447_v14, %v7446_v35  ;;  %v4487_v11 = vmul.f32 %v7450_v7, %v7449_v56  ;;  %v7452_v21 = vld [vmem:[#allocation123_spill] sm:$0xff]  ;;  %v7454_v16 = vld [vmem:[#allocation124_spill] sm:$0xff]  ;;  %v7457_v52 = vld [vmem:[#allocation125_spill] sm:$0xff] }
 0x189   :  { %7445 = vst [vmem:[#allocation35_spill] sm:$0xff] %v4479_v42  ;;  %v4491_v53 = vmul.f32 %v3979_v57, %v7452_v21  ;;  %v7455_v48 = vld [vmem:[#allocation183_spill] sm:$0xff]  ;;  %v7458_v25 = vld [vmem:[#allocation184_spill] sm:$0xff]  ;;  %v7460_v50 = vld [vmem:[#allocation149_spill] sm:$0xff] }
 0x18a   :  { %7448 = vst [vmem:[#allocation79_spill] sm:$0xff] %v4483_v6  ;;  %7451 = vst [vmem:[#allocation72_spill] sm:$0xff] %v4487_v11  ;;  %v4495_v20 = vmul.f32 %v7455_v48, %v7454_v16  ;;  %v4499_v32 = vmul.f32 %v7458_v25, %v7457_v52  ;;  %v4503_v14 = vmul.f32 %v3991_v27, %v7460_v50  ;;  %v7462_v35 = vld [vmem:[#allocation127_spill] sm:$0xff]  ;;  %v7463_v6 = vld [vmem:[#allocation185_spill] sm:$0xff] }
 0x18b   :  { %7453 = vst [vmem:[#allocation81_spill] sm:$0xff] %v4491_v53  ;;  %v4507_v7 = vmul.f32 %v7463_v6, %v7462_v35  ;;  %v7465_v56 = vld [vmem:[#allocation150_spill] sm:$0xff]  ;;  %v7468_v21 = vld [vmem:[#allocation151_spill] sm:$0xff]  ;;  %v7470_v16 = vld [vmem:[#allocation129_spill] sm:$0xff] }
 0x18c   :  { %7456 = vst [vmem:[#allocation40_spill] sm:$0xff] %v4495_v20  ;;  %7459 = vst [vmem:[#allocation82_spill] sm:$0xff] %v4499_v32  ;;  %v7466_v11 = vld [vmem:[#allocation186_spill] sm:$0xff]  ;;  %v4515_v48 = vmul.f32 %v4003_v47, %v7468_v21  ;;  %v7471_v20 = vld [vmem:[#allocation187_spill] sm:$0xff] }
 0x18d   :  { %7461 = vst [vmem:[#allocation51_spill] sm:$0xff] %v4503_v14  ;;  %7464 = vst [vmem:[#allocation83_spill] sm:$0xff] %v4507_v7  ;;  %v4511_v57 = vmul.f32 %v7466_v11, %v7465_v56  ;;  %v4519_v25 = vmul.f32 %v7471_v20, %v7470_v16  ;;  %v7472_v52 = vld [vmem:[#allocation152_spill] sm:$0xff]  ;;  %v7474_v50 = vld [vmem:[#allocation153_spill] sm:$0xff] }
 0x18e   :  { %7469 = vst [vmem:[#allocation45_spill] sm:$0xff] %v4515_v48  ;;  %v7473_v32 = vld [vmem:[#allocation188_spill] sm:$0xff]  ;;  %v4527_v6 = vmul.f32 %v4015_v46, %v7474_v50  ;;  %v7475_v35 = vld [vmem:[#allocation131_spill] sm:$0xff]  ;;  %v7476_v7 = vld [vmem:[#allocation189_spill] sm:$0xff] }
 0x18f   :  { %7467 = vst [vmem:[#allocation88_spill] sm:$0xff] %v4511_v57  ;;  %v4523_v27 = vmul.f32 %v7473_v32, %v7472_v52  ;;  %v4531_v11 = vmul.f32 %v7476_v7, %v7475_v35  ;;  %v7477_v56 = vld [vmem:[#allocation154_spill] sm:$0xff]  ;;  %v7479_v21 = vld [vmem:[#allocation155_spill] sm:$0xff]  ;;  %v7483_v52 = vld [vmem:[#allocation32_spill] sm:$0xff] }
 0x190   :  { %v7478_v57 = vld [vmem:[#allocation190_spill] sm:$0xff]  ;;  %v4539_v20 = vmul.f32 %v4027_v12, %v7479_v21  ;;  %v7481_v48 = vld [vmem:[#allocation191_spill] sm:$0xff]  ;;  %v7484_v14 = vld [vmem:[#allocation192_spill] sm:$0xff] }
 0x191   :  { %v4535_v47 = vmul.f32 %v7478_v57, %v7477_v56  ;;  %v7480_v16 = vld [vmem:[#allocation14_spill] sm:$0xff]  ;;  %v4547_v46 = vmul.f32 %v7484_v14, %v7483_v52  ;;  %v7486_v50 = vld [vmem:[#allocation24_spill] sm:$0xff]  ;;  %v7488_v35 = vld [vmem:[#allocation33_spill] sm:$0xff] }
 0x192   :  { %v4543_v32 = vmul.f32 %v7481_v48, %v7480_v16  ;;  %v4551_v7 = vmul.f32 %v4039_v45, %v7486_v50  ;;  %v7489_v53 = vld [vmem:[#allocation193_spill] sm:$0xff]  ;;  %v7491_v56 = vld [vmem:[#allocation52_spill] sm:$0xff]  ;;  %v7492_v42 = vld [vmem:[#allocation194_spill] sm:$0xff] }
 0x193   :  { %7485 = vst [vmem:[#allocation86_spill] sm:$0xff] %v4547_v46  ;;  %v4555_v57 = vmul.f32 %v7489_v53, %v7488_v35  ;;  %v4559_v12 = vmul.f32 %v7492_v42, %v7491_v56  ;;  %v7494_v21 = vld [vmem:[#allocation156_spill] sm:$0xff]  ;;  %v7496_v16 = vld [vmem:[#allocation15_spill] sm:$0xff]  ;;  %v7499_v52 = vld [vmem:[#allocation26_spill] sm:$0xff] }
 0x194   :  { %7482 = vst [vmem:[#allocation85_spill] sm:$0xff] %v4543_v32  ;;  %7487 = vst [vmem:[#allocation87_spill] sm:$0xff] %v4551_v7  ;;  %v4563_v48 = vmul.f32 %v4051_v39, %v7494_v21  ;;  %v7497_v32 = vld [vmem:[#allocation195_spill] sm:$0xff]  ;;  %v7500_v46 = vld [vmem:[#allocation196_spill] sm:$0xff] }
 0x195   :  { %7490 = vst [vmem:[#allocation138_spill] sm:$0xff] %v4555_v57  ;;  %7493 = vst [vmem:[#allocation89_spill] sm:$0xff] %v4559_v12  ;;  %v4567_v14 = vmul.f32 %v7497_v32, %v7496_v16  ;;  %v4571_v45 = vmul.f32 %v7500_v46, %v7499_v52  ;;  %v7502_v50 = vld [vmem:[#allocation134_spill] sm:$0xff]  ;;  %v7504_v35 = vld [vmem:[#allocation157_spill] sm:$0xff] }
 0x196   :  { %7495 = vst [vmem:[#allocation90_spill] sm:$0xff] %v4563_v48  ;;  %v4575_v53 = vmul.f32 %v4063_v54, %v7502_v50  ;;  %v7505_v57 = vld [vmem:[#allocation197_spill] sm:$0xff]  ;;  %v7508_v12 = vld [vmem:[#allocation198_spill] sm:$0xff]  ;;  %v7509_v21 = vld [vmem:[#allocation56_spill] sm:$0xff] }
 0x197   :  { %7498 = vst [vmem:[#allocation139_spill] sm:$0xff] %v4567_v14  ;;  %7501 = vst [vmem:[#allocation91_spill] sm:$0xff] %v4571_v45  ;;  %v4579_v42 = vmul.f32 %v7505_v57, %v7504_v35  ;;  %v7507_v56 = vld [vmem:[#allocation17_spill] sm:$0xff]  ;;  %v1225_v48 = vmul.f32 %v4075_v26, %v7509_v21  ;;  %v7510_v32 = vld [vmem:[#allocation28_spill] sm:$0xff] }
 0x198   :  { %7503 = vst [vmem:[#allocation166_spill] sm:$0xff] %v4575_v53  ;;  %v1224_v39 = vmul.f32 %v7508_v12, %v7507_v56  ;;  %v7511_v16 = vld [vmem:[#allocation199_spill] sm:$0xff]  ;;  %v7513_v46 = vld [vmem:[#allocation200_spill] sm:$0xff]  ;;  %v7514_v45 = vld [vmem:[#allocation37_spill] sm:$0xff] }
 0x199   :  { %7506 = vst [vmem:[#allocation93_spill] sm:$0xff] %v4579_v42  ;;  %v1226_v14 = vmul.f32 %v7511_v16, %v7510_v32  ;;  %v7512_v7 = vld [vmem:[#allocation19_spill] sm:$0xff]  ;;  %v4593_v54 = vmul.f32 %v4087_v17, %v7514_v45  ;;  %v7516_v57 = vld [vmem:[#allocation201_spill] sm:$0xff]  ;;  %v7517_v42 = vld [vmem:[#allocation158_spill] sm:$0xff] }
 0x19a   :  { %v4589_v52 = vmul.f32 %v7513_v46, %v7512_v7  ;;  %v7515_v50 = vld [vmem:[#allocation135_spill] sm:$0xff]  ;;  %v7518_v12 = vld [vmem:[#allocation202_spill] sm:$0xff]  ;;  %v7520_v26 = vld [vmem:[#allocation36_spill] sm:$0xff] }
 0x19b   :  { %v4597_v35 = vmul.f32 %v7516_v57, %v7515_v50  ;;  %v4601_v56 = vmul.f32 %v7518_v12, %v7517_v42  ;;  %v4605_v21 = vmul.f32 %v4099_v40, %v7520_v26  ;;  %v7522_v32 = vld [vmem:[#allocation59_spill] sm:$0xff]  ;;  %v7525_v46 = vld [vmem:[#allocation22_spill] sm:$0xff]  ;;  %v7526_v53 = vld [vmem:[#allocation204_spill] sm:$0xff] }
 0x19c   :  { %v7523_v16 = vld [vmem:[#allocation203_spill] sm:$0xff]  ;;  %v4613_v17 = vmul.f32 %v7526_v53, %v7525_v46  ;;  %v7528_v45 = vld [vmem:[#allocation38_spill] sm:$0xff]  ;;  %v7530_v57 = vld [vmem:[#allocation136_spill] sm:$0xff] }
 0x19d   :  { %7519 = vst [vmem:[#allocation94_spill] sm:$0xff] %v4601_v56  ;;  %7521 = vst [vmem:[#allocation167_spill] sm:$0xff] %v4605_v21  ;;  %v4609_v7 = vmul.f32 %v7523_v16, %v7522_v32  ;;  %v4617_v50 = vmul.f32 %v4111_v51, %v7528_v45  ;;  %v7531_v2 = vld [vmem:[#allocation205_spill] sm:$0xff]  ;;  %v7533_v12 = vld [vmem:[#allocation159_spill] sm:$0xff] }
 0x19e   :  { %7527 = vst [vmem:[#allocation168_spill] sm:$0xff] %v4613_v17  ;;  %v4621_v42 = vmul.f32 %v7531_v2, %v7530_v57  ;;  %v7534_v56 = vld [vmem:[#allocation206_spill] sm:$0xff]  ;;  %v7538_v16 = vld [vmem:[#allocation137_spill] sm:$0xff]  ;;  %v7541_v46 = vld [vmem:[#allocation160_spill] sm:$0xff] }
 0x19f   :  { %7524 = vst [vmem:[#allocation141_spill] sm:$0xff] %v4609_v7  ;;  %7529 = vst [vmem:[#allocation142_spill] sm:$0xff] %v4617_v50  ;;  %v4625_v40 = vmul.f32 %v7534_v56, %v7533_v12  ;;  %v7536_v26 = vld [vmem:[#allocation18_spill] sm:$0xff]  ;;  %v7539_v7 = vld [vmem:[#allocation207_spill] sm:$0xff] }
 0x1a0   :  { %7532 = vst [vmem:[#allocation97_spill] sm:$0xff] %v4621_v42  ;;  %v4629_v32 = vmul.f32 %v4123_v62, %v7536_v26  ;;  %v4633_v53 = vmul.f32 %v7539_v7, %v7538_v16  ;;  %v7542_v17 = vld [vmem:[#allocation208_spill] sm:$0xff]  ;;  %v7545_v57 = vld [vmem:[#allocation21_spill] sm:$0xff]  ;;  %v7547_v56 = vld [vmem:[#allocation62_spill] sm:$0xff] }
 0x1a1   :  { %7535 = vst [vmem:[#allocation169_spill] sm:$0xff] %v4625_v40  ;;  %v4637_v51 = vmul.f32 %v7542_v17, %v7541_v46  ;;  %v7544_v45 = vld [vmem:[#allocation108_spill] sm:$0xff]  ;;  %v7546_v42 = vld [vmem:[#allocation209_spill] sm:$0xff]  ;;  %v7548_v12 = vld [vmem:[#allocation210_spill] sm:$0xff] }
 0x1a2   :  { %7537 = vst [vmem:[#allocation98_spill] sm:$0xff] %v4629_v32  ;;  %7540 = vst [vmem:[#allocation170_spill] sm:$0xff] %v4633_v53  ;;  %v1240_v2 = vmul.f32 %v4135_v24, %v7544_v45  ;;  %v1241_v50 = vmul.f32 %v7546_v42, %v7545_v57  ;;  %v1242_v40 = vmul.f32 %v7548_v12, %v7547_v56  ;;  %v7549_v21 = vld [vmem:[#allocation84_spill] sm:$0xff]  ;;  %v7551_v32 = vld [vmem:[#allocation211_spill] sm:$0xff] }
 0x1a3   :  { %7543 = vst [vmem:[#allocation143_spill] sm:$0xff] %v4637_v51  ;;  %v1243_v62 = vmul.f32 %v4147_v10, %v7549_v21  ;;  %v7550_v26 = vld [vmem:[#allocation96_spill] sm:$0xff]  ;;  %v7552_v16 = vld [vmem:[#allocation55_spill] sm:$0xff]  ;;  %v7557_v10 = vld [vmem:[#allocation25_spill] sm:$0xff] }
 0x1a4   :  { %v1244_v7 = vmul.f32 %v7551_v32, %v7550_v26  ;;  %v7553_v53 = vld [vmem:[#allocation212_spill] sm:$0xff]  ;;  %v7554_v17 = vld [vmem:[#allocation39_spill] sm:$0xff]  ;;  %v4667_v21 = vmul.f32 %v4171_v58, %v7557_v10  ;;  %v7578_v51 = vld [vmem:[#allocation214_spill] sm:$0xff] }
 0x1a5   :  { %v4651_v15 = vmul.f32 %v7553_v53, %v7552_v16  ;;  %v4655_v46 = vmul.f32 %v4159_v9, %v7554_v17  ;;  %v7555_v24 = vld [vmem:[#allocation43_spill] sm:$0xff]  ;;  %v7559_v32 = vld [vmem:[#allocation64_spill] sm:$0xff]  ;;  %v7567_v16 = vld [vmem:[#allocation41_spill] sm:$0xff] }
 0x1a6   :  { %v4659_v42 = vmul.f32 %v4163_v61, %v7555_v24  ;;  %v7556_v45 = vld [vmem:[#allocation47_spill] sm:$0xff]  ;;  %7558 = vst [vmem:[#allocation99_spill] sm:$0xff] %v4667_v21  ;;  %v4671_v53 = vmul.f32 %v4175_v19, %v7559_v32  ;;  %v7561_v56 = vld [vmem:[#allocation76_spill] sm:$0xff]  ;;  %v4687_v58 = vmul.f32 %v4191_v55, %v7567_v16  ;;  %v7569_v17 = vld [vmem:[#allocation49_spill] sm:$0xff] }
 0x1a7   :  { %v4663_v57 = vmul.f32 %v4167_v8, %v7556_v45  ;;  %v4675_v9 = vmul.f32 %v4179_v13, %v7561_v56  ;;  %v7563_v12 = vld [vmem:[#allocation100_spill] sm:$0xff]  ;;  %v4691_v19 = vmul.f32 %v4195_v29, %v7569_v17  ;;  %v7571_v24 = vld [vmem:[#allocation53_spill] sm:$0xff]  ;;  %v7580_v17 = vld [vmem:[#allocation215_spill] sm:$0xff] }
 0x1a8   :  { %7560 = vst [vmem:[#allocation171_spill] sm:$0xff] %v4671_v53  ;;  %v4679_v61 = vmul.f32 %v4183_v63, %v7563_v12  ;;  %v7565_v26 = vld [vmem:[#allocation44_spill] sm:$0xff]  ;;  %7568 = vst [vmem:[#allocation145_spill] sm:$0xff] %v4687_v58  ;;  %v1256_v13 = vmul.f32 %v4199_v30, %v7571_v24  ;;  %v7572_v45 = vld [vmem:[#allocation29_spill] sm:$0xff] }
 0x1a9   :  { %7562 = vst [vmem:[#allocation144_spill] sm:$0xff] %v4675_v9  ;;  %v4683_v8 = vmul.f32 %v4187_v28, %v7565_v26  ;;  %7570 = vst [vmem:[#allocation173_spill] sm:$0xff] %v4691_v19  ;;  %v1257_v10 = vmul.f32 %v4203_v0, %v7572_v45  ;;  %v7573_v63 = vld [vmem:[#allocation68_spill] sm:$0xff]  ;;  %v7576_v26 = vld [vmem:[#allocation213_spill] sm:$0xff] }
 0x1aa   :  { %7564 = vst [vmem:[#allocation172_spill] sm:$0xff] %v4679_v61  ;;  %v1258_v32 = vmul.f32 %v4207_v18, %v7573_v63  ;;  %v7574_v56 = vld [vmem:[#allocation80_spill] sm:$0xff]  ;;  %v7583_v0 = vld [vmem:[#allocation46_spill] sm:$0xff]  ;;  %v7584_v45 = vld [vmem:[#allocation217_spill] sm:$0xff] }
 0x1ab   :  { %7566 = vst [vmem:[#allocation102_spill] sm:$0xff] %v4683_v8  ;;  %v1259_v28 = vmul.f32 %v4211_v31, %v7574_v56  ;;  %v7575_v12 = vld [vmem:[#allocation92_spill] sm:$0xff]  ;;  %v7581_v8 = vld [vmem:[#allocation42_spill] sm:$0xff]  ;;  %v4713_v61 = vmul.f32 %v7584_v45, %v7583_v0  ;;  %v7599_v21 = vld [vmem:[#allocation223_spill] sm:$0xff] }
 0x1ac   :  { %v1260_v55 = vmul.f32 %v7576_v26, %v7575_v12  ;;  %v7577_v16 = vld [vmem:[#allocation104_spill] sm:$0xff]  ;;  %v7585_v18 = vld [vmem:[#allocation50_spill] sm:$0xff]  ;;  %v7589_v12 = vld [vmem:[#allocation219_spill] sm:$0xff] }
 0x1ad   :  { %v1261_v58 = vmul.f32 %v7578_v51, %v7577_v16  ;;  %v7579_v29 = vld [vmem:[#allocation48_spill] sm:$0xff]  ;;  %v7586_v63 = vld [vmem:[#allocation218_spill] sm:$0xff]  ;;  %v7591_v51 = vld [vmem:[#allocation161_spill] sm:$0xff] }
 0x1ae   :  { %v1262_v19 = vmul.f32 %v7580_v17, %v7579_v29  ;;  %v7582_v30 = vld [vmem:[#allocation216_spill] sm:$0xff]  ;;  %v4717_v31 = vmul.f32 %v7586_v63, %v7585_v18  ;;  %v7588_v56 = vld [vmem:[#allocation54_spill] sm:$0xff]  ;;  %v7595_v17 = vld [vmem:[#allocation221_spill] sm:$0xff] }
 0x1af   :  { %v4709_v24 = vmul.f32 %v7582_v30, %v7581_v8  ;;  %v4721_v26 = vmul.f32 %v7589_v12, %v7588_v56  ;;  %v7592_v16 = vld [vmem:[#allocation220_spill] sm:$0xff]  ;;  %v7594_v29 = vld [vmem:[#allocation162_spill] sm:$0xff]  ;;  %v7596_v30 = vld [vmem:[#allocation163_spill] sm:$0xff] }
 0x1b0   :  { %7587 = vst [vmem:[#allocation103_spill] sm:$0xff] %v4717_v31  ;;  %v4725_v9 = vmul.f32 %v7592_v16, %v7591_v51  ;;  %v4729_v8 = vmul.f32 %v7595_v17, %v7594_v29  ;;  %v7597_v53 = vld [vmem:[#allocation222_spill] sm:$0xff]  ;;  %v7598_v45 = vld [vmem:[#allocation164_spill] sm:$0xff]  ;;  %v7600_v63 = vld [vmem:[#allocation165_spill] sm:$0xff]  ;;  %v1314_v29 = vadd.f32 %v4395_v22, %v4391_v36  ;;  %v1377_v17 = vadd.f32 %v1225_v48, %v1224_v39 }
 0x1b1   :  { %7590 = vst [vmem:[#allocation174_spill] sm:$0xff] %v4721_v26  ;;  %v4733_v0 = vmul.f32 %v7597_v53, %v7596_v30  ;;  %v4737_v18 = vmul.f32 %v7599_v21, %v7598_v45  ;;  %v7601_v31 = vld [vmem:[#allocation224_spill] sm:$0xff]  ;;  %v7604_v26 = vld [vmem:[#allocation101_spill] sm:$0xff]  ;;  %v1335_v53 = vadd.f32 %v4459_v3, %v4455_v5  ;;  %v1356_v21 = vadd.f32 %v4523_v27, %v4519_v25 }
 0x1b2   :  { %7593 = vst [vmem:[#allocation105_spill] sm:$0xff] %v4725_v9  ;;  %v4741_v56 = vmul.f32 %v7601_v31, %v7600_v63  ;;  %v7603_v12 = vld [vmem:[#allocation112_spill] sm:$0xff]  ;;  %v7605_v16 = vld [vmem:[#allocation65_spill] sm:$0xff]  ;;  %v1398_v30 = vadd.f32 %v1241_v50, %v1240_v2  ;;  %v1378_v36 = vadd.f32 %v1377_v17, %v1226_v14 }
 0x1b3   :  { %v1272_v51 = vadd.f32 %v7604_v26, %v7603_v12  ;;  %v1293_v9 = vadd.f32 %v4331_v59, %v7605_v16  ;;  %v7606_v45 = vld [vmem:[#allocation57_spill] sm:$0xff]  ;;  %v1315_v26 = vadd.f32 %v1314_v29, %v4399_v38  ;;  %v1419_v12 = vadd.f32 %v1257_v10, %v1256_v13  ;;  %v7608_v50 = vld [vmem:[#allocation116_spill] sm:$0xff]  ;;  %v7613_v29 = vld [vmem:[#allocation35_spill] sm:$0xff] }
 0x1b4   :  { %7602 = vst [vmem:[#allocation106_spill] sm:$0xff] %v4741_v56  ;;  %v1336_v59 = vadd.f32 %v1335_v53, %v4463_v1  ;;  %v1357_v16 = vadd.f32 %v1356_v21, %v4527_v6  ;;  %v1399_v22 = vadd.f32 %v1398_v30, %v1242_v40  ;;  %v7607_v56 = vld [vmem:[#allocation146_spill] sm:$0xff]  ;;  %v1379_v38 = vadd.f32 %v1378_v36, %v4589_v52  ;;  %v7614_v53 = vld [vmem:[#allocation85_spill] sm:$0xff] }
 0x1b5   :  { %v1273_v31 = vadd.f32 %v1272_v51, %v7606_v45  ;;  %v1294_v63 = vadd.f32 %v1293_v9, %v4335_v41  ;;  %v1316_v25 = vadd.f32 %v1315_v26, %v4403_v44  ;;  %v1420_v27 = vadd.f32 %v1419_v12, %v1258_v32  ;;  %v7610_v32 = vld [vmem:[#allocation120_spill] sm:$0xff]  ;;  %v7620_v12 = vld [vmem:[#allocation86_spill] sm:$0xff] }
 0x1b6   :  { %v1337_v48 = vadd.f32 %v1336_v59, %v4467_v23  ;;  %v1358_v41 = vadd.f32 %v1357_v16, %v4531_v11  ;;  %v1400_v39 = vadd.f32 %v1399_v22, %v1243_v62  ;;  %v1380_v44 = vadd.f32 %v1379_v38, %v4593_v54  ;;  %v7609_v23 = vld [vmem:[#allocation107_spill] sm:$0xff]  ;;  %v7622_v22 = vld [vmem:[#allocation58_spill] sm:$0xff] }
 0x1b7   :  { %v1274_v5 = vadd.f32 %v1273_v31, %v7607_v56  ;;  %v1295_v3 = vadd.f32 %v1294_v63, %v4339_v49  ;;  %v1317_v14 = vadd.f32 %v1316_v25, %v4407_v34  ;;  %v1421_v40 = vadd.f32 %v1420_v27, %v1259_v28  ;;  %v7611_v28 = vld [vmem:[#allocation130_spill] sm:$0xff]  ;;  %v7619_v63 = vld [vmem:[#allocation79_spill] sm:$0xff] }
 0x1b8   :  { %v1338_v2 = vadd.f32 %v1337_v48, %v4471_v4  ;;  %v1359_v49 = vadd.f32 %v1358_v41, %v4535_v47  ;;  %v1401_v9 = vadd.f32 %v1400_v39, %v1244_v7  ;;  %v1381_v34 = vadd.f32 %v1380_v44, %v4597_v35  ;;  %v7612_v7 = vld [vmem:[#allocation27_spill] sm:$0xff]  ;;  %v7617_v35 = vld [vmem:[#allocation66_spill] sm:$0xff]  ;;  %v7625_v41 = vld [vmem:[#allocation72_spill] sm:$0xff] }
 0x1b9   :  { %v1275_v1 = vadd.f32 %v1274_v5, %v7608_v50  ;;  %v1296_v6 = vadd.f32 %v1295_v3, %v4343_v43  ;;  %v1318_v52 = vadd.f32 %v1317_v14, %v4411_v37  ;;  %v1422_v62 = vadd.f32 %v1421_v40, %v1260_v55  ;;  %v7615_v55 = vld [vmem:[#allocation94_spill] sm:$0xff]  ;;  %v7623_v3 = vld [vmem:[#allocation132_spill] sm:$0xff]  ;;  %v7626_v39 = vld [vmem:[#allocation87_spill] sm:$0xff] }
 0x1ba   :  { %v1339_v10 = vadd.f32 %v1338_v2, %v4475_v60  ;;  %v1360_v43 = vadd.f32 %v1359_v49, %v4539_v20  ;;  %v1402_v4 = vadd.f32 %v1401_v9, %v4651_v15  ;;  %v1382_v21 = vadd.f32 %v1381_v34, %v7615_v55  ;;  %v7616_v20 = vld [vmem:[#allocation111_spill] sm:$0xff]  ;;  %v7618_v15 = vld [vmem:[#allocation73_spill] sm:$0xff]  ;;  %v7630_v49 = vld [vmem:[#allocation74_spill] sm:$0xff] }
 0x1bb   :  { %v1276_v13 = vadd.f32 %v1275_v1, %v7609_v23  ;;  %v1297_v11 = vadd.f32 %v1296_v6, %v4347_v33  ;;  %v1319_v56 = vadd.f32 %v1318_v52, %v7612_v7  ;;  %v1423_v51 = vadd.f32 %v1422_v62, %v1261_v58  ;;  %v7621_v58 = vld [vmem:[#allocation167_spill] sm:$0xff]  ;;  %v7627_v50 = vld [vmem:[#allocation141_spill] sm:$0xff]  ;;  %v7633_v52 = vld [vmem:[#allocation168_spill] sm:$0xff] }
 0x1bc   :  { %v1340_v33 = vadd.f32 %v1339_v10, %v7613_v29  ;;  %v1361_v37 = vadd.f32 %v1360_v43, %v7614_v53  ;;  %v1403_v60 = vadd.f32 %v1402_v4, %v4655_v46  ;;  %v1383_v16 = vadd.f32 %v1382_v21, %v7621_v58  ;;  %v7624_v46 = vld [vmem:[#allocation31_spill] sm:$0xff]  ;;  %v7628_v14 = vld [vmem:[#allocation117_spill] sm:$0xff]  ;;  %v7635_v34 = vld [vmem:[#allocation60_spill] sm:$0xff] }
 0x1bd   :  { %v1277_v47 = vadd.f32 %v1276_v13, %v7610_v32  ;;  %v1298_v54 = vadd.f32 %v1297_v11, %v7611_v28  ;;  %v1320_v45 = vadd.f32 %v1319_v56, %v7618_v15  ;;  %v1424_v31 = vadd.f32 %v1423_v51, %v1262_v19  ;;  %v7629_v2 = vld [vmem:[#allocation67_spill] sm:$0xff]  ;;  %v7631_v23 = vld [vmem:[#allocation81_spill] sm:$0xff]  ;;  %v7632_v11 = vld [vmem:[#allocation138_spill] sm:$0xff] }
 0x1be   :  { %v1341_v26 = vadd.f32 %v1340_v33, %v7619_v63  ;;  %v1362_v59 = vadd.f32 %v1361_v37, %v7620_v12  ;;  %v1404_v36 = vadd.f32 %v1403_v60, %v4659_v42  ;;  %v1384_v1 = vadd.f32 %v1383_v16, %v7627_v50  ;;  %v7634_v10 = vld [vmem:[#allocation99_spill] sm:$0xff]  ;;  %v7639_v56 = vld [vmem:[#allocation40_spill] sm:$0xff]  ;;  %v7640_v29 = vld [vmem:[#allocation89_spill] sm:$0xff] }
 0x1bf   :  { %v1278_v17 = vadd.f32 %v1277_v47, %v7616_v20  ;;  %v1299_v30 = vadd.f32 %v1298_v54, %v7617_v35  ;;  %v1321_v27 = vadd.f32 %v1320_v45, %v7624_v46  ;;  %v1425_v48 = vadd.f32 %v1424_v31, %v4709_v24  ;;  %v7636_v32 = vld [vmem:[#allocation23_spill] sm:$0xff]  ;;  %v7637_v47 = vld [vmem:[#allocation20_spill] sm:$0xff]  ;;  %v7641_v33 = vld [vmem:[#allocation142_spill] sm:$0xff] }
 0x1c0   :  { %v1342_v38 = vadd.f32 %v1341_v26, %v7625_v41  ;;  %v1363_v19 = vadd.f32 %v1362_v59, %v7626_v39  ;;  %v1405_v6 = vadd.f32 %v1404_v36, %v4663_v57  ;;  %v1385_v62 = vadd.f32 %v1384_v1, %v7633_v52  ;;  %v7638_v54 = vld [vmem:[#allocation103_spill] sm:$0xff]  ;;  %v7643_v21 = vld [vmem:[#allocation122_spill] sm:$0xff]  ;;  %v7644_v20 = vld [vmem:[#allocation69_spill] sm:$0xff] }
 0x1c1   :  { %v1279_v5 = vadd.f32 %v1278_v17, %v7622_v22  ;;  %v1300_v25 = vadd.f32 %v1299_v30, %v7623_v3  ;;  %v1322_v44 = vadd.f32 %v1321_v27, %v7630_v49  ;;  %v1426_v9 = vadd.f32 %v1425_v48, %v4713_v61  ;;  %v7642_v37 = vld [vmem:[#allocation171_spill] sm:$0xff]  ;;  %v7646_v15 = vld [vmem:[#allocation174_spill] sm:$0xff]  ;;  %v7649_v59 = vld [vmem:[#allocation97_spill] sm:$0xff] }
 0x1c2   :  { %v1343_v13 = vadd.f32 %v1342_v38, %v7631_v23  ;;  %v1364_v24 = vadd.f32 %v1363_v19, %v7632_v11  ;;  %v1406_v43 = vadd.f32 %v1405_v6, %v7634_v10  ;;  %v1386_v53 = vadd.f32 %v1385_v62, %v7641_v33  ;;  %v7645_v35 = vld [vmem:[#allocation75_spill] sm:$0xff]  ;;  %v7647_v31 = vld [vmem:[#allocation82_spill] sm:$0xff]  ;;  %v7650_v16 = vld [vmem:[#allocation144_spill] sm:$0xff] }
 0x1c3   :  { %v1280_v40 = vadd.f32 %v1279_v5, %v7628_v14  ;;  %v1301_v42 = vadd.f32 %v1300_v25, %v7629_v2  ;;  %v1323_v28 = vadd.f32 %v1322_v44, %v7637_v47  ;;  %v1427_v7 = vadd.f32 %v1426_v9, %v7638_v54  ;;  %v7648_v26 = vld [vmem:[#allocation90_spill] sm:$0xff]  ;;  %v7651_v22 = vld [vmem:[#allocation61_spill] sm:$0xff]  ;;  %v7653_v46 = vld [vmem:[#allocation16_spill] sm:$0xff] }
 0x1c4   :  { %v1344_v51 = vadd.f32 %v1343_v13, %v7639_v56  ;;  %v1365_v61 = vadd.f32 %v1364_v24, %v7640_v29  ;;  %v1407_v55 = vadd.f32 %v1406_v43, %v7642_v37  ;;  %v1387_v58 = vadd.f32 %v1386_v53, %v7649_v59  ;;  %v7652_v3 = vld [vmem:[#allocation133_spill] sm:$0xff]  ;;  %v7655_v38 = vld [vmem:[#allocation51_spill] sm:$0xff]  ;;  %v7658_v14 = vld [vmem:[#allocation172_spill] sm:$0xff] }
 0x1c5   :  { %v1281_v4 = vadd.f32 %v1280_v40, %v7635_v34  ;;  %v1302_v57 = vadd.f32 %v1301_v42, %v7636_v32  ;;  %v1324_v30 = vadd.f32 %v1323_v28, %v7645_v35  ;;  %v1428_v45 = vadd.f32 %v1427_v7, %v7646_v15  ;;  %v7654_v48 = vld [vmem:[#allocation105_spill] sm:$0xff]  ;;  %v7656_v19 = vld [vmem:[#allocation139_spill] sm:$0xff]  ;;  %v7659_v2 = vld [vmem:[#allocation126_spill] sm:$0xff] }
 0x1c6   :  { %v1345_v63 = vadd.f32 %v1344_v51, %v7647_v31  ;;  %v1366_v12 = vadd.f32 %v1365_v61, %v7648_v26  ;;  %v1408_v36 = vadd.f32 %v1407_v55, %v7650_v16  ;;  %v7657_v1 = vld [vmem:[#allocation169_spill] sm:$0xff]  ;;  %v7660_v49 = vld [vmem:[#allocation70_spill] sm:$0xff]  ;;  %v7662_v11 = vld [vmem:[#allocation83_spill] sm:$0xff] }
 0x1c7   :  { %v1282_v60 = vadd.f32 %v1281_v4, %v7643_v21  ;;  %v1303_v17 = vadd.f32 %v1302_v57, %v7644_v20  ;;  %v1325_v27 = vadd.f32 %v1324_v30, %v7653_v46  ;;  %v1429_v41 = vadd.f32 %v1428_v45, %v7654_v48  ;;  %v7661_v9 = vld [vmem:[#allocation77_spill] sm:$0xff]  ;;  %v7663_v52 = vld [vmem:[#allocation91_spill] sm:$0xff]  ;;  %v7664_v10 = vld [vmem:[#allocation98_spill] sm:$0xff] }
 0x1c8   :  { %v1346_v39 = vadd.f32 %v1345_v63, %v7655_v38  ;;  %v1367_v50 = vadd.f32 %v1366_v12, %v7656_v19  ;;  %v1388_v6 = vadd.f32 %v1387_v58, %v7657_v1  ;;  %v1409_v40 = vadd.f32 %v1408_v36, %v7658_v14  ;;  %v7665_v34 = vld [vmem:[#allocation102_spill] sm:$0xff]  ;;  %v7666_v32 = vld [vmem:[#allocation63_spill] sm:$0xff]  ;;  %v7669_v51 = vld [vmem:[#allocation88_spill] sm:$0xff] }
 0x1c9   :  { %v1283_v5 = vadd.f32 %v1282_v60, %v7651_v22  ;;  %v1304_v25 = vadd.f32 %v1303_v17, %v7652_v3  ;;  %v1326_v23 = vadd.f32 %v1325_v27, %v7661_v9  ;;  %v1430_v13 = vadd.f32 %v1429_v41, %v4729_v8  ;;  %v7667_v47 = vld [vmem:[#allocation34_spill] sm:$0xff]  ;;  %v7672_v37 = vld [vmem:[#allocation145_spill] sm:$0xff]  ;;  %v7673_v21 = vld [vmem:[#allocation128_spill] sm:$0xff] }
 0x1ca   :  { %v1347_v24 = vadd.f32 %v1346_v39, %v7662_v11  ;;  %v1368_v62 = vadd.f32 %v1367_v50, %v7663_v52  ;;  %v1389_v43 = vadd.f32 %v1388_v6, %v7664_v10  ;;  %v1410_v4 = vadd.f32 %v1409_v40, %v7665_v34  ;;  %v7668_v54 = vld [vmem:[#allocation30_spill] sm:$0xff]  ;;  %v7674_v20 = vld [vmem:[#allocation71_spill] sm:$0xff]  ;;  %v7676_v45 = vld [vmem:[#allocation45_spill] sm:$0xff] }
 0x1cb   :  { %v1284_v42 = vadd.f32 %v1283_v5, %v7659_v2  ;;  %v1305_v44 = vadd.f32 %v1304_v25, %v7660_v49  ;;  %v1327_v7 = vadd.f32 %v1326_v23, %v7668_v54  ;;  %v1431_v56 = vadd.f32 %v1430_v13, %v4733_v0  ;;  %v7670_v61 = vld [vmem:[#allocation166_spill] sm:$0xff]  ;;  %v7677_v63 = vld [vmem:[#allocation93_spill] sm:$0xff]  ;;  %v7678_v26 = vld [vmem:[#allocation143_spill] sm:$0xff] }
 0x1cc   :  { %v1348_v29 = vadd.f32 %v1347_v24, %v7669_v51  ;;  %v1369_v8 = vadd.f32 %v1368_v62, %v7670_v61  ;;  %v7671_v33 = vld [vmem:[#allocation170_spill] sm:$0xff]  ;;  %v1411_v55 = vadd.f32 %v1410_v4, %v7672_v37  ;;  %v7679_v59 = vld [vmem:[#allocation173_spill] sm:$0xff]  ;;  %v1464_v37 = vld [vmem:[#allocation7 + $0x30] sm:$0xff] }
 0x1cd   :  { %v1285_v57 = vadd.f32 %v1284_v42, %v7666_v32  ;;  %v1306_v28 = vadd.f32 %v1305_v44, %v7667_v47  ;;  %v1390_v53 = vadd.f32 %v1389_v43, %v7671_v33  ;;  %v7675_v35 = vld [vmem:[#allocation78_spill] sm:$0xff]  ;;  %v1432_v15 = vadd.f32 %v1431_v56, %v4737_v18  ;;  %v1461_v56 = vld [vmem:[#allocation7 + $0x18] sm:$0xff] }
 0x1ce   :  { %v1328_v30 = vadd.f32 %v1327_v7, %v7675_v35  ;;  %v1349_v31 = vadd.f32 %v1348_v29, %v7676_v45  ;;  %v1370_v0 = vadd.f32 %v1369_v8, %v7677_v63  ;;  %v1412_v58 = vadd.f32 %v1411_v55, %v7679_v59  ;;  %v7680_v5 = vld [vmem:[#allocation106_spill] sm:$0xff]  ;;  %v1460_v7 = vld [vmem:[#allocation7 + $0x10] sm:$0xff]  ;;  %v1469_v59 = vld [vmem:[#allocation7 + $0x58] sm:$0xff] }
 0x1cf   :  { %v1286_v60 = vadd.f32 %v1285_v57, %v7673_v21  ;;  %v1307_v17 = vadd.f32 %v1306_v28, %v7674_v20  ;;  %v1391_v12 = vadd.f32 %v1390_v53, %v7678_v26  ;;  %v1433_v3 = vadd.f32 %v1432_v15, %v7680_v5  ;;  %v1458_v4 = vld [vmem:[#allocation7] sm:$0xff]  ;;  %v1459_v54 = vld [vmem:[#allocation7 + $0x8] sm:$0xff]  ;;  %v7682_v45 = vld [vmem:[#allocation140_spill] sm:$0xff] }
 0x1d0   :  { %v1329_v22 = vrot.slane %v1328_v30, 4  ;;  %v1350_v25 = vrot.slane %v1349_v31, 4  ;;  %v1371_v46 = vrot.slane %v1370_v0, 4  ;;  %v1413_v48 = vrot.slane %v1412_v58, 4  ;;  %v1462_v33 = vld [vmem:[#allocation7 + $0x20] sm:$0xff]  ;;  %v1463_v53 = vld [vmem:[#allocation7 + $0x28] sm:$0xff] }
 0x1d1   :  { %v1287_v16 = vrot.slane %v1286_v60, 4  ;;  %v1308_v36 = vrot.slane %v1307_v17, 4  ;;  %v1392_v27 = vrot.slane %v1391_v12, 4  ;;  %v1434_v39 = vrot.slane %v1433_v3, 4  ;;  %v1466_v35 = vld [vmem:[#allocation7 + $0x40] sm:$0xff]  ;;  %v7681_v15 = vld [vmem:[#allocation95_spill] sm:$0xff] }
 0x1d2   :  { %v1330_v38 = vadd.f32 %v1329_v22, %v1328_v30  ;;  %v1351_v19 = vadd.f32 %v1350_v25, %v1349_v31  ;;  %v1372_v50 = vadd.f32 %v1371_v46, %v1370_v0  ;;  %v1414_v6 = vadd.f32 %v1413_v48, %v1412_v58  ;;  %v1467_v30 = vld [vmem:[#allocation7 + $0x48] sm:$0xff]  ;;  %v1470_v58 = vld [vmem:[#allocation7 + $0x60] sm:$0xff]  ;;  %v1473_v25 = vld [vmem:[#allocation7 + $0x78] sm:$0xff] }
 0x1d3   :  { %v1288_v41 = vadd.f32 %v1287_v16, %v1286_v60  ;;  %v1309_v18 = vadd.f32 %v1308_v36, %v1307_v17  ;;  %v1393_v1 = vadd.f32 %v1392_v27, %v1391_v12  ;;  %v1435_v42 = vadd.f32 %v1434_v39, %v1433_v3  ;;  %v1465_v17 = vld [vmem:[#allocation7 + $0x38] sm:$0xff]  ;;  %v1468_v12 = vld [vmem:[#allocation7 + $0x50] sm:$0xff]  ;;  %v1471_v5 = vld [vmem:[#allocation7 + $0x68] sm:$0xff] }
 0x1d4   :  { %v1331_v2 = vrot.slane %v1330_v38, 2  ;;  %v1352_v49 = vrot.slane %v1351_v19, 2  ;;  %v1373_v44 = vrot.slane %v1372_v50, 2  ;;  %v1415_v23 = vrot.slane %v1414_v6, 2  ;;  %v1472_v3 = vld [vmem:[#allocation7 + $0x70] sm:$0xff]  ;;  %v1474_v48 = vld [vmem:[#allocation7 + $0x80] sm:$0xff] }
 0x1d5   :  { %v1289_v14 = vrot.slane %v1288_v41, 2  ;;  %v1310_v40 = vrot.slane %v1309_v18, 2  ;;  %v1394_v9 = vrot.slane %v1393_v1, 2  ;;  %v1436_v52 = vrot.slane %v1435_v42, 2 }
 0x1d6   :  { %v1332_v24 = vadd.f32 %v1331_v2, %v1330_v38  ;;  %v1353_v62 = vadd.f32 %v1352_v49, %v1351_v19  ;;  %v1374_v10 = vadd.f32 %v1373_v44, %v1372_v50  ;;  %v1416_v34 = vadd.f32 %v1415_v23, %v1414_v6  ;;  %v1478_v6 = vld [vmem:[#allocation7 + $0xa0] sm:$0xff]  ;;  %v1480_v44 = vld [vmem:[#allocation7 + $0xb0] sm:$0xff] }
 0x1d7   :  { %v1290_v13 = vadd.f32 %v1289_v14, %v1288_v41  ;;  %v1311_v11 = vadd.f32 %v1310_v40, %v1309_v18  ;;  %v1395_v43 = vadd.f32 %v1394_v9, %v1393_v1  ;;  %v1437_v28 = vadd.f32 %v1436_v52, %v1435_v42  ;;  %v1475_v41 = vld [vmem:[#allocation7 + $0x88] sm:$0xff]  ;;  %v1476_v18 = vld [vmem:[#allocation7 + $0x90] sm:$0xff]  ;;  %v1477_v1 = vld [vmem:[#allocation7 + $0x98] sm:$0xff] }
 0x1d8   :  { %v1333_v47 = vrot.slane %v1332_v24, 1  ;;  %v1354_v51 = vrot.slane %v1353_v62, 1  ;;  %v1375_v29 = vrot.slane %v1374_v10, 1  ;;  %v1417_v8 = vrot.slane %v1416_v34, 1  ;;  %v1479_v14 = vld [vmem:[#allocation7 + $0xa8] sm:$0xff]  ;;  %v1481_v9 = vld [vmem:[#allocation7 + $0xb8] sm:$0xff] }
 0x1d9   :  { %v1291_v32 = vrot.slane %v1290_v13, 1  ;;  %v1312_v57 = vrot.slane %v1311_v11, 1  ;;  %v1396_v61 = vrot.slane %v1395_v43, 1  ;;  %v1438_v20 = vrot.slane %v1437_v28, 1  ;;  %v1482_v23 = vld [vmem:[#allocation7 + $0xc0] sm:$0xff] }
 0x1da   :  { %v1334_v60 = vadd.f32 %v1333_v47, %v1332_v24  ;;  %v755_v31 = vsel %vm754_vm6, %v7682_v45, %v7681_v15  ;;  %v1355_v63 = vadd.f32 %v1354_v51, %v1353_v62  ;;  %v1376_v0 = vadd.f32 %v1375_v29, %v1374_v10  ;;  %v1483_v62 = vld [vmem:[#allocation7 + $0xc8] sm:$0xff]  ;;  %v1484_v10 = vld [vmem:[#allocation7 + $0xd0] sm:$0xff]  ;;  %v1486_v47 = vld [vmem:[#allocation7 + $0xe0] sm:$0xff] }
 0x1db   :  { %v1292_v55 = vadd.f32 %v1291_v32, %v1290_v13  ;;  %v1313_v21 = vadd.f32 %v1312_v57, %v1311_v11  ;;  %v1397_v26 = vadd.f32 %v1396_v61, %v1395_v43  ;;  %v1418_v16 = vadd.f32 %v1417_v8, %v1416_v34  ;;  %v1485_v43 = vld [vmem:[#allocation7 + $0xd8] sm:$0xff]  ;;  %v1490_v8 = vld [vmem:[#allocation7 + $0x100] sm:$0xff]  ;;  %v1495_v45 = vld [vmem:[#allocation7 + $0x128] sm:$0xff] }
 0x1dc   :  { %v1439_v36 = vadd.f32 %v1438_v20, %v1437_v28  ;;  %v4860_v46 = vmax.f32 %v1458_v4, 1e-06  ;;  %v4863_v38 = vmax.f32 %v1459_v54, 1e-06  ;;  %v4865_v39 = vmax.f32 %v1460_v7, 1e-06 }
 0x1dd   :  { %v1448_v22 = vsel %vm742_vm0, %v1313_v21, %v1292_v55  ;;  %v4867_v19 = vmax.f32 %v1461_v56, 1e-06  ;;  %v4870_v40 = vmax.f32 %v1462_v33, 1e-06  ;;  %v4872_v2 = vmax.f32 %v1463_v53, 1e-06 }
 0x1de   :  { %7683 = vst [vmem:[#allocation175_spill] sm:$0xff] %v4860_v46  ;;  %v1449_v27 = vsel %vm744_vm1, %v1334_v60, %v1448_v22  ;;  %7684 = vst [vmem:[#allocation147_spill] sm:$0xff] %v4863_v38  ;;  %v4874_v42 = vmax.f32 %v1464_v37, 1e-06  ;;  %v4877_v13 = vmax.f32 %v1465_v17, 1e-06 }
 0x1df   :  { %7685 = vst [vmem:[#allocation176_spill] sm:$0xff] %v4865_v39  ;;  %7686 = vst [vmem:[#allocation148_spill] sm:$0xff] %v4867_v19  ;;  %v1450_v50 = vsel %vm746_vm2, %v1355_v63, %v1449_v27  ;;  %v4879_v11 = vmax.f32 %v1466_v35, 1e-06  ;;  %v4881_v24 = vmax.f32 %v1467_v30, 1e-06 }
 0x1e0   :  { %7687 = vst [vmem:[#allocation109_spill] sm:$0xff] %v4870_v40  ;;  %7688 = vst [vmem:[#allocation177_spill] sm:$0xff] %v4872_v2  ;;  %v1451_v49 = vsel %vm748_vm3, %v1376_v0, %v1450_v50  ;;  %v4884_v34 = vmax.f32 %v1468_v12, 1e-06  ;;  %v4886_v4 = vmax.f32 %v1469_v59, 1e-06 }
 0x1e1   :  { %7689 = vst [vmem:[#allocation110_spill] sm:$0xff] %v4874_v42  ;;  %7690 = vst [vmem:[#allocation178_spill] sm:$0xff] %v4877_v13  ;;  %v1452_v52 = vsel %vm750_vm4, %v1397_v26, %v1451_v49  ;;  %v4888_v32 = vmax.f32 %v1470_v58, 1e-06  ;;  %v1487_v28 = vld [vmem:[#allocation7 + $0xe8] sm:$0xff]  ;;  %v1488_v54 = vld [vmem:[#allocation7 + $0xf0] sm:$0xff] }
 0x1e2   :  { %7691 = vst [vmem:[#allocation113_spill] sm:$0xff] %v4879_v11  ;;  %7692 = vst [vmem:[#allocation114_spill] sm:$0xff] %v4881_v24  ;;  %v1453_v57 = vsel %vm752_vm5, %v1418_v16, %v1452_v52  ;;  %v4891_v7 = vmax.f32 %v1471_v5, 1e-06  ;;  %v4893_v56 = vmax.f32 %v1472_v3, 1e-06  ;;  %v4946_v52 = vmul.f32 %v4865_v39, %v4865_v39 }
 0x1e3   :  { %7693 = vst [vmem:[#allocation179_spill] sm:$0xff] %v4884_v34  ;;  %7694 = vst [vmem:[#allocation115_spill] sm:$0xff] %v4886_v4  ;;  %v4895_v51 = vmax.f32 %v1473_v25, 1e-06  ;;  %v1454_v29 = vsel %vm754_vm6, %v1439_v36, %v1453_v57  ;;  %v1489_v61 = vld [vmem:[#allocation7 + $0xf8] sm:$0xff]  ;;  %v1491_v33 = vld [vmem:[#allocation7 + $0x108] sm:$0xff] }
 0x1e4   :  { %7695 = vst [vmem:[#allocation180_spill] sm:$0xff] %v4888_v32  ;;  %7696 = vst [vmem:[#allocation118_spill] sm:$0xff] %v4891_v7  ;;  %v4898_v53 = vmax.f32 %v1474_v48, 1e-06  ;;  %v4900_v37 = vmax.f32 %v1475_v41, 1e-06  ;;  %v4910_v15 = vadd.f32 %v1454_v29, %v755_v31  ;;  %v4926_v31 = vmul.f32 %v4860_v46, %v4860_v46 }
 0x1e5   :  { %7697 = vst [vmem:[#allocation119_spill] sm:$0xff] %v4893_v56  ;;  %7698 = vst [vmem:[#allocation181_spill] sm:$0xff] %v4895_v51  ;;  %v4902_v55 = vmax.f32 %v1476_v18, 1e-06  ;;  %v1492_v21 = vld [vmem:[#allocation7 + $0x110] sm:$0xff]  ;;  %v1493_v60 = vld [vmem:[#allocation7 + $0x118] sm:$0xff] }
 0x1e6   :  { %7699 = vst [vmem:[#allocation121_spill] sm:$0xff] %v4898_v53  ;;  %7700 = vst [vmem:[#allocation182_spill] sm:$0xff] %v4900_v37  ;;  %v1494_v20 = vld [vmem:[#allocation7 + $0x120] sm:$0xff]  ;;  %v4904_v17 = vmax.f32 %v1477_v1, 1e-06  ;;  %v1496_v63 = vld [vmem:[#allocation7 + $0x130] sm:$0xff]  ;;  %v4936_v1 = vmul.f32 %v4863_v38, %v4863_v38 }
 0x1e7   :  { %7701 = vst [vmem:[#allocation123_spill] sm:$0xff] %v4902_v55  ;;  %v4906_v35 = vmax.f32 %v1478_v6, 1e-06  ;;  %v4908_v30 = vmax.f32 %v1479_v14, 1e-06  ;;  %7705 = vst [vmem:[#allocation184_spill] sm:$0xff] %v4910_v15 }
 0x1e8   :  { %7702 = vst [vmem:[#allocation124_spill] sm:$0xff] %v4904_v17  ;;  %v1497_v0 = vld [vmem:[#allocation7 + $0x138] sm:$0xff]  ;;  %v4912_v26 = vmax.f32 %v1480_v44, 1e-06  ;;  %v4914_v12 = vmax.f32 %v1481_v9, 1e-06 }
 0x1e9   :  { %7703 = vst [vmem:[#allocation183_spill] sm:$0xff] %v4906_v35  ;;  %7704 = vst [vmem:[#allocation125_spill] sm:$0xff] %v4908_v30  ;;  %v4916_v59 = vmax.f32 %v1482_v23, 1e-06  ;;  %v1498_v58 = vld [vmem:[#allocation7 + $0x140] sm:$0xff]  ;;  %v1499_v16 = vld [vmem:[#allocation7 + $0x148] sm:$0xff] }
 0x1ea   :  { %7706 = vst [vmem:[#allocation149_spill] sm:$0xff] %v4912_v26  ;;  %7707 = vst [vmem:[#allocation127_spill] sm:$0xff] %v4914_v12  ;;  %v1500_v36 = vld [vmem:[#allocation7 + $0x150] sm:$0xff]  ;;  %v4918_v22 = vmax.f32 %v1483_v62, 1e-06  ;;  %v1501_v25 = vld [vmem:[#allocation7 + $0x158] sm:$0xff] }
 0x1eb   :  { %7708 = vst [vmem:[#allocation185_spill] sm:$0xff] %v4916_v59  ;;  %v4920_v5 = vmax.f32 %v1484_v10, 1e-06  ;;  %v4922_v3 = vmax.f32 %v1485_v43, 1e-06  ;;  %7712 = vst [vmem:[#allocation129_spill] sm:$0xff] %v4926_v31 }
 0x1ec   :  { %7709 = vst [vmem:[#allocation150_spill] sm:$0xff] %v4918_v22  ;;  %v1502_v27 = vld [vmem:[#allocation7 + $0x160] sm:$0xff]  ;;  %v1503_v48 = vld [vmem:[#allocation7 + $0x168] sm:$0xff]  ;;  %v4928_v41 = vmax.f32 %v1486_v47, 1e-06  ;;  %7715 = vst [vmem:[#allocation188_spill] sm:$0xff] %v4936_v1 }
 0x1ed   :  { %7710 = vst [vmem:[#allocation186_spill] sm:$0xff] %v4920_v5  ;;  %7711 = vst [vmem:[#allocation151_spill] sm:$0xff] %v4922_v3  ;;  %v4930_v18 = vmax.f32 %v1487_v28, 1e-06  ;;  %v4932_v50 = vmax.f32 %v1488_v54, 1e-06  ;;  %v4956_v54 = vmul.f32 %v4867_v19, %v4867_v19 }
 0x1ee   :  { %v1504_v6 = vld [vmem:[#allocation7 + $0x170] sm:$0xff]  ;;  %v1505_v14 = vld [vmem:[#allocation7 + $0x178] sm:$0xff]  ;;  %v1506_v49 = vld [vmem:[#allocation7 + $0x180] sm:$0xff]  ;;  %v4938_v44 = vmax.f32 %v1489_v61, 1e-06  ;;  %7717 = vst [vmem:[#allocation131_spill] sm:$0xff] %v4946_v52 }
 0x1ef   :  { %7713 = vst [vmem:[#allocation187_spill] sm:$0xff] %v4930_v18  ;;  %7714 = vst [vmem:[#allocation152_spill] sm:$0xff] %v4932_v50  ;;  %v4940_v9 = vmax.f32 %v1490_v8, 1e-06  ;;  %v4942_v23 = vmax.f32 %v1491_v33, 1e-06 }
 0x1f0   :  { %7716 = vst [vmem:[#allocation153_spill] sm:$0xff] %v4938_v44  ;;  %v1507_v62 = vld [vmem:[#allocation7 + $0x188] sm:$0xff]  ;;  %v1508_v10 = vld [vmem:[#allocation7 + $0x190] sm:$0xff]  ;;  %v1509_v43 = vld [vmem:[#allocation7 + $0x198] sm:$0xff]  ;;  %v4948_v57 = vmax.f32 %v1492_v21, 1e-06  ;;  %v4966_v21 = vmul.f32 %v4870_v40, %v4870_v40 }
 0x1f1   :  { %v4950_v47 = vmax.f32 %v1493_v60, 1e-06  ;;  %v4952_v28 = vmax.f32 %v1494_v20, 1e-06  ;;  %7720 = vst [vmem:[#allocation190_spill] sm:$0xff] %v4956_v54  ;;  %v1510_v29 = vld [vmem:[#allocation7 + $0x1a0] sm:$0xff] }
 0x1f2   :  { %v1511_v61 = vld [vmem:[#allocation7 + $0x1a8] sm:$0xff]  ;;  %v1512_v8 = vld [vmem:[#allocation7 + $0x1b0] sm:$0xff]  ;;  %v4958_v33 = vmax.f32 %v1495_v45, 1e-06  ;;  %v4960_v15 = vmax.f32 %v1496_v63, 1e-06  ;;  %v4976_v45 = vmul.f32 %v4872_v2, %v4872_v2 }
 0x1f3   :  { %7718 = vst [vmem:[#allocation189_spill] sm:$0xff] %v4950_v47  ;;  %7719 = vst [vmem:[#allocation154_spill] sm:$0xff] %v4952_v28  ;;  %v4962_v52 = vmax.f32 %v1497_v0, 1e-06  ;;  %v1513_v60 = vld [vmem:[#allocation7 + $0x1b8] sm:$0xff]  ;;  %v1514_v20 = vld [vmem:[#allocation7 + $0x1c0] sm:$0xff] }
 0x1f4   :  { %7721 = vst [vmem:[#allocation155_spill] sm:$0xff] %v4958_v33  ;;  %7722 = vst [vmem:[#allocation14_spill] sm:$0xff] %v4960_v15  ;;  %v1515_v39 = vld [vmem:[#allocation7 + $0x1c8] sm:$0xff]  ;;  %v4968_v1 = vmax.f32 %v1498_v58, 1e-06  ;;  %v1516_v63 = vld [vmem:[#allocation7 + $0x1d0] sm:$0xff]  ;;  %v4986_v58 = vmul.f32 %v4874_v42, %v4874_v42 }
 0x1f5   :  { %7723 = vst [vmem:[#allocation191_spill] sm:$0xff] %v4962_v52  ;;  %7724 = vst [vmem:[#allocation32_spill] sm:$0xff] %v4966_v21  ;;  %v4970_v19 = vmax.f32 %v1499_v16, 1e-06  ;;  %v4972_v54 = vmax.f32 %v1500_v36, 1e-06 }
 0x1f6   :  { %7725 = vst [vmem:[#allocation192_spill] sm:$0xff] %v4968_v1  ;;  %7728 = vst [vmem:[#allocation193_spill] sm:$0xff] %v4976_v45  ;;  %v1517_v0 = vld [vmem:[#allocation7 + $0x1d8] sm:$0xff]  ;;  %v1518_v38 = vld [vmem:[#allocation7 + $0x1e0] sm:$0xff]  ;;  %v4978_v31 = vmax.f32 %v1501_v25, 1e-06  ;;  %v4996_v25 = vmul.f32 %v4877_v13, %v4877_v13 }
 0x1f7   :  { %7726 = vst [vmem:[#allocation24_spill] sm:$0xff] %v4970_v19  ;;  %7727 = vst [vmem:[#allocation33_spill] sm:$0xff] %v4972_v54  ;;  %v4980_v40 = vmax.f32 %v1502_v27, 1e-06  ;;  %v4982_v21 = vmax.f32 %v1503_v48, 1e-06 }
 0x1f8   :  { %7729 = vst [vmem:[#allocation52_spill] sm:$0xff] %v4978_v31  ;;  %7732 = vst [vmem:[#allocation15_spill] sm:$0xff] %v4986_v58  ;;  %v1519_v16 = vld [vmem:[#allocation7 + $0x1e8] sm:$0xff]  ;;  %v1520_v36 = vld [vmem:[#allocation7 + $0x1f0] sm:$0xff]  ;;  %v4988_v54 = vmax.f32 %v1504_v6, 1e-06  ;;  %v5006_v6 = vmul.f32 %v4879_v11, %v4879_v11 }
 0x1f9   :  { %7730 = vst [vmem:[#allocation194_spill] sm:$0xff] %v4980_v40  ;;  %7731 = vst [vmem:[#allocation156_spill] sm:$0xff] %v4982_v21  ;;  %v1521_v46 = vld [vmem:[#allocation7 + $0x1f8] sm:$0xff]  ;;  %v4990_v2 = vmax.f32 %v1505_v14, 1e-06  ;;  %v1522_v27 = vld [vmem:[#allocation7 + $0x200] sm:$0xff] }
 0x1fa   :  { %7733 = vst [vmem:[#allocation195_spill] sm:$0xff] %v4988_v54  ;;  %v4992_v45 = vmax.f32 %v1506_v49, 1e-06  ;;  %7736 = vst [vmem:[#allocation134_spill] sm:$0xff] %v4996_v25  ;;  %v1523_v48 = vld [vmem:[#allocation7 + $0x208] sm:$0xff]  ;;  %v1524_v21 = vld [vmem:[#allocation7 + $0x210] sm:$0xff] }
 0x1fb   :  { %7734 = vst [vmem:[#allocation26_spill] sm:$0xff] %v4990_v2  ;;  %v4998_v40 = vmax.f32 %v1507_v62, 1e-06  ;;  %v5000_v42 = vmax.f32 %v1508_v10, 1e-06  ;;  %7740 = vst [vmem:[#allocation198_spill] sm:$0xff] %v5006_v6  ;;  %v5016_v62 = vmul.f32 %v4881_v24, %v4881_v24 }
 0x1fc   :  { %7735 = vst [vmem:[#allocation196_spill] sm:$0xff] %v4992_v45  ;;  %v5002_v58 = vmax.f32 %v1509_v43, 1e-06  ;;  %v1525_v14 = vld [vmem:[#allocation7 + $0x218] sm:$0xff]  ;;  %v1526_v49 = vld [vmem:[#allocation7 + $0x220] sm:$0xff]  ;;  %v1527_v45 = vld [vmem:[#allocation7 + $0x228] sm:$0xff] }
 0x1fd   :  { %7737 = vst [vmem:[#allocation157_spill] sm:$0xff] %v4998_v40  ;;  %7738 = vst [vmem:[#allocation197_spill] sm:$0xff] %v5000_v42  ;;  %v5008_v2 = vmax.f32 %v1510_v29, 1e-06  ;;  %v5010_v13 = vmax.f32 %v1511_v61, 1e-06  ;;  %v5026_v29 = vmul.f32 %v4884_v34, %v4884_v34 }
 0x1fe   :  { %7739 = vst [vmem:[#allocation17_spill] sm:$0xff] %v5002_v58  ;;  %v5012_v25 = vmax.f32 %v1512_v8, 1e-06  ;;  %7744 = vst [vmem:[#allocation19_spill] sm:$0xff] %v5016_v62  ;;  %v1528_v10 = vld [vmem:[#allocation7 + $0x230] sm:$0xff]  ;;  %v1529_v43 = vld [vmem:[#allocation7 + $0x238] sm:$0xff] }
 0x1ff   :  { %7741 = vst [vmem:[#allocation56_spill] sm:$0xff] %v5008_v2  ;;  %7742 = vst [vmem:[#allocation28_spill] sm:$0xff] %v5010_v13  ;;  %v1530_v58 = vld [vmem:[#allocation7 + $0x240] sm:$0xff]  ;;  %v5018_v42 = vmax.f32 %v1513_v60, 1e-06  ;;  %v1531_v61 = vld [vmem:[#allocation7 + $0x248] sm:$0xff]  ;;  %v5036_v60 = vmul.f32 %v4886_v4, %v4886_v4 }
 0x200   :  { %7743 = vst [vmem:[#allocation199_spill] sm:$0xff] %v5012_v25  ;;  %v5020_v11 = vmax.f32 %v1514_v20, 1e-06  ;;  %v5022_v6 = vmax.f32 %v1515_v39, 1e-06  ;;  %7748 = vst [vmem:[#allocation201_spill] sm:$0xff] %v5026_v29 }
 0x201   :  { %7745 = vst [vmem:[#allocation200_spill] sm:$0xff] %v5018_v42  ;;  %v1532_v8 = vld [vmem:[#allocation7 + $0x250] sm:$0xff]  ;;  %v1533_v25 = vld [vmem:[#allocation7 + $0x258] sm:$0xff]  ;;  %v5028_v13 = vmax.f32 %v1516_v63, 1e-06  ;;  %7752 = vst [vmem:[#allocation59_spill] sm:$0xff] %v5036_v60  ;;  %v5046_v63 = vmul.f32 %v4888_v32, %v4888_v32 }
 0x202   :  { %7746 = vst [vmem:[#allocation37_spill] sm:$0xff] %v5020_v11  ;;  %7747 = vst [vmem:[#allocation135_spill] sm:$0xff] %v5022_v6  ;;  %v5030_v24 = vmax.f32 %v1517_v0, 1e-06  ;;  %v5032_v62 = vmax.f32 %v1518_v38, 1e-06 }
 0x203   :  { %7749 = vst [vmem:[#allocation158_spill] sm:$0xff] %v5028_v13  ;;  %v1534_v20 = vld [vmem:[#allocation7 + $0x260] sm:$0xff]  ;;  %v1535_v39 = vld [vmem:[#allocation7 + $0x268] sm:$0xff]  ;;  %v1536_v6 = vld [vmem:[#allocation7 + $0x270] sm:$0xff]  ;;  %v5038_v11 = vmax.f32 %v1519_v16, 1e-06  ;;  %v5056_v16 = vmul.f32 %v4891_v7, %v4891_v7 }
 0x204   :  { %7750 = vst [vmem:[#allocation202_spill] sm:$0xff] %v5030_v24  ;;  %7751 = vst [vmem:[#allocation36_spill] sm:$0xff] %v5032_v62  ;;  %v5040_v34 = vmax.f32 %v1520_v36, 1e-06  ;;  %v5042_v29 = vmax.f32 %v1521_v46, 1e-06 }
 0x205   :  { %7753 = vst [vmem:[#allocation203_spill] sm:$0xff] %v5038_v11  ;;  %7756 = vst [vmem:[#allocation38_spill] sm:$0xff] %v5046_v63  ;;  %v1537_v0 = vld [vmem:[#allocation7 + $0x278] sm:$0xff]  ;;  %v1538_v38 = vld [vmem:[#allocation7 + $0x280] sm:$0xff]  ;;  %v5048_v24 = vmax.f32 %v1522_v27, 1e-06  ;;  %v5066_v27 = vmul.f32 %v4893_v56, %v4893_v56 }
 0x206   :  { %7754 = vst [vmem:[#allocation22_spill] sm:$0xff] %v5040_v34  ;;  %7755 = vst [vmem:[#allocation204_spill] sm:$0xff] %v5042_v29  ;;  %v1539_v62 = vld [vmem:[#allocation7 + $0x288] sm:$0xff]  ;;  %v5050_v4 = vmax.f32 %v1523_v48, 1e-06  ;;  %v1540_v36 = vld [vmem:[#allocation7 + $0x290] sm:$0xff] }
 0x207   :  { %7757 = vst [vmem:[#allocation136_spill] sm:$0xff] %v5048_v24  ;;  %v5052_v60 = vmax.f32 %v1524_v21, 1e-06  ;;  %7760 = vst [vmem:[#allocation206_spill] sm:$0xff] %v5056_v16  ;;  %v1541_v46 = vld [vmem:[#allocation7 + $0x298] sm:$0xff]  ;;  %v1542_v29 = vld [vmem:[#allocation7 + $0x2a0] sm:$0xff] }
 0x208   :  { %7758 = vst [vmem:[#allocation205_spill] sm:$0xff] %v5050_v4  ;;  %v5058_v34 = vmax.f32 %v1525_v14, 1e-06  ;;  %v5060_v32 = vmax.f32 %v1526_v49, 1e-06  ;;  %7764 = vst [vmem:[#allocation160_spill] sm:$0xff] %v5066_v27  ;;  %v5076_v14 = vmul.f32 %v4895_v51, %v4895_v51 }
 0x209   :  { %7759 = vst [vmem:[#allocation159_spill] sm:$0xff] %v5052_v60  ;;  %v5062_v63 = vmax.f32 %v1527_v45, 1e-06  ;;  %v1543_v48 = vld [vmem:[#allocation7 + $0x2a8] sm:$0xff]  ;;  %v1544_v21 = vld [vmem:[#allocation7 + $0x2b0] sm:$0xff]  ;;  %v1545_v60 = vld [vmem:[#allocation7 + $0x2b8] sm:$0xff] }
 0x20a   :  { %7761 = vst [vmem:[#allocation18_spill] sm:$0xff] %v5058_v34  ;;  %7762 = vst [vmem:[#allocation137_spill] sm:$0xff] %v5060_v32  ;;  %v5068_v4 = vmax.f32 %v1528_v10, 1e-06  ;;  %v5070_v7 = vmax.f32 %v1529_v43, 1e-06  ;;  %v5086_v10 = vmul.f32 %v4898_v53, %v4898_v53 }
 0x20b   :  { %7763 = vst [vmem:[#allocation207_spill] sm:$0xff] %v5062_v63  ;;  %v5072_v16 = vmax.f32 %v1530_v58, 1e-06  ;;  %7768 = vst [vmem:[#allocation209_spill] sm:$0xff] %v5076_v14  ;;  %v1546_v49 = vld [vmem:[#allocation7 + $0x2c0] sm:$0xff]  ;;  %v1547_v45 = vld [vmem:[#allocation7 + $0x2c8] sm:$0xff] }
 0x20c   :  { %7765 = vst [vmem:[#allocation208_spill] sm:$0xff] %v5068_v4  ;;  %7766 = vst [vmem:[#allocation108_spill] sm:$0xff] %v5070_v7  ;;  %v1548_v63 = vld [vmem:[#allocation7 + $0x2d0] sm:$0xff]  ;;  %v5078_v32 = vmax.f32 %v1531_v61, 1e-06  ;;  %v1549_v43 = vld [vmem:[#allocation7 + $0x2d8] sm:$0xff]  ;;  %v5096_v61 = vmul.f32 %v4900_v37, %v4900_v37 }
 0x20d   :  { %7767 = vst [vmem:[#allocation21_spill] sm:$0xff] %v5072_v16  ;;  %v5080_v56 = vmax.f32 %v1532_v8, 1e-06  ;;  %v5082_v27 = vmax.f32 %v1533_v25, 1e-06  ;;  %7772 = vst [vmem:[#allocation96_spill] sm:$0xff] %v5086_v10 }
 0x20e   :  { %7769 = vst [vmem:[#allocation62_spill] sm:$0xff] %v5078_v32  ;;  %v1550_v58 = vld [vmem:[#allocation7 + $0x2e0] sm:$0xff]  ;;  %v1551_v16 = vld [vmem:[#allocation7 + $0x2e8] sm:$0xff]  ;;  %v5088_v7 = vmax.f32 %v1534_v20, 1e-06  ;;  %7776 = vst [vmem:[#allocation39_spill] sm:$0xff] %v5096_v61  ;;  %v5106_v20 = vmul.f32 %v4902_v55, %v4902_v55 }
 0x20f   :  { %7770 = vst [vmem:[#allocation210_spill] sm:$0xff] %v5080_v56  ;;  %7771 = vst [vmem:[#allocation84_spill] sm:$0xff] %v5082_v27  ;;  %v5090_v51 = vmax.f32 %v1535_v39, 1e-06  ;;  %v5092_v14 = vmax.f32 %v1536_v6, 1e-06 }
 0x210   :  { %7773 = vst [vmem:[#allocation211_spill] sm:$0xff] %v5088_v7  ;;  %v1552_v8 = vld [vmem:[#allocation7 + $0x2f0] sm:$0xff]  ;;  %v1553_v25 = vld [vmem:[#allocation7 + $0x2f8] sm:$0xff]  ;;  %v1554_v27 = vld [vmem:[#allocation7 + $0x300] sm:$0xff]  ;;  %v5098_v56 = vmax.f32 %v1537_v0, 1e-06  ;;  %v5116_v0 = vmul.f32 %v4904_v17, %v4904_v17 }
 0x211   :  { %7774 = vst [vmem:[#allocation55_spill] sm:$0xff] %v5090_v51  ;;  %7775 = vst [vmem:[#allocation212_spill] sm:$0xff] %v5092_v14  ;;  %v5100_v53 = vmax.f32 %v1538_v38, 1e-06  ;;  %v5102_v10 = vmax.f32 %v1539_v62, 1e-06 }
 0x212   :  { %7777 = vst [vmem:[#allocation43_spill] sm:$0xff] %v5098_v56  ;;  %7780 = vst [vmem:[#allocation64_spill] sm:$0xff] %v5106_v20  ;;  %v1555_v39 = vld [vmem:[#allocation7 + $0x308] sm:$0xff]  ;;  %v1556_v6 = vld [vmem:[#allocation7 + $0x310] sm:$0xff]  ;;  %v5108_v51 = vmax.f32 %v1540_v36, 1e-06  ;;  %v5126_v36 = vmul.f32 %v4906_v35, %v4906_v35 }
 0x213   :  { %7778 = vst [vmem:[#allocation47_spill] sm:$0xff] %v5100_v53  ;;  %7779 = vst [vmem:[#allocation25_spill] sm:$0xff] %v5102_v10  ;;  %v1557_v14 = vld [vmem:[#allocation7 + $0x318] sm:$0xff]  ;;  %v5110_v37 = vmax.f32 %v1541_v46, 1e-06  ;;  %v1558_v38 = vld [vmem:[#allocation7 + $0x320] sm:$0xff] }
 0x214   :  { %7781 = vst [vmem:[#allocation76_spill] sm:$0xff] %v5108_v51  ;;  %v5112_v61 = vmax.f32 %v1542_v29, 1e-06  ;;  %7784 = vst [vmem:[#allocation41_spill] sm:$0xff] %v5116_v0  ;;  %v1559_v62 = vld [vmem:[#allocation7 + $0x328] sm:$0xff]  ;;  %v1560_v10 = vld [vmem:[#allocation7 + $0x330] sm:$0xff] }
 0x215   :  { %7782 = vst [vmem:[#allocation100_spill] sm:$0xff] %v5110_v37  ;;  %v5118_v53 = vmax.f32 %v1543_v48, 1e-06  ;;  %v5120_v55 = vmax.f32 %v1544_v21, 1e-06  ;;  %7788 = vst [vmem:[#allocation68_spill] sm:$0xff] %v5126_v36  ;;  %v5136_v48 = vmul.f32 %v4908_v30, %v4908_v30 }
 0x216   :  { %7783 = vst [vmem:[#allocation44_spill] sm:$0xff] %v5112_v61  ;;  %v5122_v20 = vmax.f32 %v1545_v60, 1e-06  ;;  %v1561_v46 = vld [vmem:[#allocation7 + $0x338] sm:$0xff]  ;;  %v1562_v29 = vld [vmem:[#allocation7 + $0x340] sm:$0xff]  ;;  %v1563_v61 = vld [vmem:[#allocation7 + $0x348] sm:$0xff] }
 0x217   :  { %7785 = vst [vmem:[#allocation49_spill] sm:$0xff] %v5118_v53  ;;  %7786 = vst [vmem:[#allocation53_spill] sm:$0xff] %v5120_v55  ;;  %v5128_v37 = vmax.f32 %v1546_v49, 1e-06  ;;  %v5130_v17 = vmax.f32 %v1547_v45, 1e-06  ;;  %v5146_v49 = vmul.f32 %v4912_v26, %v4912_v26 }
 0x218   :  { %7787 = vst [vmem:[#allocation29_spill] sm:$0xff] %v5122_v20  ;;  %v5132_v0 = vmax.f32 %v1548_v63, 1e-06  ;;  %7792 = vst [vmem:[#allocation104_spill] sm:$0xff] %v5136_v48  ;;  %v1564_v21 = vld [vmem:[#allocation7 + $0x350] sm:$0xff]  ;;  %v1565_v60 = vld [vmem:[#allocation7 + $0x358] sm:$0xff] }
 0x219   :  { %7789 = vst [vmem:[#allocation80_spill] sm:$0xff] %v5128_v37  ;;  %7790 = vst [vmem:[#allocation92_spill] sm:$0xff] %v5130_v17  ;;  %v1566_v20 = vld [vmem:[#allocation7 + $0x360] sm:$0xff]  ;;  %v5138_v55 = vmax.f32 %v1549_v43, 1e-06  ;;  %v1567_v45 = vld [vmem:[#allocation7 + $0x368] sm:$0xff]  ;;  %v5156_v43 = vmul.f32 %v4914_v12, %v4914_v12 }
 0x21a   :  { %7791 = vst [vmem:[#allocation213_spill] sm:$0xff] %v5132_v0  ;;  %v5140_v35 = vmax.f32 %v1550_v58, 1e-06  ;;  %v5142_v36 = vmax.f32 %v1551_v16, 1e-06  ;;  %7796 = vst [vmem:[#allocation42_spill] sm:$0xff] %v5146_v49 }
 0x21b   :  { %7793 = vst [vmem:[#allocation214_spill] sm:$0xff] %v5138_v55  ;;  %v1568_v63 = vld [vmem:[#allocation7 + $0x370] sm:$0xff]  ;;  %v1569_v0 = vld [vmem:[#allocation7 + $0x378] sm:$0xff]  ;;  %v5148_v17 = vmax.f32 %v1552_v8, 1e-06  ;;  %7800 = vst [vmem:[#allocation50_spill] sm:$0xff] %v5156_v43  ;;  %v5166_v8 = vmul.f32 %v4916_v59, %v4916_v59 }
 0x21c   :  { %7794 = vst [vmem:[#allocation48_spill] sm:$0xff] %v5140_v35  ;;  %7795 = vst [vmem:[#allocation215_spill] sm:$0xff] %v5142_v36  ;;  %v5150_v30 = vmax.f32 %v1553_v25, 1e-06  ;;  %v5152_v48 = vmax.f32 %v1554_v27, 1e-06 }
 0x21d   :  { %7797 = vst [vmem:[#allocation216_spill] sm:$0xff] %v5148_v17  ;;  %v1570_v58 = vld [vmem:[#allocation7 + $0x380] sm:$0xff]  ;;  %v1571_v16 = vld [vmem:[#allocation7 + $0x388] sm:$0xff]  ;;  %v1572_v36 = vld [vmem:[#allocation7 + $0x390] sm:$0xff]  ;;  %v5158_v35 = vmax.f32 %v1555_v39, 1e-06  ;;  %v5176_v39 = vmul.f32 %v4918_v22, %v4918_v22 }
 0x21e   :  { %7798 = vst [vmem:[#allocation46_spill] sm:$0xff] %v5150_v30  ;;  %7799 = vst [vmem:[#allocation217_spill] sm:$0xff] %v5152_v48  ;;  %v5160_v26 = vmax.f32 %v1556_v6, 1e-06  ;;  %v5162_v49 = vmax.f32 %v1557_v14, 1e-06 }
 0x21f   :  { %7801 = vst [vmem:[#allocation218_spill] sm:$0xff] %v5158_v35  ;;  %7804 = vst [vmem:[#allocation161_spill] sm:$0xff] %v5166_v8  ;;  %v1573_v25 = vld [vmem:[#allocation7 + $0x398] sm:$0xff]  ;;  %v1574_v27 = vld [vmem:[#allocation7 + $0x3a0] sm:$0xff]  ;;  %v5168_v30 = vmax.f32 %v1558_v38, 1e-06  ;;  %v5186_v38 = vmul.f32 %v4920_v5, %v4920_v5 }
 0x220   :  { %7802 = vst [vmem:[#allocation54_spill] sm:$0xff] %v5160_v26  ;;  %7803 = vst [vmem:[#allocation219_spill] sm:$0xff] %v5162_v49  ;;  %v1575_v48 = vld [vmem:[#allocation7 + $0x3a8] sm:$0xff]  ;;  %v5170_v12 = vmax.f32 %v1559_v62, 1e-06  ;;  %v1576_v6 = vld [vmem:[#allocation7 + $0x3b0] sm:$0xff] }
 0x221   :  { %7805 = vst [vmem:[#allocation220_spill] sm:$0xff] %v5168_v30  ;;  %v5172_v43 = vmax.f32 %v1560_v10, 1e-06  ;;  %7808 = vst [vmem:[#allocation163_spill] sm:$0xff] %v5176_v39  ;;  %v1577_v14 = vld [vmem:[#allocation7 + $0x3b8] sm:$0xff]  ;;  %v1578_v49 = vld [vmem:[#allocation7 + $0x3c0] sm:$0xff] }
 0x222   :  { %7806 = vst [vmem:[#allocation162_spill] sm:$0xff] %v5170_v12  ;;  %v5178_v26 = vmax.f32 %v1561_v46, 1e-06  ;;  %v5180_v59 = vmax.f32 %v1562_v29, 1e-06  ;;  %7812 = vst [vmem:[#allocation165_spill] sm:$0xff] %v5186_v38  ;;  %v5196_v46 = vmul.f32 %v4922_v3, %v4922_v3 }
 0x223   :  { %7807 = vst [vmem:[#allocation221_spill] sm:$0xff] %v5172_v43  ;;  %v5182_v8 = vmax.f32 %v1563_v61, 1e-06  ;;  %v1579_v62 = vld [vmem:[#allocation7 + $0x3c8] sm:$0xff]  ;;  %v1580_v10 = vld [vmem:[#allocation7 + $0x3d0] sm:$0xff]  ;;  %v1581_v43 = vld [vmem:[#allocation7 + $0x3d8] sm:$0xff] }
 0x224   :  { %7809 = vst [vmem:[#allocation222_spill] sm:$0xff] %v5178_v26  ;;  %7810 = vst [vmem:[#allocation164_spill] sm:$0xff] %v5180_v59  ;;  %v5188_v12 = vmax.f32 %v1564_v21, 1e-06  ;;  %v5190_v22 = vmax.f32 %v1565_v60, 1e-06  ;;  %v5206_v21 = vmul.f32 %v4928_v41, %v4928_v41 }
 0x225   :  { %7811 = vst [vmem:[#allocation223_spill] sm:$0xff] %v5182_v8  ;;  %v5192_v39 = vmax.f32 %v1566_v20, 1e-06  ;;  %7816 = vst [vmem:[#allocation65_spill] sm:$0xff] %v5196_v46  ;;  %v1582_v29 = vld [vmem:[#allocation7 + $0x3e0] sm:$0xff]  ;;  %v1583_v61 = vld [vmem:[#allocation7 + $0x3e8] sm:$0xff]  ;;  %v5216_v46 = vmul.f32 %v4930_v18, %v4930_v18  ;;  %v5236_v18 = vmul.f32 %v4938_v44, %v4938_v44  ;;  %v5256_v44 = vmul.f32 %v4942_v23, %v4942_v23 }
 0x226   :  { %7813 = vst [vmem:[#allocation224_spill] sm:$0xff] %v5188_v12  ;;  %7814 = vst [vmem:[#allocation112_spill] sm:$0xff] %v5190_v22  ;;  %v1584_v8 = vld [vmem:[#allocation7 + $0x3f0] sm:$0xff]  ;;  %v5198_v59 = vmax.f32 %v1567_v45, 1e-06  ;;  %v1585_v60 = vld [vmem:[#allocation7 + $0x3f8] sm:$0xff] }
 0x227   :  { %7815 = vst [vmem:[#allocation101_spill] sm:$0xff] %v5192_v39  ;;  %v5200_v5 = vmax.f32 %v1568_v63, 1e-06  ;;  %v5202_v38 = vmax.f32 %v1569_v0, 1e-06  ;;  %7820 = vst [vmem:[#allocation107_spill] sm:$0xff] %v5206_v21  ;;  %v5226_v21 = vmul.f32 %v4932_v50, %v4932_v50  ;;  %v5246_v50 = vmul.f32 %v4940_v9, %v4940_v9 }
 0x228   :  { %7817 = vst [vmem:[#allocation57_spill] sm:$0xff] %v5198_v59  ;;  %v5208_v20 = vmax.f32 %v1570_v58, 1e-06  ;;  %v5210_v39 = vmax.f32 %v1571_v16, 1e-06 }
 0x229   :  { %7818 = vst [vmem:[#allocation146_spill] sm:$0xff] %v5200_v5  ;;  %7819 = vst [vmem:[#allocation116_spill] sm:$0xff] %v5202_v38  ;;  %v5212_v3 = vmax.f32 %v1572_v36, 1e-06  ;;  %v5218_v45 = vmax.f32 %v1573_v25, 1e-06 }
 0x22a   :  { %7821 = vst [vmem:[#allocation120_spill] sm:$0xff] %v5208_v20  ;;  %7822 = vst [vmem:[#allocation130_spill] sm:$0xff] %v5210_v39  ;;  %v5220_v63 = vmax.f32 %v1574_v27, 1e-06  ;;  %v5222_v0 = vmax.f32 %v1575_v48, 1e-06 }
 0x22b   :  { %7823 = vst [vmem:[#allocation27_spill] sm:$0xff] %v5212_v3  ;;  %7824 = vst [vmem:[#allocation35_spill] sm:$0xff] %v5218_v45  ;;  %v5228_v58 = vmax.f32 %v1576_v6, 1e-06  ;;  %v5230_v16 = vmax.f32 %v1577_v14, 1e-06 }
 0x22c   :  { %7825 = vst [vmem:[#allocation85_spill] sm:$0xff] %v5220_v63  ;;  %7826 = vst [vmem:[#allocation94_spill] sm:$0xff] %v5222_v0  ;;  %v5232_v36 = vmax.f32 %v1578_v49, 1e-06  ;;  %v5238_v25 = vmax.f32 %v1579_v62, 1e-06 }
 0x22d   :  { %7827 = vst [vmem:[#allocation111_spill] sm:$0xff] %v5228_v58  ;;  %7828 = vst [vmem:[#allocation66_spill] sm:$0xff] %v5230_v16  ;;  %v5240_v27 = vmax.f32 %v1580_v10, 1e-06  ;;  %v5242_v48 = vmax.f32 %v1581_v43, 1e-06  ;;  %v5262_v43 = vmul.f32 %v4948_v57, %v4948_v57  ;;  %v5266_v10 = vmul.f32 %v4950_v47, %v4950_v47 }
 0x22e   :  { %7829 = vst [vmem:[#allocation73_spill] sm:$0xff] %v5232_v36  ;;  %7830 = vst [vmem:[#allocation79_spill] sm:$0xff] %v5238_v25  ;;  %v5248_v6 = vmax.f32 %v1582_v29, 1e-06  ;;  %v5250_v14 = vmax.f32 %v1583_v61, 1e-06  ;;  %v5270_v29 = vmul.f32 %v4952_v28, %v4952_v28  ;;  %v5278_v61 = vmul.f32 %v4960_v15, %v4960_v15 }
 0x22f   :  { %7831 = vst [vmem:[#allocation86_spill] sm:$0xff] %v5240_v27  ;;  %7832 = vst [vmem:[#allocation167_spill] sm:$0xff] %v5242_v48  ;;  %v5252_v49 = vmax.f32 %v1584_v8, 1e-06  ;;  %v5258_v62 = vmax.f32 %v1585_v60, 1e-06  ;;  %v5274_v8 = vmul.f32 %v4958_v33, %v4958_v33  ;;  %v5282_v60 = vmul.f32 %v4962_v52, %v4962_v52 }
 0x230   :  { %7833 = vst [vmem:[#allocation58_spill] sm:$0xff] %v5248_v6  ;;  %7834 = vst [vmem:[#allocation132_spill] sm:$0xff] %v5250_v14  ;;  %v5286_v47 = vmul.f32 %v4968_v1, %v4968_v1  ;;  %v5290_v28 = vmul.f32 %v4970_v19, %v4970_v19  ;;  %v5298_v15 = vmul.f32 %v4978_v31, %v4978_v31 }
 0x231   :  { %7835 = vst [vmem:[#allocation31_spill] sm:$0xff] %v5252_v49  ;;  %7836 = vst [vmem:[#allocation72_spill] sm:$0xff] %v5258_v62  ;;  %v5310_v19 = vmul.f32 %v4988_v54, %v4988_v54 }
 0x232   :  { %7837 = vst [vmem:[#allocation87_spill] sm:$0xff] %v5270_v29  ;;  %7838 = vst [vmem:[#allocation141_spill] sm:$0xff] %v5278_v61  ;;  %v7841_v29 = vld [vmem:[#allocation33_spill] sm:$0xff]  ;;  %v7843_v61 = vld [vmem:[#allocation194_spill] sm:$0xff] }
 0x233   :  { %7839 = vst [vmem:[#allocation117_spill] sm:$0xff] %v5282_v60  ;;  %7840 = vst [vmem:[#allocation67_spill] sm:$0xff] %v5290_v28  ;;  %v5294_v33 = vmul.f32 %v7841_v29, %v7841_v29  ;;  %v5302_v52 = vmul.f32 %v7843_v61, %v7843_v61  ;;  %v7845_v60 = vld [vmem:[#allocation156_spill] sm:$0xff]  ;;  %v7847_v28 = vld [vmem:[#allocation26_spill] sm:$0xff]  ;;  %v5322_v61 = vmul.f32 %v4998_v40, %v4998_v40 }
 0x234   :  { %v5306_v1 = vmul.f32 %v7845_v60, %v7845_v60  ;;  %v5314_v29 = vmul.f32 %v7847_v28, %v7847_v28  ;;  %v5334_v28 = vmul.f32 %v5008_v2, %v5008_v2 }
 0x235   :  { %7842 = vst [vmem:[#allocation74_spill] sm:$0xff] %v5294_v33  ;;  %7844 = vst [vmem:[#allocation81_spill] sm:$0xff] %v5302_v52  ;;  %v7849_v33 = vld [vmem:[#allocation196_spill] sm:$0xff]  ;;  %v7851_v52 = vld [vmem:[#allocation197_spill] sm:$0xff] }
 0x236   :  { %7846 = vst [vmem:[#allocation138_spill] sm:$0xff] %v5306_v1  ;;  %7848 = vst [vmem:[#allocation168_spill] sm:$0xff] %v5314_v29  ;;  %v5318_v31 = vmul.f32 %v7849_v33, %v7849_v33  ;;  %v5326_v60 = vmul.f32 %v7851_v52, %v7851_v52  ;;  %v7853_v1 = vld [vmem:[#allocation17_spill] sm:$0xff]  ;;  %v7855_v29 = vld [vmem:[#allocation28_spill] sm:$0xff]  ;;  %v5346_v52 = vmul.f32 %v5018_v42, %v5018_v42 }
 0x237   :  { %v5330_v54 = vmul.f32 %v7853_v1, %v7853_v1  ;;  %v5338_v33 = vmul.f32 %v7855_v29, %v7855_v29  ;;  %v5358_v29 = vmul.f32 %v5028_v13, %v5028_v13 }
 0x238   :  { %7850 = vst [vmem:[#allocation99_spill] sm:$0xff] %v5318_v31  ;;  %7852 = vst [vmem:[#allocation60_spill] sm:$0xff] %v5326_v60  ;;  %v7857_v31 = vld [vmem:[#allocation199_spill] sm:$0xff]  ;;  %v7859_v60 = vld [vmem:[#allocation37_spill] sm:$0xff] }
 0x239   :  { %7854 = vst [vmem:[#allocation23_spill] sm:$0xff] %v5330_v54  ;;  %7856 = vst [vmem:[#allocation20_spill] sm:$0xff] %v5338_v33  ;;  %v5342_v40 = vmul.f32 %v7857_v31, %v7857_v31  ;;  %v5350_v1 = vmul.f32 %v7859_v60, %v7859_v60  ;;  %v7861_v54 = vld [vmem:[#allocation135_spill] sm:$0xff]  ;;  %v7863_v33 = vld [vmem:[#allocation202_spill] sm:$0xff]  ;;  %v5370_v60 = vmul.f32 %v5038_v11, %v5038_v11 }
 0x23a   :  { %v5354_v2 = vmul.f32 %v7861_v54, %v7861_v54  ;;  %v5362_v31 = vmul.f32 %v7863_v33, %v7863_v33  ;;  %v5382_v33 = vmul.f32 %v5048_v24, %v5048_v24 }
 0x23b   :  { %7858 = vst [vmem:[#allocation103_spill] sm:$0xff] %v5342_v40  ;;  %7860 = vst [vmem:[#allocation40_spill] sm:$0xff] %v5350_v1  ;;  %v7865_v40 = vld [vmem:[#allocation36_spill] sm:$0xff]  ;;  %v7867_v1 = vld [vmem:[#allocation22_spill] sm:$0xff] }
 0x23c   :  { %7862 = vst [vmem:[#allocation89_spill] sm:$0xff] %v5354_v2  ;;  %7864 = vst [vmem:[#allocation142_spill] sm:$0xff] %v5362_v31  ;;  %v5366_v42 = vmul.f32 %v7865_v40, %v7865_v40  ;;  %v5374_v54 = vmul.f32 %v7867_v1, %v7867_v1  ;;  %v7869_v2 = vld [vmem:[#allocation204_spill] sm:$0xff]  ;;  %v7871_v31 = vld [vmem:[#allocation205_spill] sm:$0xff]  ;;  %v5394_v1 = vmul.f32 %v5058_v34, %v5058_v34 }
 0x23d   :  { %v5378_v13 = vmul.f32 %v7869_v2, %v7869_v2  ;;  %v5386_v40 = vmul.f32 %v7871_v31, %v7871_v31  ;;  %v5406_v31 = vmul.f32 %v5068_v4, %v5068_v4 }
 0x23e   :  { %7866 = vst [vmem:[#allocation171_spill] sm:$0xff] %v5366_v42  ;;  %7868 = vst [vmem:[#allocation122_spill] sm:$0xff] %v5374_v54  ;;  %v7873_v42 = vld [vmem:[#allocation159_spill] sm:$0xff]  ;;  %v7875_v54 = vld [vmem:[#allocation137_spill] sm:$0xff] }
 0x23f   :  { %7870 = vst [vmem:[#allocation69_spill] sm:$0xff] %v5378_v13  ;;  %7872 = vst [vmem:[#allocation75_spill] sm:$0xff] %v5386_v40  ;;  %v5390_v11 = vmul.f32 %v7873_v42, %v7873_v42  ;;  %v5398_v2 = vmul.f32 %v7875_v54, %v7875_v54  ;;  %v7877_v13 = vld [vmem:[#allocation207_spill] sm:$0xff]  ;;  %v7879_v40 = vld [vmem:[#allocation108_spill] sm:$0xff]  ;;  %v5418_v54 = vmul.f32 %v5078_v32, %v5078_v32 }
 0x240   :  { %v5402_v24 = vmul.f32 %v7877_v13, %v7877_v13  ;;  %v5410_v42 = vmul.f32 %v7879_v40, %v7879_v40  ;;  %v5430_v40 = vmul.f32 %v5088_v7, %v5088_v7 }
 0x241   :  { %7874 = vst [vmem:[#allocation174_spill] sm:$0xff] %v5390_v11  ;;  %7876 = vst [vmem:[#allocation82_spill] sm:$0xff] %v5398_v2  ;;  %v7881_v11 = vld [vmem:[#allocation21_spill] sm:$0xff]  ;;  %v7883_v2 = vld [vmem:[#allocation210_spill] sm:$0xff] }
 0x242   :  { %7878 = vst [vmem:[#allocation90_spill] sm:$0xff] %v5402_v24  ;;  %7880 = vst [vmem:[#allocation97_spill] sm:$0xff] %v5410_v42  ;;  %v5414_v34 = vmul.f32 %v7881_v11, %v7881_v11  ;;  %v5422_v13 = vmul.f32 %v7883_v2, %v7883_v2  ;;  %v7885_v24 = vld [vmem:[#allocation84_spill] sm:$0xff]  ;;  %v7887_v42 = vld [vmem:[#allocation55_spill] sm:$0xff]  ;;  %v5442_v2 = vmul.f32 %v5098_v56, %v5098_v56 }
 0x243   :  { %v5426_v4 = vmul.f32 %v7885_v24, %v7885_v24  ;;  %v5434_v11 = vmul.f32 %v7887_v42, %v7887_v42  ;;  %v5454_v42 = vmul.f32 %v5108_v51, %v5108_v51 }
 0x244   :  { %7882 = vst [vmem:[#allocation144_spill] sm:$0xff] %v5414_v34  ;;  %7884 = vst [vmem:[#allocation61_spill] sm:$0xff] %v5422_v13  ;;  %v7889_v34 = vld [vmem:[#allocation212_spill] sm:$0xff]  ;;  %v7891_v13 = vld [vmem:[#allocation47_spill] sm:$0xff] }
 0x245   :  { %7886 = vst [vmem:[#allocation133_spill] sm:$0xff] %v5426_v4  ;;  %7888 = vst [vmem:[#allocation16_spill] sm:$0xff] %v5434_v11  ;;  %v5438_v32 = vmul.f32 %v7889_v34, %v7889_v34  ;;  %v5446_v24 = vmul.f32 %v7891_v13, %v7891_v13  ;;  %v7893_v4 = vld [vmem:[#allocation25_spill] sm:$0xff]  ;;  %v7895_v11 = vld [vmem:[#allocation100_spill] sm:$0xff]  ;;  %v5466_v13 = vmul.f32 %v5118_v53, %v5118_v53 }
 0x246   :  { %v5450_v7 = vmul.f32 %v7893_v4, %v7893_v4  ;;  %v5458_v34 = vmul.f32 %v7895_v11, %v7895_v11  ;;  %v5478_v11 = vmul.f32 %v5128_v37, %v5128_v37 }
 0x247   :  { %7890 = vst [vmem:[#allocation105_spill] sm:$0xff] %v5438_v32  ;;  %7892 = vst [vmem:[#allocation51_spill] sm:$0xff] %v5446_v24  ;;  %v7897_v32 = vld [vmem:[#allocation44_spill] sm:$0xff]  ;;  %v7899_v24 = vld [vmem:[#allocation53_spill] sm:$0xff] }
 0x248   :  { %7894 = vst [vmem:[#allocation139_spill] sm:$0xff] %v5450_v7  ;;  %7896 = vst [vmem:[#allocation169_spill] sm:$0xff] %v5458_v34  ;;  %v5462_v56 = vmul.f32 %v7897_v32, %v7897_v32  ;;  %v5470_v4 = vmul.f32 %v7899_v24, %v7899_v24  ;;  %v7901_v7 = vld [vmem:[#allocation29_spill] sm:$0xff]  ;;  %v7903_v34 = vld [vmem:[#allocation92_spill] sm:$0xff]  ;;  %v5490_v24 = vmul.f32 %v5138_v55, %v5138_v55 }
 0x249   :  { %v5474_v51 = vmul.f32 %v7901_v7, %v7901_v7  ;;  %v5482_v32 = vmul.f32 %v7903_v34, %v7903_v34  ;;  %v5502_v34 = vmul.f32 %v5148_v17, %v5148_v17 }
 0x24a   :  { %7898 = vst [vmem:[#allocation172_spill] sm:$0xff] %v5462_v56  ;;  %7900 = vst [vmem:[#allocation126_spill] sm:$0xff] %v5470_v4  ;;  %v7905_v56 = vld [vmem:[#allocation213_spill] sm:$0xff]  ;;  %v7907_v4 = vld [vmem:[#allocation48_spill] sm:$0xff] }
 0x24b   :  { %7902 = vst [vmem:[#allocation70_spill] sm:$0xff] %v5474_v51  ;;  %7904 = vst [vmem:[#allocation77_spill] sm:$0xff] %v5482_v32  ;;  %v5486_v53 = vmul.f32 %v7905_v56, %v7905_v56  ;;  %v5494_v7 = vmul.f32 %v7907_v4, %v7907_v4  ;;  %v7909_v51 = vld [vmem:[#allocation215_spill] sm:$0xff]  ;;  %v7911_v32 = vld [vmem:[#allocation46_spill] sm:$0xff]  ;;  %v5514_v4 = vmul.f32 %v5158_v35, %v5158_v35 }
 0x24c   :  { %v5498_v37 = vmul.f32 %v7909_v51, %v7909_v51  ;;  %v5506_v56 = vmul.f32 %v7911_v32, %v7911_v32  ;;  %v5526_v32 = vmul.f32 %v5168_v30, %v5168_v30 }
 0x24d   :  { %7906 = vst [vmem:[#allocation83_spill] sm:$0xff] %v5486_v53  ;;  %7908 = vst [vmem:[#allocation91_spill] sm:$0xff] %v5494_v7  ;;  %v7913_v53 = vld [vmem:[#allocation217_spill] sm:$0xff]  ;;  %v7915_v7 = vld [vmem:[#allocation54_spill] sm:$0xff] }
 0x24e   :  { %7910 = vst [vmem:[#allocation98_spill] sm:$0xff] %v5498_v37  ;;  %7912 = vst [vmem:[#allocation102_spill] sm:$0xff] %v5506_v56  ;;  %v5510_v55 = vmul.f32 %v7913_v53, %v7913_v53  ;;  %v5518_v51 = vmul.f32 %v7915_v7, %v7915_v7  ;;  %v7917_v37 = vld [vmem:[#allocation219_spill] sm:$0xff]  ;;  %v7919_v56 = vld [vmem:[#allocation162_spill] sm:$0xff]  ;;  %v5538_v7 = vmul.f32 %v5178_v26, %v5178_v26 }
 0x24f   :  { %v5522_v17 = vmul.f32 %v7917_v37, %v7917_v37  ;;  %v5530_v53 = vmul.f32 %v7919_v56, %v7919_v56  ;;  %v5550_v56 = vmul.f32 %v5188_v12, %v5188_v12  ;;  %v5570_v12 = vmul.f32 %v5202_v38, %v5202_v38 }
 0x250   :  { %7914 = vst [vmem:[#allocation63_spill] sm:$0xff] %v5510_v55  ;;  %7916 = vst [vmem:[#allocation34_spill] sm:$0xff] %v5518_v51  ;;  %v7920_v55 = vld [vmem:[#allocation221_spill] sm:$0xff]  ;;  %v7922_v51 = vld [vmem:[#allocation164_spill] sm:$0xff]  ;;  %v5590_v38 = vmul.f32 %v5220_v63, %v5220_v63  ;;  %v5610_v63 = vmul.f32 %v5238_v25, %v5238_v25  ;;  %v5630_v25 = vmul.f32 %v5252_v49, %v5252_v49 }
 0x251   :  { %7918 = vst [vmem:[#allocation30_spill] sm:$0xff] %v5522_v17  ;;  %v5534_v35 = vmul.f32 %v7920_v55, %v7920_v55  ;;  %v5542_v37 = vmul.f32 %v7922_v51, %v7922_v51  ;;  %v7923_v17 = vld [vmem:[#allocation223_spill] sm:$0xff]  ;;  %v5554_v55 = vmul.f32 %v5190_v22, %v5190_v22  ;;  %v5562_v51 = vmul.f32 %v5198_v59, %v5198_v59 }
 0x252   :  { %v5546_v30 = vmul.f32 %v7923_v17, %v7923_v17  ;;  %v5566_v17 = vmul.f32 %v5200_v5, %v5200_v5  ;;  %v5574_v22 = vmul.f32 %v5208_v20, %v5208_v20  ;;  %v5582_v59 = vmul.f32 %v5212_v3, %v5212_v3  ;;  %7925 = vst [vmem:[#allocation166_spill] sm:$0xff] %v5590_v38  ;;  %v7953_v38 = vld [vmem:[#allocation193_spill] sm:$0xff] }
 0x253   :  { %7921 = vst [vmem:[#allocation88_spill] sm:$0xff] %v5534_v35  ;;  %v7924_v35 = vld [vmem:[#allocation101_spill] sm:$0xff]  ;;  %v5586_v5 = vmul.f32 %v5218_v45, %v5218_v45  ;;  %v5594_v20 = vmul.f32 %v5222_v0, %v5222_v0  ;;  %v5602_v3 = vmul.f32 %v5230_v16, %v5230_v16  ;;  %v5606_v45 = vmul.f32 %v5232_v36, %v5232_v36 }
 0x254   :  { %v5558_v26 = vmul.f32 %v7924_v35, %v7924_v35  ;;  %v5578_v35 = vmul.f32 %v5210_v39, %v5210_v39  ;;  %v5598_v39 = vmul.f32 %v5228_v58, %v5228_v58  ;;  %7930 = vst [vmem:[#allocation78_spill] sm:$0xff] %v5610_v63  ;;  %v5614_v0 = vmul.f32 %v5240_v27, %v5240_v27  ;;  %v7938_v63 = vld [vmem:[#allocation129_spill] sm:$0xff] }
 0x255   :  { %7926 = vst [vmem:[#allocation170_spill] sm:$0xff] %v5594_v20  ;;  %7928 = vst [vmem:[#allocation128_spill] sm:$0xff] %v5602_v3  ;;  %v5618_v58 = vmul.f32 %v5242_v48, %v5242_v48  ;;  %v5622_v16 = vmul.f32 %v5248_v6, %v5248_v6  ;;  %v5626_v36 = vmul.f32 %v5250_v14, %v5250_v14  ;;  %v7944_v3 = vld [vmem:[#allocation131_spill] sm:$0xff]  ;;  %v7950_v20 = vld [vmem:[#allocation32_spill] sm:$0xff] }
 0x256   :  { %7927 = vst [vmem:[#allocation145_spill] sm:$0xff] %v5598_v39  ;;  %7929 = vst [vmem:[#allocation71_spill] sm:$0xff] %v5606_v45  ;;  %v5634_v27 = vmul.f32 %v5258_v62, %v5258_v62  ;;  %v7941_v45 = vld [vmem:[#allocation188_spill] sm:$0xff]  ;;  %v7947_v39 = vld [vmem:[#allocation190_spill] sm:$0xff] }
 0x257   :  { %7931 = vst [vmem:[#allocation45_spill] sm:$0xff] %v5614_v0  ;;  %7932 = vst [vmem:[#allocation93_spill] sm:$0xff] %v5618_v58  ;;  %v7937_v0 = vld [vmem:[#allocation175_spill] sm:$0xff] }
 0x258   :  { %7933 = vst [vmem:[#allocation143_spill] sm:$0xff] %v5622_v16  ;;  %7934 = vst [vmem:[#allocation173_spill] sm:$0xff] %v5626_v36  ;;  %v5638_v48 = vmul.f32 %v7938_v63, %v7937_v0  ;;  %v7940_v58 = vld [vmem:[#allocation147_spill] sm:$0xff]  ;;  %v7943_v16 = vld [vmem:[#allocation176_spill] sm:$0xff] }
 0x259   :  { %7935 = vst [vmem:[#allocation106_spill] sm:$0xff] %v5630_v25  ;;  %7936 = vst [vmem:[#allocation95_spill] sm:$0xff] %v5634_v27  ;;  %v5642_v6 = vmul.f32 %v7941_v45, %v7940_v58  ;;  %v5646_v14 = vmul.f32 %v7944_v3, %v7943_v16  ;;  %v7946_v36 = vld [vmem:[#allocation148_spill] sm:$0xff]  ;;  %v7949_v25 = vld [vmem:[#allocation109_spill] sm:$0xff] }
 0x25a   :  { %7939 = vst [vmem:[#allocation140_spill] sm:$0xff] %v5638_v48  ;;  %v5650_v49 = vmul.f32 %v7947_v39, %v7946_v36  ;;  %v5654_v62 = vmul.f32 %v7950_v20, %v7949_v25  ;;  %v7952_v27 = vld [vmem:[#allocation177_spill] sm:$0xff]  ;;  %v7955_v0 = vld [vmem:[#allocation110_spill] sm:$0xff]  ;;  %v7956_v48 = vld [vmem:[#allocation15_spill] sm:$0xff] }
 0x25b   :  { %7942 = vst [vmem:[#allocation175_spill] sm:$0xff] %v5642_v6  ;;  %7945 = vst [vmem:[#allocation129_spill] sm:$0xff] %v5646_v14  ;;  %v5658_v63 = vmul.f32 %v7953_v38, %v7952_v27  ;;  %v5662_v45 = vmul.f32 %v7956_v48, %v7955_v0  ;;  %v7958_v58 = vld [vmem:[#allocation178_spill] sm:$0xff]  ;;  %v7961_v16 = vld [vmem:[#allocation113_spill] sm:$0xff] }
 0x25c   :  { %7948 = vst [vmem:[#allocation147_spill] sm:$0xff] %v5650_v49  ;;  %7951 = vst [vmem:[#allocation188_spill] sm:$0xff] %v5654_v62  ;;  %v7959_v6 = vld [vmem:[#allocation134_spill] sm:$0xff]  ;;  %v7965_v49 = vld [vmem:[#allocation19_spill] sm:$0xff] }
 0x25d   :  { %7954 = vst [vmem:[#allocation176_spill] sm:$0xff] %v5658_v63  ;;  %7957 = vst [vmem:[#allocation131_spill] sm:$0xff] %v5662_v45  ;;  %v5666_v3 = vmul.f32 %v7959_v6, %v7958_v58  ;;  %v7962_v14 = vld [vmem:[#allocation198_spill] sm:$0xff]  ;;  %v7967_v25 = vld [vmem:[#allocation179_spill] sm:$0xff] }
 0x25e   :  { %v5670_v39 = vmul.f32 %v7962_v14, %v7961_v16  ;;  %v7964_v36 = vld [vmem:[#allocation114_spill] sm:$0xff]  ;;  %v7968_v62 = vld [vmem:[#allocation201_spill] sm:$0xff]  ;;  %v7970_v27 = vld [vmem:[#allocation115_spill] sm:$0xff] }
 0x25f   :  { %7960 = vst [vmem:[#allocation148_spill] sm:$0xff] %v5666_v3  ;;  %v5674_v20 = vmul.f32 %v7965_v49, %v7964_v36  ;;  %v5678_v38 = vmul.f32 %v7968_v62, %v7967_v25  ;;  %v7971_v63 = vld [vmem:[#allocation59_spill] sm:$0xff]  ;;  %v7973_v0 = vld [vmem:[#allocation180_spill] sm:$0xff]  ;;  %v7974_v45 = vld [vmem:[#allocation38_spill] sm:$0xff] }
 0x260   :  { %7963 = vst [vmem:[#allocation190_spill] sm:$0xff] %v5670_v39  ;;  %v5682_v48 = vmul.f32 %v7971_v63, %v7970_v27  ;;  %v5686_v6 = vmul.f32 %v7974_v45, %v7973_v0  ;;  %v7976_v58 = vld [vmem:[#allocation118_spill] sm:$0xff]  ;;  %v7979_v16 = vld [vmem:[#allocation119_spill] sm:$0xff]  ;;  %v7980_v39 = vld [vmem:[#allocation160_spill] sm:$0xff] }
 0x261   :  { %7966 = vst [vmem:[#allocation109_spill] sm:$0xff] %v5674_v20  ;;  %7969 = vst [vmem:[#allocation32_spill] sm:$0xff] %v5678_v38  ;;  %v7977_v3 = vld [vmem:[#allocation206_spill] sm:$0xff]  ;;  %v5694_v49 = vmul.f32 %v7980_v39, %v7979_v16  ;;  %v7982_v36 = vld [vmem:[#allocation181_spill] sm:$0xff] }
 0x262   :  { %7972 = vst [vmem:[#allocation177_spill] sm:$0xff] %v5682_v48  ;;  %7975 = vst [vmem:[#allocation193_spill] sm:$0xff] %v5686_v6  ;;  %v5690_v14 = vmul.f32 %v7977_v3, %v7976_v58  ;;  %v7983_v20 = vld [vmem:[#allocation209_spill] sm:$0xff]  ;;  %v7986_v38 = vld [vmem:[#allocation96_spill] sm:$0xff] }
 0x263   :  { %7981 = vst [vmem:[#allocation15_spill] sm:$0xff] %v5694_v49  ;;  %v5698_v62 = vmul.f32 %v7983_v20, %v7982_v36  ;;  %v7985_v25 = vld [vmem:[#allocation121_spill] sm:$0xff]  ;;  %v7988_v27 = vld [vmem:[#allocation182_spill] sm:$0xff]  ;;  %v7989_v48 = vld [vmem:[#allocation39_spill] sm:$0xff] }
 0x264   :  { %7978 = vst [vmem:[#allocation110_spill] sm:$0xff] %v5690_v14  ;;  %v5702_v63 = vmul.f32 %v7986_v38, %v7985_v25  ;;  %v5706_v45 = vmul.f32 %v7989_v48, %v7988_v27  ;;  %v7991_v0 = vld [vmem:[#allocation123_spill] sm:$0xff]  ;;  %v7992_v6 = vld [vmem:[#allocation64_spill] sm:$0xff]  ;;  %v7995_v14 = vld [vmem:[#allocation41_spill] sm:$0xff] }
 0x265   :  { %7984 = vst [vmem:[#allocation178_spill] sm:$0xff] %v5698_v62  ;;  %v5710_v3 = vmul.f32 %v7992_v6, %v7991_v0  ;;  %v7994_v58 = vld [vmem:[#allocation124_spill] sm:$0xff]  ;;  %v7997_v16 = vld [vmem:[#allocation183_spill] sm:$0xff]  ;;  %v8000_v36 = vld [vmem:[#allocation125_spill] sm:$0xff] }
 0x266   :  { %7987 = vst [vmem:[#allocation134_spill] sm:$0xff] %v5702_v63  ;;  %7990 = vst [vmem:[#allocation113_spill] sm:$0xff] %v5706_v45  ;;  %v5714_v39 = vmul.f32 %v7995_v14, %v7994_v58  ;;  %v7998_v49 = vld [vmem:[#allocation68_spill] sm:$0xff]  ;;  %v8003_v25 = vld [vmem:[#allocation149_spill] sm:$0xff] }
 0x267   :  { %7993 = vst [vmem:[#allocation198_spill] sm:$0xff] %v5710_v3  ;;  %v5718_v20 = vmul.f32 %v7998_v49, %v7997_v16  ;;  %v8001_v62 = vld [vmem:[#allocation104_spill] sm:$0xff]  ;;  %v8004_v63 = vld [vmem:[#allocation42_spill] sm:$0xff]  ;;  %v8005_v27 = vld [vmem:[#allocation127_spill] sm:$0xff] }
 0x268   :  { %7996 = vst [vmem:[#allocation114_spill] sm:$0xff] %v5714_v39  ;;  %v5722_v38 = vmul.f32 %v8001_v62, %v8000_v36  ;;  %v5726_v48 = vmul.f32 %v8004_v63, %v8003_v25  ;;  %v8006_v45 = vld [vmem:[#allocation50_spill] sm:$0xff]  ;;  %v8007_v0 = vld [vmem:[#allocation185_spill] sm:$0xff]  ;;  %v8010_v39 = vld [vmem:[#allocation163_spill] sm:$0xff] }
 0x269   :  { %7999 = vst [vmem:[#allocation19_spill] sm:$0xff] %v5718_v20  ;;  %v5730_v6 = vmul.f32 %v8006_v45, %v8005_v27  ;;  %v8008_v3 = vld [vmem:[#allocation161_spill] sm:$0xff]  ;;  %v8009_v58 = vld [vmem:[#allocation150_spill] sm:$0xff]  ;;  %v8014_v36 = vld [vmem:[#allocation151_spill] sm:$0xff] }
 0x26a   :  { %8002 = vst [vmem:[#allocation179_spill] sm:$0xff] %v5722_v38  ;;  %v5734_v14 = vmul.f32 %v8008_v3, %v8007_v0  ;;  %v5738_v49 = vmul.f32 %v8010_v39, %v8009_v58  ;;  %v8011_v16 = vld [vmem:[#allocation186_spill] sm:$0xff]  ;;  %v8012_v20 = vld [vmem:[#allocation165_spill] sm:$0xff]  ;;  %v8017_v25 = vld [vmem:[#allocation107_spill] sm:$0xff] }
 0x26b   :  { %v5742_v62 = vmul.f32 %v8012_v20, %v8011_v16  ;;  %v8015_v38 = vld [vmem:[#allocation65_spill] sm:$0xff]  ;;  %v5750_v45 = vmul.f32 %v8017_v25, %v4928_v41  ;;  %v8019_v27 = vld [vmem:[#allocation187_spill] sm:$0xff]  ;;  %v8021_v0 = vld [vmem:[#allocation152_spill] sm:$0xff]  ;;  %v5770_v41 = vmul.f32 %v5256_v44, %v4942_v23 }
 0x26c   :  { %v5746_v63 = vmul.f32 %v8015_v38, %v8014_v36  ;;  %v5754_v3 = vmul.f32 %v5216_v46, %v8019_v27  ;;  %v5758_v39 = vmul.f32 %v5226_v21, %v8021_v0  ;;  %v8023_v58 = vld [vmem:[#allocation153_spill] sm:$0xff]  ;;  %v5766_v38 = vmul.f32 %v5246_v50, %v4940_v9  ;;  %v8026_v36 = vld [vmem:[#allocation154_spill] sm:$0xff]  ;;  %v8027_v25 = vld [vmem:[#allocation87_spill] sm:$0xff] }
 0x26d   :  { %8013 = vst [vmem:[#allocation201_spill] sm:$0xff] %v5742_v62  ;;  %8018 = vst [vmem:[#allocation59_spill] sm:$0xff] %v5750_v45  ;;  %v5762_v20 = vmul.f32 %v5236_v18, %v8023_v58  ;;  %v5774_v46 = vmul.f32 %v5262_v43, %v4948_v57  ;;  %v8025_v16 = vld [vmem:[#allocation189_spill] sm:$0xff]  ;;  %v5782_v18 = vmul.f32 %v8027_v25, %v8026_v36  ;;  %v8028_v27 = vld [vmem:[#allocation155_spill] sm:$0xff] }
 0x26e   :  { %8016 = vst [vmem:[#allocation115_spill] sm:$0xff] %v5746_v63  ;;  %8020 = vst [vmem:[#allocation180_spill] sm:$0xff] %v5754_v3  ;;  %v5778_v21 = vmul.f32 %v5266_v10, %v8025_v16  ;;  %v5786_v50 = vmul.f32 %v5274_v8, %v8028_v27  ;;  %v8029_v9 = vld [vmem:[#allocation14_spill] sm:$0xff]  ;;  %v8030_v0 = vld [vmem:[#allocation141_spill] sm:$0xff] }
 0x26f   :  { %8022 = vst [vmem:[#allocation38_spill] sm:$0xff] %v5758_v39  ;;  %8024 = vst [vmem:[#allocation118_spill] sm:$0xff] %v5762_v20  ;;  %v5790_v44 = vmul.f32 %v8030_v0, %v8029_v9  ;;  %v8031_v23 = vld [vmem:[#allocation191_spill] sm:$0xff]  ;;  %v8032_v58 = vld [vmem:[#allocation117_spill] sm:$0xff] }
 0x270   :  { %v5794_v57 = vmul.f32 %v8032_v58, %v8031_v23  ;;  %v8033_v43 = vld [vmem:[#allocation192_spill] sm:$0xff]  ;;  %v8036_v20 = vld [vmem:[#allocation67_spill] sm:$0xff]  ;;  %v8038_v25 = vld [vmem:[#allocation33_spill] sm:$0xff] }
 0x271   :  { %v5798_v10 = vmul.f32 %v5286_v47, %v8033_v43  ;;  %v8035_v16 = vld [vmem:[#allocation24_spill] sm:$0xff]  ;;  %v8039_v39 = vld [vmem:[#allocation74_spill] sm:$0xff]  ;;  %v8044_v3 = vld [vmem:[#allocation81_spill] sm:$0xff] }
 0x272   :  { %v5802_v36 = vmul.f32 %v8036_v20, %v8035_v16  ;;  %v5806_v8 = vmul.f32 %v8039_v39, %v8038_v25  ;;  %v8041_v27 = vld [vmem:[#allocation52_spill] sm:$0xff]  ;;  %v8043_v0 = vld [vmem:[#allocation194_spill] sm:$0xff]  ;;  %v8049_v43 = vld [vmem:[#allocation195_spill] sm:$0xff] }
 0x273   :  { %8034 = vst [vmem:[#allocation206_spill] sm:$0xff] %v5798_v10  ;;  %v5810_v9 = vmul.f32 %v5298_v15, %v8041_v27  ;;  %v5814_v23 = vmul.f32 %v8044_v3, %v8043_v0  ;;  %v8046_v58 = vld [vmem:[#allocation156_spill] sm:$0xff]  ;;  %v8047_v45 = vld [vmem:[#allocation138_spill] sm:$0xff]  ;;  %v5822_v20 = vmul.f32 %v5310_v19, %v8049_v43  ;;  %v8056_v27 = vld [vmem:[#allocation157_spill] sm:$0xff] }
 0x274   :  { %8037 = vst [vmem:[#allocation119_spill] sm:$0xff] %v5802_v36  ;;  %8040 = vst [vmem:[#allocation160_spill] sm:$0xff] %v5806_v8  ;;  %v5818_v47 = vmul.f32 %v8047_v45, %v8046_v58  ;;  %v8051_v16 = vld [vmem:[#allocation26_spill] sm:$0xff]  ;;  %v8052_v63 = vld [vmem:[#allocation168_spill] sm:$0xff]  ;;  %v5834_v3 = vmul.f32 %v5322_v61, %v8056_v27 }
 0x275   :  { %8042 = vst [vmem:[#allocation181_spill] sm:$0xff] %v5810_v9  ;;  %8045 = vst [vmem:[#allocation209_spill] sm:$0xff] %v5814_v23  ;;  %v5826_v39 = vmul.f32 %v8052_v63, %v8051_v16  ;;  %v8054_v25 = vld [vmem:[#allocation196_spill] sm:$0xff]  ;;  %v8055_v8 = vld [vmem:[#allocation99_spill] sm:$0xff] }
 0x276   :  { %8048 = vst [vmem:[#allocation121_spill] sm:$0xff] %v5818_v47  ;;  %8050 = vst [vmem:[#allocation96_spill] sm:$0xff] %v5822_v20  ;;  %v5830_v15 = vmul.f32 %v8055_v8, %v8054_v25  ;;  %v8057_v0 = vld [vmem:[#allocation197_spill] sm:$0xff]  ;;  %v8058_v23 = vld [vmem:[#allocation60_spill] sm:$0xff] }
 0x277   :  { %8053 = vst [vmem:[#allocation182_spill] sm:$0xff] %v5826_v39  ;;  %v5838_v45 = vmul.f32 %v8058_v23, %v8057_v0  ;;  %v8059_v58 = vld [vmem:[#allocation17_spill] sm:$0xff]  ;;  %v8060_v47 = vld [vmem:[#allocation23_spill] sm:$0xff]  ;;  %v8061_v43 = vld [vmem:[#allocation56_spill] sm:$0xff] }
 0x278   :  { %v5842_v19 = vmul.f32 %v8060_v47, %v8059_v58  ;;  %v5846_v63 = vmul.f32 %v5334_v28, %v8061_v43  ;;  %v8062_v16 = vld [vmem:[#allocation28_spill] sm:$0xff]  ;;  %v8064_v25 = vld [vmem:[#allocation199_spill] sm:$0xff]  ;;  %v8067_v0 = vld [vmem:[#allocation37_spill] sm:$0xff] }
 0x279   :  { %v8063_v39 = vld [vmem:[#allocation20_spill] sm:$0xff]  ;;  %v8065_v20 = vld [vmem:[#allocation103_spill] sm:$0xff]  ;;  %v8071_v62 = vld [vmem:[#allocation89_spill] sm:$0xff] }
 0x27a   :  { %v5850_v8 = vmul.f32 %v8063_v39, %v8062_v16  ;;  %v5854_v61 = vmul.f32 %v8065_v20, %v8064_v25  ;;  %v8066_v27 = vld [vmem:[#allocation200_spill] sm:$0xff]  ;;  %v8070_v58 = vld [vmem:[#allocation135_spill] sm:$0xff]  ;;  %v8073_v43 = vld [vmem:[#allocation158_spill] sm:$0xff] }
 0x27b   :  { %v5858_v23 = vmul.f32 %v5346_v52, %v8066_v27  ;;  %v8068_v9 = vld [vmem:[#allocation40_spill] sm:$0xff]  ;;  %v5866_v28 = vmul.f32 %v8071_v62, %v8070_v58  ;;  %v5870_v39 = vmul.f32 %v5358_v29, %v8073_v43  ;;  %v8074_v16 = vld [vmem:[#allocation202_spill] sm:$0xff]  ;;  %v8078_v10 = vld [vmem:[#allocation171_spill] sm:$0xff] }
 0x27c   :  { %v5862_v47 = vmul.f32 %v8068_v9, %v8067_v0  ;;  %v8075_v36 = vld [vmem:[#allocation142_spill] sm:$0xff]  ;;  %v8077_v25 = vld [vmem:[#allocation36_spill] sm:$0xff]  ;;  %v8080_v27 = vld [vmem:[#allocation203_spill] sm:$0xff] }
 0x27d   :  { %8072 = vst [vmem:[#allocation123_spill] sm:$0xff] %v5866_v28  ;;  %v5874_v20 = vmul.f32 %v8075_v36, %v8074_v16  ;;  %v5878_v52 = vmul.f32 %v8078_v10, %v8077_v25  ;;  %v5882_v9 = vmul.f32 %v5370_v60, %v8080_v27  ;;  %v8081_v0 = vld [vmem:[#allocation22_spill] sm:$0xff]  ;;  %v8084_v58 = vld [vmem:[#allocation204_spill] sm:$0xff]  ;;  %v8085_v28 = vld [vmem:[#allocation69_spill] sm:$0xff] }
 0x27e   :  { %8069 = vst [vmem:[#allocation39_spill] sm:$0xff] %v5862_v47  ;;  %v8082_v47 = vld [vmem:[#allocation122_spill] sm:$0xff]  ;;  %v5890_v29 = vmul.f32 %v8085_v28, %v8084_v58  ;;  %v8087_v43 = vld [vmem:[#allocation136_spill] sm:$0xff]  ;;  %v8088_v16 = vld [vmem:[#allocation205_spill] sm:$0xff] }
 0x27f   :  { %8076 = vst [vmem:[#allocation64_spill] sm:$0xff] %v5874_v20  ;;  %8079 = vst [vmem:[#allocation124_spill] sm:$0xff] %v5878_v52  ;;  %v5886_v62 = vmul.f32 %v8082_v47, %v8081_v0  ;;  %v5894_v36 = vmul.f32 %v5382_v33, %v8087_v43  ;;  %v8089_v20 = vld [vmem:[#allocation75_spill] sm:$0xff]  ;;  %v8092_v52 = vld [vmem:[#allocation174_spill] sm:$0xff] }
 0x280   :  { %8086 = vst [vmem:[#allocation183_spill] sm:$0xff] %v5890_v29  ;;  %v5898_v10 = vmul.f32 %v8089_v20, %v8088_v16  ;;  %v8091_v25 = vld [vmem:[#allocation159_spill] sm:$0xff]  ;;  %v8094_v27 = vld [vmem:[#allocation18_spill] sm:$0xff]  ;;  %v8095_v0 = vld [vmem:[#allocation137_spill] sm:$0xff] }
 0x281   :  { %8083 = vst [vmem:[#allocation41_spill] sm:$0xff] %v5886_v62  ;;  %v5902_v60 = vmul.f32 %v8092_v52, %v8091_v25  ;;  %v5906_v47 = vmul.f32 %v5394_v1, %v8094_v27  ;;  %v8096_v62 = vld [vmem:[#allocation82_spill] sm:$0xff]  ;;  %v8098_v58 = vld [vmem:[#allocation207_spill] sm:$0xff]  ;;  %v8101_v43 = vld [vmem:[#allocation208_spill] sm:$0xff] }
 0x282   :  { %8090 = vst [vmem:[#allocation68_spill] sm:$0xff] %v5898_v10  ;;  %v5910_v28 = vmul.f32 %v8096_v62, %v8095_v0  ;;  %v8099_v29 = vld [vmem:[#allocation90_spill] sm:$0xff]  ;;  %v5918_v20 = vmul.f32 %v5406_v31, %v8101_v43  ;;  %v8103_v16 = vld [vmem:[#allocation108_spill] sm:$0xff]  ;;  %v8104_v10 = vld [vmem:[#allocation97_spill] sm:$0xff] }
 0x283   :  { %8093 = vst [vmem:[#allocation125_spill] sm:$0xff] %v5902_v60  ;;  %v5914_v33 = vmul.f32 %v8099_v29, %v8098_v58  ;;  %v5922_v52 = vmul.f32 %v8104_v10, %v8103_v16  ;;  %v8106_v25 = vld [vmem:[#allocation21_spill] sm:$0xff]  ;;  %v8107_v60 = vld [vmem:[#allocation144_spill] sm:$0xff]  ;;  %v8109_v27 = vld [vmem:[#allocation62_spill] sm:$0xff] }
 0x284   :  { %8097 = vst [vmem:[#allocation104_spill] sm:$0xff] %v5910_v28  ;;  %8102 = vst [vmem:[#allocation42_spill] sm:$0xff] %v5918_v20  ;;  %v5926_v1 = vmul.f32 %v8107_v60, %v8106_v25  ;;  %v5930_v62 = vmul.f32 %v5418_v54, %v8109_v27  ;;  %v8111_v0 = vld [vmem:[#allocation210_spill] sm:$0xff]  ;;  %v8112_v28 = vld [vmem:[#allocation61_spill] sm:$0xff] }
 0x285   :  { %8100 = vst [vmem:[#allocation149_spill] sm:$0xff] %v5914_v33  ;;  %8105 = vst [vmem:[#allocation127_spill] sm:$0xff] %v5922_v52  ;;  %v5934_v29 = vmul.f32 %v8112_v28, %v8111_v0  ;;  %v8114_v58 = vld [vmem:[#allocation84_spill] sm:$0xff]  ;;  %v8115_v33 = vld [vmem:[#allocation133_spill] sm:$0xff] }
 0x286   :  { %8108 = vst [vmem:[#allocation50_spill] sm:$0xff] %v5926_v1  ;;  %8110 = vst [vmem:[#allocation185_spill] sm:$0xff] %v5930_v62  ;;  %v5938_v31 = vmul.f32 %v8115_v33, %v8114_v58  ;;  %v8117_v43 = vld [vmem:[#allocation211_spill] sm:$0xff]  ;;  %v8120_v52 = vld [vmem:[#allocation16_spill] sm:$0xff] }
 0x287   :  { %8113 = vst [vmem:[#allocation161_spill] sm:$0xff] %v5934_v29  ;;  %v5942_v10 = vmul.f32 %v5430_v40, %v8117_v43  ;;  %v8119_v16 = vld [vmem:[#allocation55_spill] sm:$0xff]  ;;  %v8122_v25 = vld [vmem:[#allocation212_spill] sm:$0xff]  ;;  %v8123_v1 = vld [vmem:[#allocation105_spill] sm:$0xff] }
 0x288   :  { %8116 = vst [vmem:[#allocation150_spill] sm:$0xff] %v5938_v31  ;;  %v5946_v60 = vmul.f32 %v8120_v52, %v8119_v16  ;;  %v5950_v54 = vmul.f32 %v8123_v1, %v8122_v25  ;;  %v8125_v27 = vld [vmem:[#allocation43_spill] sm:$0xff]  ;;  %v8129_v58 = vld [vmem:[#allocation25_spill] sm:$0xff]  ;;  %v8131_v43 = vld [vmem:[#allocation76_spill] sm:$0xff] }
 0x289   :  { %8118 = vst [vmem:[#allocation163_spill] sm:$0xff] %v5942_v10  ;;  %v5954_v28 = vmul.f32 %v5442_v2, %v8125_v27  ;;  %v8127_v0 = vld [vmem:[#allocation47_spill] sm:$0xff]  ;;  %v5966_v52 = vmul.f32 %v5454_v42, %v8131_v43  ;;  %v8132_v16 = vld [vmem:[#allocation100_spill] sm:$0xff]  ;;  %v8136_v27 = vld [vmem:[#allocation49_spill] sm:$0xff] }
 0x28a   :  { %8121 = vst [vmem:[#allocation186_spill] sm:$0xff] %v5946_v60  ;;  %8124 = vst [vmem:[#allocation165_spill] sm:$0xff] %v5950_v54  ;;  %v8128_v29 = vld [vmem:[#allocation51_spill] sm:$0xff]  ;;  %v8133_v60 = vld [vmem:[#allocation169_spill] sm:$0xff] }
 0x28b   :  { %8126 = vst [vmem:[#allocation151_spill] sm:$0xff] %v5954_v28  ;;  %v5958_v33 = vmul.f32 %v8128_v29, %v8127_v0  ;;  %v8130_v31 = vld [vmem:[#allocation139_spill] sm:$0xff]  ;;  %v5970_v1 = vmul.f32 %v8133_v60, %v8132_v16  ;;  %v8134_v25 = vld [vmem:[#allocation44_spill] sm:$0xff]  ;;  %v5978_v29 = vmul.f32 %v5466_v13, %v8136_v27  ;;  %v8137_v0 = vld [vmem:[#allocation53_spill] sm:$0xff] }
 0x28c   :  { %v5962_v40 = vmul.f32 %v8130_v31, %v8129_v58  ;;  %v8135_v54 = vld [vmem:[#allocation172_spill] sm:$0xff]  ;;  %v8138_v28 = vld [vmem:[#allocation126_spill] sm:$0xff]  ;;  %v8140_v58 = vld [vmem:[#allocation29_spill] sm:$0xff] }
 0x28d   :  { %v5974_v2 = vmul.f32 %v8135_v54, %v8134_v25  ;;  %v5982_v31 = vmul.f32 %v8138_v28, %v8137_v0  ;;  %v8141_v10 = vld [vmem:[#allocation70_spill] sm:$0xff]  ;;  %v8143_v43 = vld [vmem:[#allocation80_spill] sm:$0xff]  ;;  %v8146_v62 = vld [vmem:[#allocation77_spill] sm:$0xff] }
 0x28e   :  { %v5986_v42 = vmul.f32 %v8141_v10, %v8140_v58  ;;  %v5990_v60 = vmul.f32 %v5478_v11, %v8143_v43  ;;  %v8145_v16 = vld [vmem:[#allocation92_spill] sm:$0xff]  ;;  %v8148_v25 = vld [vmem:[#allocation213_spill] sm:$0xff]  ;;  %v8149_v20 = vld [vmem:[#allocation83_spill] sm:$0xff] }
 0x28f   :  { %8139 = vst [vmem:[#allocation65_spill] sm:$0xff] %v5982_v31  ;;  %v5994_v54 = vmul.f32 %v8146_v62, %v8145_v16  ;;  %v5998_v13 = vmul.f32 %v8149_v20, %v8148_v25  ;;  %v8151_v27 = vld [vmem:[#allocation214_spill] sm:$0xff]  ;;  %v8153_v0 = vld [vmem:[#allocation48_spill] sm:$0xff]  ;;  %v8154_v31 = vld [vmem:[#allocation91_spill] sm:$0xff] }
 0x290   :  { %8142 = vst [vmem:[#allocation107_spill] sm:$0xff] %v5986_v42  ;;  %8144 = vst [vmem:[#allocation187_spill] sm:$0xff] %v5990_v60  ;;  %v6002_v28 = vmul.f32 %v5490_v24, %v8151_v27  ;;  %v6006_v10 = vmul.f32 %v8154_v31, %v8153_v0  ;;  %v8156_v58 = vld [vmem:[#allocation215_spill] sm:$0xff]  ;;  %v8157_v42 = vld [vmem:[#allocation98_spill] sm:$0xff] }
 0x291   :  { %8147 = vst [vmem:[#allocation152_spill] sm:$0xff] %v5994_v54  ;;  %8150 = vst [vmem:[#allocation153_spill] sm:$0xff] %v5998_v13  ;;  %v6010_v11 = vmul.f32 %v8157_v42, %v8156_v58  ;;  %v8159_v43 = vld [vmem:[#allocation216_spill] sm:$0xff]  ;;  %v8161_v16 = vld [vmem:[#allocation46_spill] sm:$0xff] }
 0x292   :  { %8152 = vst [vmem:[#allocation189_spill] sm:$0xff] %v6002_v28  ;;  %8155 = vst [vmem:[#allocation154_spill] sm:$0xff] %v6006_v10  ;;  %v6014_v62 = vmul.f32 %v5502_v34, %v8159_v43  ;;  %v8162_v54 = vld [vmem:[#allocation102_spill] sm:$0xff]  ;;  %v8164_v25 = vld [vmem:[#allocation217_spill] sm:$0xff] }
 0x293   :  { %8158 = vst [vmem:[#allocation87_spill] sm:$0xff] %v6010_v11  ;;  %v6018_v20 = vmul.f32 %v8162_v54, %v8161_v16  ;;  %v8165_v13 = vld [vmem:[#allocation63_spill] sm:$0xff]  ;;  %v8166_v27 = vld [vmem:[#allocation218_spill] sm:$0xff]  ;;  %v8171_v43 = vld [vmem:[#allocation220_spill] sm:$0xff] }
 0x294   :  { %8160 = vst [vmem:[#allocation155_spill] sm:$0xff] %v6014_v62  ;;  %v6022_v24 = vmul.f32 %v8165_v13, %v8164_v25  ;;  %v6026_v31 = vmul.f32 %v5514_v4, %v8166_v27  ;;  %v8167_v0 = vld [vmem:[#allocation54_spill] sm:$0xff]  ;;  %v8169_v58 = vld [vmem:[#allocation219_spill] sm:$0xff]  ;;  %v6038_v54 = vmul.f32 %v5526_v32, %v8171_v43  ;;  %v8173_v25 = vld [vmem:[#allocation221_spill] sm:$0xff] }
 0x295   :  { %8163 = vst [vmem:[#allocation14_spill] sm:$0xff] %v6018_v20  ;;  %v8168_v10 = vld [vmem:[#allocation34_spill] sm:$0xff]  ;;  %v8174_v20 = vld [vmem:[#allocation88_spill] sm:$0xff]  ;;  %v8201_v62 = vld [vmem:[#allocation145_spill] sm:$0xff] }
 0x296   :  { %v6030_v42 = vmul.f32 %v8168_v10, %v8167_v0  ;;  %v8170_v11 = vld [vmem:[#allocation30_spill] sm:$0xff]  ;;  %v6046_v4 = vmul.f32 %v8174_v20, %v8173_v25  ;;  %v8176_v0 = vld [vmem:[#allocation164_spill] sm:$0xff]  ;;  %v8184_v25 = vld [vmem:[#allocation101_spill] sm:$0xff] }
 0x297   :  { %v6034_v34 = vmul.f32 %v8170_v11, %v8169_v58  ;;  %v8172_v16 = vld [vmem:[#allocation162_spill] sm:$0xff]  ;;  %v6054_v11 = vmul.f32 %v5542_v37, %v8176_v0  ;;  %v8178_v58 = vld [vmem:[#allocation223_spill] sm:$0xff]  ;;  %v8180_v43 = vld [vmem:[#allocation224_spill] sm:$0xff] }
 0x298   :  { %v6042_v13 = vmul.f32 %v5530_v53, %v8172_v16  ;;  %v8175_v27 = vld [vmem:[#allocation222_spill] sm:$0xff]  ;;  %v6058_v32 = vmul.f32 %v5546_v30, %v8178_v58  ;;  %v6062_v53 = vmul.f32 %v5550_v56, %v8180_v43  ;;  %v8182_v16 = vld [vmem:[#allocation112_spill] sm:$0xff]  ;;  %v8215_v28 = vld [vmem:[#allocation93_spill] sm:$0xff] }
 0x299   :  { %v6050_v10 = vmul.f32 %v5538_v7, %v8175_v27  ;;  %8177 = vst [vmem:[#allocation141_spill] sm:$0xff] %v6054_v11  ;;  %v6066_v20 = vmul.f32 %v5554_v55, %v8182_v16  ;;  %v6070_v7 = vmul.f32 %v5558_v26, %v8184_v25  ;;  %v8186_v27 = vld [vmem:[#allocation57_spill] sm:$0xff]  ;;  %v8188_v0 = vld [vmem:[#allocation146_spill] sm:$0xff]  ;;  %v8190_v58 = vld [vmem:[#allocation116_spill] sm:$0xff] }
 0x29a   :  { %8179 = vst [vmem:[#allocation191_spill] sm:$0xff] %v6058_v32  ;;  %8181 = vst [vmem:[#allocation117_spill] sm:$0xff] %v6062_v53  ;;  %v6074_v37 = vmul.f32 %v5562_v51, %v8186_v27  ;;  %v6078_v30 = vmul.f32 %v5566_v17, %v8188_v0  ;;  %v6082_v56 = vmul.f32 %v5570_v12, %v8190_v58  ;;  %v8192_v43 = vld [vmem:[#allocation120_spill] sm:$0xff]  ;;  %v8193_v16 = vld [vmem:[#allocation130_spill] sm:$0xff] }
 0x29b   :  { %8183 = vst [vmem:[#allocation192_spill] sm:$0xff] %v6066_v20  ;;  %8185 = vst [vmem:[#allocation24_spill] sm:$0xff] %v6070_v7  ;;  %v6086_v55 = vmul.f32 %v5574_v22, %v8192_v43  ;;  %v6090_v26 = vmul.f32 %v5578_v35, %v8193_v16  ;;  %v8194_v25 = vld [vmem:[#allocation27_spill] sm:$0xff]  ;;  %v8196_v0 = vld [vmem:[#allocation85_spill] sm:$0xff] }
 0x29c   :  { %8187 = vst [vmem:[#allocation67_spill] sm:$0xff] %v6074_v37  ;;  %8189 = vst [vmem:[#allocation33_spill] sm:$0xff] %v6078_v30  ;;  %v6094_v51 = vmul.f32 %v5582_v59, %v8194_v25  ;;  %v8195_v27 = vld [vmem:[#allocation35_spill] sm:$0xff]  ;;  %v8197_v30 = vld [vmem:[#allocation166_spill] sm:$0xff] }
 0x29d   :  { %8191 = vst [vmem:[#allocation74_spill] sm:$0xff] %v6082_v56  ;;  %v6098_v17 = vmul.f32 %v5586_v5, %v8195_v27  ;;  %v6102_v12 = vmul.f32 %v8197_v30, %v8196_v0  ;;  %v8198_v58 = vld [vmem:[#allocation94_spill] sm:$0xff]  ;;  %v8200_v43 = vld [vmem:[#allocation111_spill] sm:$0xff]  ;;  %v8203_v37 = vld [vmem:[#allocation128_spill] sm:$0xff] }
 0x29e   :  { %v8199_v56 = vld [vmem:[#allocation170_spill] sm:$0xff]  ;;  %v6110_v35 = vmul.f32 %v8201_v62, %v8200_v43  ;;  %v8205_v25 = vld [vmem:[#allocation73_spill] sm:$0xff]  ;;  %v8206_v7 = vld [vmem:[#allocation71_spill] sm:$0xff] }
 0x29f   :  { %v6106_v22 = vmul.f32 %v8199_v56, %v8198_v58  ;;  %v8202_v16 = vld [vmem:[#allocation66_spill] sm:$0xff]  ;;  %v6118_v5 = vmul.f32 %v8206_v7, %v8205_v25  ;;  %v8208_v27 = vld [vmem:[#allocation79_spill] sm:$0xff]  ;;  %v8212_v53 = vld [vmem:[#allocation45_spill] sm:$0xff] }
 0x2a0   :  { %v6114_v59 = vmul.f32 %v8203_v37, %v8202_v16  ;;  %v8209_v20 = vld [vmem:[#allocation78_spill] sm:$0xff]  ;;  %v8214_v58 = vld [vmem:[#allocation167_spill] sm:$0xff]  ;;  %v8218_v16 = vld [vmem:[#allocation132_spill] sm:$0xff] }
 0x2a1   :  { %8207 = vst [vmem:[#allocation194_spill] sm:$0xff] %v6118_v5  ;;  %v6122_v30 = vmul.f32 %v8209_v20, %v8208_v27  ;;  %v8211_v0 = vld [vmem:[#allocation86_spill] sm:$0xff]  ;;  %v6130_v62 = vmul.f32 %v8215_v28, %v8214_v58  ;;  %v8217_v32 = vld [vmem:[#allocation143_spill] sm:$0xff]  ;;  %v8219_v11 = vld [vmem:[#allocation173_spill] sm:$0xff] }
 0x2a2   :  { %8204 = vst [vmem:[#allocation52_spill] sm:$0xff] %v6114_v59  ;;  %v6126_v56 = vmul.f32 %v8212_v53, %v8211_v0  ;;  %v8216_v43 = vld [vmem:[#allocation58_spill] sm:$0xff]  ;;  %v6138_v7 = vmul.f32 %v8219_v11, %v8218_v16  ;;  %v8221_v25 = vld [vmem:[#allocation140_spill] sm:$0xff]  ;;  %v8222_v5 = vld [vmem:[#allocation129_spill] sm:$0xff]  ;;  %v2048_v11 = vadd.f32 %v5838_v45, %v5830_v15 }
 0x2a3   :  { %8210 = vst [vmem:[#allocation81_spill] sm:$0xff] %v6122_v30  ;;  %v6134_v37 = vmul.f32 %v8217_v32, %v8216_v43  ;;  %v1970_v20 = vadd.f32 %v8222_v5, %v8221_v25  ;;  %v8223_v27 = vld [vmem:[#allocation175_spill] sm:$0xff]  ;;  %v8225_v53 = vld [vmem:[#allocation134_spill] sm:$0xff]  ;;  %v8227_v60 = vld [vmem:[#allocation113_spill] sm:$0xff]  ;;  %v2022_v32 = vadd.f32 %v5774_v46, %v5766_v38  ;;  %v2035_v43 = vadd.f32 %v5778_v21, %v5770_v41 }
 0x2a4   :  { %8213 = vst [vmem:[#allocation156_spill] sm:$0xff] %v6126_v56  ;;  %8220 = vst [vmem:[#allocation138_spill] sm:$0xff] %v6138_v7  ;;  %v8224_v30 = vld [vmem:[#allocation147_spill] sm:$0xff]  ;;  %v8226_v0 = vld [vmem:[#allocation198_spill] sm:$0xff]  ;;  %v2049_v41 = vadd.f32 %v2048_v11, %v5846_v63 }
 0x2a5   :  { %v1983_v59 = vadd.f32 %v8224_v30, %v8223_v27  ;;  %v1996_v56 = vadd.f32 %v8226_v0, %v8225_v53  ;;  %v8228_v28 = vld [vmem:[#allocation114_spill] sm:$0xff]  ;;  %v8229_v16 = vld [vmem:[#allocation188_spill] sm:$0xff]  ;;  %v8231_v30 = vld [vmem:[#allocation19_spill] sm:$0xff]  ;;  %v2061_v53 = vadd.f32 %v5842_v19, %v5834_v3  ;;  %v2036_v38 = vadd.f32 %v2035_v43, %v5786_v50 }
 0x2a6   :  { %v2009_v58 = vadd.f32 %v8228_v28, %v8227_v60  ;;  %v1971_v5 = vadd.f32 %v1970_v20, %v8229_v16  ;;  %v8230_v25 = vld [vmem:[#allocation176_spill] sm:$0xff]  ;;  %v8232_v0 = vld [vmem:[#allocation179_spill] sm:$0xff]  ;;  %v2023_v28 = vadd.f32 %v2022_v32, %v5782_v18  ;;  %v2050_v18 = vadd.f32 %v2049_v41, %v5854_v61  ;;  %v8236_v32 = vld [vmem:[#allocation109_spill] sm:$0xff] }
 0x2a7   :  { %v1984_v7 = vadd.f32 %v1983_v59, %v8230_v25  ;;  %v1997_v27 = vadd.f32 %v1996_v56, %v8231_v30  ;;  %v8233_v46 = vld [vmem:[#allocation131_spill] sm:$0xff]  ;;  %v8234_v15 = vld [vmem:[#allocation148_spill] sm:$0xff]  ;;  %v2062_v59 = vadd.f32 %v2061_v53, %v5850_v8  ;;  %v2037_v19 = vadd.f32 %v2036_v38, %v5794_v57  ;;  %v8237_v11 = vld [vmem:[#allocation206_spill] sm:$0xff] }
 0x2a8   :  { %v2010_v60 = vadd.f32 %v2009_v58, %v8232_v0  ;;  %v1972_v21 = vadd.f32 %v1971_v5, %v8233_v46  ;;  %v2024_v3 = vadd.f32 %v2023_v28, %v5790_v44  ;;  %v8235_v58 = vld [vmem:[#allocation190_spill] sm:$0xff]  ;;  %v8238_v16 = vld [vmem:[#allocation119_spill] sm:$0xff]  ;;  %v8240_v25 = vld [vmem:[#allocation32_spill] sm:$0xff] }
 0x2a9   :  { %v1985_v45 = vadd.f32 %v1984_v7, %v8234_v15  ;;  %v1998_v20 = vadd.f32 %v1997_v27, %v5726_v48  ;;  %v2063_v7 = vadd.f32 %v2062_v59, %v5858_v23  ;;  %v8239_v5 = vld [vmem:[#allocation39_spill] sm:$0xff]  ;;  %v8241_v30 = vld [vmem:[#allocation177_spill] sm:$0xff]  ;;  %v8245_v38 = vld [vmem:[#allocation160_spill] sm:$0xff] }
 0x2aa   :  { %v2011_v56 = vadd.f32 %v2010_v60, %v5730_v6  ;;  %v1973_v50 = vadd.f32 %v1972_v21, %v8235_v58  ;;  %v2025_v8 = vadd.f32 %v2024_v3, %v8237_v11  ;;  %v2038_v6 = vadd.f32 %v2037_v19, %v8238_v16  ;;  %v8242_v27 = vld [vmem:[#allocation201_spill] sm:$0xff]  ;;  %v8243_v0 = vld [vmem:[#allocation123_spill] sm:$0xff]  ;;  %v8250_v3 = vld [vmem:[#allocation64_spill] sm:$0xff] }
 0x2ab   :  { %v1986_v63 = vadd.f32 %v1985_v45, %v8236_v32  ;;  %v1999_v43 = vadd.f32 %v1998_v20, %v5734_v14  ;;  %v2051_v44 = vadd.f32 %v2050_v18, %v8239_v5  ;;  %v2064_v60 = vadd.f32 %v2063_v7, %v8243_v0  ;;  %v8244_v28 = vld [vmem:[#allocation115_spill] sm:$0xff]  ;;  %v8246_v41 = vld [vmem:[#allocation181_spill] sm:$0xff]  ;;  %v8248_v45 = vld [vmem:[#allocation110_spill] sm:$0xff] }
 0x2ac   :  { %v2012_v48 = vadd.f32 %v2011_v56, %v5738_v49  ;;  %v1974_v57 = vadd.f32 %v1973_v50, %v8240_v25  ;;  %v2026_v23 = vadd.f32 %v2025_v8, %v8245_v38  ;;  %v2039_v49 = vadd.f32 %v2038_v6, %v8246_v41  ;;  %v8247_v21 = vld [vmem:[#allocation193_spill] sm:$0xff]  ;;  %v8249_v59 = vld [vmem:[#allocation59_spill] sm:$0xff]  ;;  %v8251_v18 = vld [vmem:[#allocation180_spill] sm:$0xff] }
 0x2ad   :  { %v1987_v61 = vadd.f32 %v1986_v63, %v8241_v30  ;;  %v2000_v53 = vadd.f32 %v1999_v43, %v8242_v27  ;;  %v2052_v46 = vadd.f32 %v2051_v44, %v5870_v39  ;;  %v2065_v19 = vadd.f32 %v2064_v60, %v8250_v3  ;;  %v8252_v50 = vld [vmem:[#allocation209_spill] sm:$0xff]  ;;  %v8254_v7 = vld [vmem:[#allocation124_spill] sm:$0xff]  ;;  %v8255_v11 = vld [vmem:[#allocation15_spill] sm:$0xff] }
 0x2ae   :  { %v2013_v14 = vadd.f32 %v2012_v48, %v8244_v28  ;;  %v1975_v15 = vadd.f32 %v1974_v57, %v8247_v21  ;;  %v2027_v32 = vadd.f32 %v2026_v23, %v8252_v50  ;;  %v8253_v63 = vld [vmem:[#allocation121_spill] sm:$0xff]  ;;  %v8256_v16 = vld [vmem:[#allocation178_spill] sm:$0xff]  ;;  %v8259_v30 = vld [vmem:[#allocation96_spill] sm:$0xff] }
 0x2af   :  { %v1988_v20 = vadd.f32 %v1987_v61, %v8248_v45  ;;  %v2001_v56 = vadd.f32 %v2000_v53, %v8249_v59  ;;  %v2040_v43 = vadd.f32 %v2039_v49, %v8253_v63  ;;  %v2053_v48 = vadd.f32 %v2052_v46, %v8254_v7  ;;  %v8257_v6 = vld [vmem:[#allocation38_spill] sm:$0xff]  ;;  %v8261_v0 = vld [vmem:[#allocation41_spill] sm:$0xff]  ;;  %v8262_v23 = vld [vmem:[#allocation183_spill] sm:$0xff] }
 0x2b0   :  { %v2014_v58 = vadd.f32 %v2013_v14, %v8251_v18  ;;  %v1976_v8 = vadd.f32 %v1975_v15, %v8255_v11  ;;  %v2066_v44 = vadd.f32 %v2065_v19, %v5882_v9  ;;  %v8258_v25 = vld [vmem:[#allocation118_spill] sm:$0xff]  ;;  %v2028_v61 = vadd.f32 %v2027_v32, %v8259_v30 }
 0x2b1   :  { %v1989_v39 = vadd.f32 %v1988_v20, %v8256_v16  ;;  %v2002_v5 = vadd.f32 %v2001_v56, %v8257_v6  ;;  %v8260_v27 = vld [vmem:[#allocation182_spill] sm:$0xff]  ;;  %v2054_v60 = vadd.f32 %v2053_v48, %v8261_v0  ;;  %v8263_v0 = vld [vmem:[#allocation31_spill] sm:$0xff] }
 0x2b2   :  { %v2015_v57 = vadd.f32 %v2014_v58, %v8258_v25  ;;  %v2041_v53 = vadd.f32 %v2040_v43, %v8260_v27  ;;  %v1977_v28 = vrot.slane %v1976_v8, 4  ;;  %v2067_v41 = vadd.f32 %v2066_v44, %v8262_v23 }
 0x2b3   :  { %v1990_v14 = vrot.slane %v1989_v39, 4  ;;  %v2003_v38 = vrot.slane %v2002_v5, 4  ;;  %v2029_v46 = vrot.slane %v2028_v61, 4  ;;  %v2055_v15 = vrot.slane %v2054_v60, 4 }
 0x2b4   :  { %v2016_v49 = vrot.slane %v2015_v57, 4  ;;  %v2042_v21 = vrot.slane %v2041_v53, 4  ;;  %v1978_v45 = vadd.f32 %v1977_v28, %v1976_v8  ;;  %v2068_v59 = vrot.slane %v2067_v41, 4 }
 0x2b5   :  { %v1991_v20 = vadd.f32 %v1990_v14, %v1989_v39  ;;  %v2004_v9 = vadd.f32 %v2003_v38, %v2002_v5  ;;  %v2030_v3 = vadd.f32 %v2029_v46, %v2028_v61  ;;  %v2056_v18 = vadd.f32 %v2055_v15, %v2054_v60  ;;  %v8264_v60 = vld [vmem:[#allocation106_spill] sm:$0xff] }
 0x2b6   :  { %v2017_v56 = vadd.f32 %v2016_v49, %v2015_v57  ;;  %v2043_v19 = vadd.f32 %v2042_v21, %v2041_v53  ;;  %v1979_v58 = vrot.slane %v1978_v45, 2  ;;  %v2069_v63 = vadd.f32 %v2068_v59, %v2067_v41  ;;  %v8265_v41 = vld [vmem:[#allocation72_spill] sm:$0xff]  ;;  %v8266_v49 = vld [vmem:[#allocation95_spill] sm:$0xff] }
 0x2b7   :  { %v1992_v50 = vrot.slane %v1991_v20, 2  ;;  %v2005_v32 = vrot.slane %v2004_v9, 2  ;;  %v2031_v7 = vrot.slane %v2030_v3, 2  ;;  %v2057_v11 = vrot.slane %v2056_v18, 2 }
 0x2b8   :  { %v2018_v43 = vrot.slane %v2017_v56, 2  ;;  %v2044_v48 = vrot.slane %v2043_v19, 2  ;;  %v1980_v16 = vadd.f32 %v1979_v58, %v1978_v45  ;;  %v2070_v25 = vrot.slane %v2069_v63, 2  ;;  %v8268_v58 = vld [vmem:[#allocation68_spill] sm:$0xff] }
 0x2b9   :  { %v1993_v6 = vadd.f32 %v1992_v50, %v1991_v20  ;;  %v2006_v44 = vadd.f32 %v2005_v32, %v2004_v9  ;;  %v2032_v39 = vadd.f32 %v2031_v7, %v2030_v3  ;;  %v6204_v30 = vadd.f32 %v2057_v11, %v2056_v18  ;;  %v8269_v11 = vld [vmem:[#allocation104_spill] sm:$0xff] }
 0x2ba   :  { %v2019_v8 = vadd.f32 %v2018_v43, %v2017_v56  ;;  %v2045_v5 = vadd.f32 %v2044_v48, %v2043_v19  ;;  %v1981_v57 = vrot.slane %v1980_v16, 1  ;;  %v6206_v53 = vadd.f32 %v2070_v25, %v2069_v63  ;;  %v8267_v19 = vld [vmem:[#allocation125_spill] sm:$0xff] }
 0x2bb   :  { %v1994_v61 = vrot.slane %v1993_v6, 1  ;;  %v2007_v27 = vrot.slane %v2006_v44, 1  ;;  %v6210_v28 = vmul.f32 %v8264_v60, %v8263_v0  ;;  %v2033_v38 = vrot.slane %v2032_v39, 1  ;;  %v8279_v0 = vld [vmem:[#allocation152_spill] sm:$0xff] }
 0x2bc   :  { %v2020_v14 = vrot.slane %v2019_v8, 1  ;;  %v2046_v23 = vrot.slane %v2045_v5, 1  ;;  %v6214_v46 = vmul.f32 %v8266_v49, %v8265_v41  ;;  %v6216_v21 = vadd.f32 %v1981_v57, %v1980_v16  ;;  %v8270_v16 = vld [vmem:[#allocation149_spill] sm:$0xff]  ;;  %v8282_v41 = vld [vmem:[#allocation194_spill] sm:$0xff] }
 0x2bd   :  { %v6218_v15 = vadd.f32 %v1994_v61, %v1993_v6  ;;  %v2059_v45 = vrot.slane %v6204_v30, 1  ;;  %v6221_v20 = vadd.f32 %v2007_v27, %v2006_v44  ;;  %v6225_v59 = vadd.f32 %v2033_v38, %v2032_v39  ;;  %v8276_v39 = vld [vmem:[#allocation185_spill] sm:$0xff]  ;;  %v8278_v61 = vld [vmem:[#allocation52_spill] sm:$0xff]  ;;  %v8281_v38 = vld [vmem:[#allocation191_spill] sm:$0xff] }
 0x2be   :  { %v6223_v9 = vadd.f32 %v2020_v14, %v2019_v8  ;;  %v2072_v56 = vrot.slane %v6206_v53, 1  ;;  %v6228_v3 = vadd.f32 %v2046_v23, %v2045_v5  ;;  %v2074_v18 = vadd.f32 %v8267_v19, %v5894_v36  ;;  %v8277_v5 = vld [vmem:[#allocation187_spill] sm:$0xff]  ;;  %v8280_v14 = vld [vmem:[#allocation141_spill] sm:$0xff]  ;;  %v8284_v19 = vld [vmem:[#allocation150_spill] sm:$0xff] }
 0x2bf   :  { %v2087_v50 = vadd.f32 %v5906_v47, %v8268_v58  ;;  %v2100_v32 = vadd.f32 %v5966_v52, %v5958_v33  ;;  %v2113_v63 = vadd.f32 %v5970_v1, %v5962_v40  ;;  %v2126_v43 = vadd.f32 %v6030_v42, %v6022_v24  ;;  %v8283_v49 = vld [vmem:[#allocation161_spill] sm:$0xff] }
 0x2c0   :  { %v2139_v7 = vadd.f32 %v6034_v34, %v6026_v31  ;;  %v2152_v48 = vadd.f32 %v6094_v51, %v6086_v55  ;;  %v2075_v36 = vadd.f32 %v2074_v18, %v8269_v11  ;;  %v2165_v33 = vadd.f32 %v6098_v17, %v6090_v26  ;;  %v8271_v31 = vld [vmem:[#allocation42_spill] sm:$0xff]  ;;  %v8272_v34 = vld [vmem:[#allocation127_spill] sm:$0xff]  ;;  %v8273_v51 = vld [vmem:[#allocation65_spill] sm:$0xff] }
 0x2c1   :  { %v2088_v6 = vadd.f32 %v2087_v50, %v8270_v16  ;;  %v2101_v47 = vadd.f32 %v2100_v32, %v5974_v2  ;;  %v2114_v40 = vadd.f32 %v2113_v63, %v5978_v29  ;;  %v2127_v52 = vadd.f32 %v2126_v43, %v6038_v54  ;;  %v8274_v2 = vld [vmem:[#allocation107_spill] sm:$0xff]  ;;  %v8275_v17 = vld [vmem:[#allocation50_spill] sm:$0xff]  ;;  %v8285_v18 = vld [vmem:[#allocation153_spill] sm:$0xff] }
 0x2c2   :  { %v2140_v1 = vadd.f32 %v2139_v7, %v6042_v13  ;;  %v2153_v24 = vadd.f32 %v2152_v48, %v6102_v12  ;;  %v2076_v42 = vadd.f32 %v2075_v36, %v8271_v31  ;;  %v2166_v25 = vadd.f32 %v2165_v33, %v6106_v22  ;;  %v8286_v50 = vld [vmem:[#allocation81_spill] sm:$0xff]  ;;  %v8289_v11 = vld [vmem:[#allocation192_spill] sm:$0xff] }
 0x2c3   :  { %v2089_v55 = vadd.f32 %v2088_v6, %v8272_v34  ;;  %v2102_v44 = vadd.f32 %v2101_v47, %v8273_v51  ;;  %v2115_v8 = vadd.f32 %v2114_v40, %v8274_v2  ;;  %v2128_v26 = vadd.f32 %v2127_v52, %v6046_v4  ;;  %v8287_v63 = vld [vmem:[#allocation189_spill] sm:$0xff]  ;;  %v8290_v16 = vld [vmem:[#allocation156_spill] sm:$0xff]  ;;  %v8291_v47 = vld [vmem:[#allocation163_spill] sm:$0xff] }
 0x2c4   :  { %v2141_v29 = vadd.f32 %v2140_v1, %v6050_v10  ;;  %v2154_v54 = vadd.f32 %v2153_v24, %v6110_v35  ;;  %v2077_v13 = vadd.f32 %v2076_v42, %v8275_v17  ;;  %v2167_v27 = vadd.f32 %v2166_v25, %v8278_v61  ;;  %v8288_v7 = vld [vmem:[#allocation117_spill] sm:$0xff]  ;;  %v8292_v40 = vld [vmem:[#allocation186_spill] sm:$0xff]  ;;  %v8294_v42 = vld [vmem:[#allocation87_spill] sm:$0xff] }
 0x2c5   :  { %v2090_v12 = vadd.f32 %v2089_v55, %v8276_v39  ;;  %v2103_v57 = vadd.f32 %v2102_v44, %v8277_v5  ;;  %v2116_v60 = vadd.f32 %v2115_v8, %v8279_v0  ;;  %v2129_v22 = vadd.f32 %v2128_v26, %v8280_v14  ;;  %v8293_v1 = vld [vmem:[#allocation154_spill] sm:$0xff]  ;;  %v8295_v55 = vld [vmem:[#allocation24_spill] sm:$0xff]  ;;  %v8296_v44 = vld [vmem:[#allocation67_spill] sm:$0xff] }
 0x2c6   :  { %v2142_v23 = vadd.f32 %v2141_v29, %v8281_v38  ;;  %v2155_v4 = vadd.f32 %v2154_v54, %v8282_v41  ;;  %v2078_v10 = vadd.f32 %v2077_v13, %v8283_v49  ;;  %v2168_v32 = vadd.f32 %v2167_v27, %v8286_v50  ;;  %v8297_v8 = vld [vmem:[#allocation165_spill] sm:$0xff]  ;;  %v8298_v29 = vld [vmem:[#allocation151_spill] sm:$0xff]  ;;  %v8300_v39 = vld [vmem:[#allocation138_spill] sm:$0xff] }
 0x2c7   :  { %v2091_v35 = vadd.f32 %v2090_v12, %v8284_v19  ;;  %v2104_v58 = vadd.f32 %v2103_v57, %v8285_v18  ;;  %v2117_v43 = vadd.f32 %v2116_v60, %v8287_v63  ;;  %v2130_v48 = vadd.f32 %v2129_v22, %v8288_v7  ;;  %v8299_v17 = vld [vmem:[#allocation155_spill] sm:$0xff]  ;;  %v8301_v5 = vld [vmem:[#allocation14_spill] sm:$0xff]  ;;  %v8302_v61 = vld [vmem:[#allocation33_spill] sm:$0xff] }
 0x2c8   :  { %v2143_v36 = vadd.f32 %v2142_v23, %v8289_v11  ;;  %v2156_v6 = vadd.f32 %v2155_v4, %v8290_v16  ;;  %v2079_v33 = vadd.f32 %v2078_v10, %v8291_v47  ;;  %v2169_v31 = vadd.f32 %v2168_v32, %v6130_v62  ;;  %v8303_v27 = vld [vmem:[#allocation74_spill] sm:$0xff] }
 0x2c9   :  { %v2092_v52 = vadd.f32 %v2091_v35, %v8292_v40  ;;  %v2105_v24 = vadd.f32 %v2104_v58, %v8293_v1  ;;  %v2118_v34 = vadd.f32 %v2117_v43, %v8294_v42  ;;  %v2131_v51 = vadd.f32 %v2130_v48, %v8295_v55 }
 0x2ca   :  { %v2144_v25 = vadd.f32 %v2143_v36, %v8296_v44  ;;  %v2157_v2 = vadd.f32 %v2156_v6, %v6134_v37  ;;  %v2080_v26 = vadd.f32 %v2079_v33, %v8297_v8  ;;  %v2170_v12 = vadd.f32 %v2169_v31, %v8300_v39 }
 0x2cb   :  { %v2093_v54 = vadd.f32 %v2092_v52, %v8298_v29  ;;  %v2106_v13 = vadd.f32 %v2105_v24, %v8299_v17  ;;  %v2119_v57 = vadd.f32 %v2118_v34, %v8301_v5  ;;  %v2132_v62 = vadd.f32 %v2131_v51, %v8302_v61 }
 0x2cc   :  { %v2145_v0 = vadd.f32 %v2144_v25, %v8303_v27  ;;  %v2158_v60 = vadd.f32 %v2157_v2, %v6210_v28  ;;  %v2081_v14 = vrot.slane %v2080_v26, 4  ;;  %v2171_v37 = vadd.f32 %v2170_v12, %v6214_v46 }
 0x2cd   :  { %v2094_v22 = vrot.slane %v2093_v54, 4  ;;  %v2107_v38 = vrot.slane %v2106_v13, 4  ;;  %v2120_v23 = vrot.slane %v2119_v57, 4  ;;  %v2133_v41 = vrot.slane %v2132_v62, 4 }
 0x2ce   :  { %v2146_v4 = vrot.slane %v2145_v0, 4  ;;  %v2159_v49 = vrot.slane %v2158_v60, 4  ;;  %v2082_v10 = vadd.f32 %v2081_v14, %v2080_v26  ;;  %v2172_v18 = vrot.slane %v2171_v37, 4 }
 0x2cf   :  { %v2095_v19 = vadd.f32 %v2094_v22, %v2093_v54  ;;  %v2108_v35 = vadd.f32 %v2107_v38, %v2106_v13  ;;  %v2121_v58 = vadd.f32 %v2120_v23, %v2119_v57  ;;  %v2134_v50 = vadd.f32 %v2133_v41, %v2132_v62  ;;  %v8304_v62 = vld [vmem:[#allocation184_spill] sm:$0xff]  ;;  %v2234_v41 = vld [vmem:[#allocation9 + $0x8] sm:$0xf] }
 0x2d0   :  { %v2147_v32 = vadd.f32 %v2146_v4, %v2145_v0  ;;  %v2160_v63 = vadd.f32 %v2159_v49, %v2158_v60  ;;  %v2083_v43 = vrot.slane %v2082_v10, 2  ;;  %v2173_v48 = vadd.f32 %v2172_v18, %v2171_v37  ;;  %v2233_v4 = vld [vmem:[#allocation9] sm:$0xff] }
 0x2d1   :  { %v2096_v7 = vrot.slane %v2095_v19, 2  ;;  %v2109_v28 = vrot.slane %v2108_v35, 2  ;;  %v2122_v11 = vrot.slane %v2121_v58, 2  ;;  %v2135_v36 = vrot.slane %v2134_v50, 2 }
 0x2d2   :  { %v2148_v16 = vrot.slane %v2147_v32, 2  ;;  %v2161_v46 = vrot.slane %v2160_v63, 2  ;;  %v2084_v6 = vadd.f32 %v2083_v43, %v2082_v10  ;;  %v2174_v40 = vrot.slane %v2173_v48, 2 }
 0x2d3   :  { %v2097_v47 = vadd.f32 %v2096_v7, %v2095_v19  ;;  %v2110_v33 = vadd.f32 %v2109_v28, %v2108_v35  ;;  %v2123_v52 = vadd.f32 %v2122_v11, %v2121_v58  ;;  %v2136_v1 = vadd.f32 %v2135_v36, %v2134_v50 }
 0x2d4   :  { %v2149_v24 = vadd.f32 %v2148_v16, %v2147_v32  ;;  %v2162_v31 = vadd.f32 %v2161_v46, %v2160_v63  ;;  %v2085_v42 = vrot.slane %v2084_v6, 1  ;;  %v2175_v51 = vadd.f32 %v2174_v40, %v2173_v48 }
 0x2d5   :  { %v2098_v34 = vrot.slane %v2097_v47, 1  ;;  %v2111_v55 = vrot.slane %v2110_v33, 1  ;;  %v2124_v44 = vrot.slane %v2123_v52, 1  ;;  %v2137_v25 = vrot.slane %v2136_v1, 1 }
 0x2d6   :  { %v2150_v2 = vrot.slane %v2149_v24, 1  ;;  %v2163_v8 = vrot.slane %v2162_v31, 1  ;;  %v2060_v26 = vadd.f32 %v2059_v45, %v6204_v30  ;;  %v2073_v29 = vadd.f32 %v2072_v56, %v6206_v53 }
 0x2d7   :  { %v2176_v54 = vrot.slane %v2175_v51, 1  ;;  %v2086_v17 = vadd.f32 %v2085_v42, %v2084_v6  ;;  %v2099_v13 = vadd.f32 %v2098_v34, %v2097_v47  ;;  %v2112_v39 = vadd.f32 %v2111_v55, %v2110_v33 }
 0x2d8   :  { %v2125_v12 = vadd.f32 %v2124_v44, %v2123_v52  ;;  %v2138_v5 = vadd.f32 %v2137_v25, %v2136_v1  ;;  %v2194_v57 = vsel %vm742_vm0, %v6221_v20, %v6216_v21  ;;  %v2201_v61 = vsel %vm742_vm0, %v6223_v9, %v6218_v15 }
 0x2d9   :  { %v2213_v30 = vmul.f32 0.00390625, %v8304_v62  ;;  %v2151_v45 = vadd.f32 %v2150_v2, %v2149_v24  ;;  %v2164_v27 = vadd.f32 %v2163_v8, %v2162_v31  ;;  %v2195_v53 = vsel %vm744_vm1, %v6225_v59, %v2194_v57 }
 0x2da   :  { %v2202_v56 = vsel %vm744_vm1, %v6228_v3, %v2201_v61  ;;  %v2177_v0 = vadd.f32 %v2176_v54, %v2175_v51  ;;  %v2196_v60 = vsel %vm746_vm2, %v2060_v26, %v2195_v53  ;;  %v2324_v49 = vadd.f32 1e-05, %v2234_v41 }
 0x2db   :  { %v2203_v14 = vsel %vm746_vm2, %v2073_v29, %v2202_v56  ;;  %2368 = vlog2.f32 %v2213_v30  ;;  %v2197_v21 = vsel %vm748_vm3, %v2086_v17, %v2196_v60  ;;  %v2256_v35 = vadd.f32 1e-05, %v2233_v4 }
 0x2dc   :  { %v2204_v15 = vsel %vm748_vm3, %v2099_v13, %v2203_v14  ;;  %v2198_v20 = vsel %vm750_vm4, %v2112_v39, %v2197_v21  ;;  %v2236_v32 = vlaneseq }
 0x2dd   :  { %v2205_v9 = vsel %vm750_vm4, %v2125_v12, %v2204_v15  ;;  %v2199_v22 = vsel %vm752_vm5, %v2138_v5, %v2198_v20 }
 0x2de   :  { %v2206_v59 = vsel %vm752_vm5, %v2151_v45, %v2205_v9  ;;  %v2200_v3 = vsel %vm754_vm6, %v2164_v27, %v2199_v22  ;;  %v2237_v11 = vshrl.u32 %v2236_v32, 7 }
 0x2df   :  { %v2207_v38 = vsel %vm754_vm6, %v2177_v0, %v2206_v59  ;;  %v2221_v37 = vmul.f32 0.015625, %v2200_v3 }
 0x2e0   :  { %v2222_v23 = vmul.f32 0.015625, %v2207_v38  ;;  %v2238_v46 = vsub.s32 2, %v2237_v11  ;;  %v2242_v47 = vsub.s32 6, %v2237_v11  ;;  %v2261_v33 = vsub.s32 3, %v2237_v11 }
 0x2e1   :  { %2370 = vlog2.f32 %v2221_v37  ;;  %v2265_v1 = vsub.s32 7, %v2237_v11  ;;  %v2281_v24 = vsub.s32 0, %v2237_v11  ;;  %v2285_v51 = vsub.s32 4, %v2237_v11 }
 0x2e2   :  { %2372 = vlog2.f32 %v2222_v23  ;;  %v2322_v40 = vrot.slane %v2234_v41, %v2238_v46  ;;  %v2239_v34 = vrot.slane %v2233_v4, %v2238_v46  ;;  %v2243_v55 = vrot.slane %v2233_v4, %v2242_v47 }
 0x2e3   :  { %2374 = vrsqrt.f32 %v2324_v49  ;;  %v2301_v44 = vsub.s32 1, %v2237_v11  ;;  %v2334_v2 = vrot.slane %v2234_v41, %v2281_v24  ;;  %v2305_v29 = vsub.s32 5, %v2237_v11 }
 0x2e4   :  { %2376 = vrsqrt.f32 %v2256_v35  ;;  %v2249_v13 = vrot.slane %v2239_v34, %v2238_v46  ;;  %v2282_v39 = vrot.slane %v2233_v4, %v2281_v24  ;;  %v2253_v12 = vrot.slane %v2243_v55, %v2238_v46 }
 0x2e5   :  { %v2339_v17 = vrot.slane %v2234_v41, %v2301_v44  ;;  %v2286_v5 = vrot.slane %v2233_v4, %v2285_v51  ;;  %v2302_v62 = vrot.slane %v2233_v4, %v2301_v44  ;;  %v2306_v27 = vrot.slane %v2233_v4, %v2305_v29 }
 0x2e6   :  { %v2292_v60 = vrot.slane %v2282_v39, %v2281_v24 }
 0x2e7   :  { %v2296_v21 = vrot.slane %v2286_v5, %v2281_v24  ;;  %v2312_v20 = vrot.slane %v2302_v62, %v2301_v44  ;;  %v2316_v22 = vrot.slane %v2306_v27, %v2301_v44 }
 0x2e8   :  { %v2369_v10 = vpop.eup %2368 }
 0x2e9   :  { %v2215_v19 = vmul.f32 0.6931472, %v2369_v10 }
 0x2eb   :  { %v2216_v18 = vmul.f32 0.33333334, %v2215_v19 }
 0x2ed   :  { %v2217_v58 = vmul.f32 1.442695, %v2216_v18 }
 0x2ee   :  { %v2371_v50 = vpop.eup %2370 }
 0x2ef   :  { %2378 = vpow2.f32 %v2217_v58  ;;  %v2373_v63 = vpop.eup %2372  ;;  %v2224_v43 = vmul.f32 0.6931472, %v2371_v50 }
 0x2f0   :  { %v2226_v7 = vmul.f32 0.6931472, %v2373_v63  ;;  %v2375_v6 = vpop.eup %2374 }
 0x2f1   :  { %v2227_v28 = vmul.f32 0.33333334, %v2224_v43  ;;  %v2377_v52 = vpop.eup %2376  ;;  %v2329_v31 = vrot.slane %v2375_v6, %v2261_v33 }
 0x2f2   :  { %v2228_v48 = vmul.f32 0.33333334, %v2226_v7  ;;  %v2262_v8 = vrot.slane %v2377_v52, %v2261_v33  ;;  %v2266_v26 = vrot.slane %v2377_v52, %v2265_v1 }
 0x2f3   :  { %v2229_v36 = vmul.f32 1.442695, %v2227_v28 }
 0x2f4   :  { %v2231_v16 = vmul.f32 1.442695, %v2228_v48  ;;  %v2272_v61 = vrot.slane %v2262_v8, %v2261_v33  ;;  %v2276_v45 = vrot.slane %v2266_v26, %v2261_v33 }
 0x2f5   :  { %2380 = vpow2.f32 %v2229_v36 }
 0x2f6   :  { %2382 = vpow2.f32 %v2231_v16 }
 0x2fc   :  { %v2379_v42 = vpop.eup %2378 }
 0x2fd   :  { %v2323_v25 = vsub.f32 %v2379_v42, %v2322_v40 }
 0x2ff   :  { %v2330_v54 = vmul.f32 %v2329_v31, %v2323_v25 }
 0x301   :  { %v2335_v57 = vmul.f32 %v2334_v2, %v2330_v54 }
 0x302   :  { %v2381_v30 = vpop.eup %2380 }
 0x303   :  { %v2340_v53 = vadd.f32 %v2339_v17, %v2335_v57  ;;  %v2383_v56 = vpop.eup %2382  ;;  %v2254_v0 = vsub.f32 %v2381_v30, %v2249_v13 }
 0x304   :  { %v2255_v14 = vsub.f32 %v2383_v56, %v2253_v12 }
 0x305   :  { %2343 = vst [vmem:[#allocation10 + $0x10] sm:$0xff] %v2340_v53  ;;  %v2277_v15 = vmul.f32 %v2272_v61, %v2254_v0 }
 0x306   :  { %v2278_v9 = vmul.f32 %v2276_v45, %v2255_v14 }
 0x307   :  { %v2297_v59 = vmul.f32 %v2292_v60, %v2277_v15 }
 0x308   :  { %v2298_v3 = vmul.f32 %v2296_v21, %v2278_v9 }
 0x309   :  { %v2317_v38 = vadd.f32 %v2312_v20, %v2297_v59 }
 0x30a   :  { %v2318_v37 = vadd.f32 %v2316_v22, %v2298_v3 }
 0x30b   :  { %2341 = vst [vmem:[#allocation10] sm:$0xff] %v2317_v38 }
 0x30c   :  { %2342 = vst [vmem:[#allocation10 + $0x8] sm:$0xff] %v2318_v37 }
 0x30d   :  { %2455 = shalt.err (!%p2452_p5)
}
 0x30e   :  { %2353 = dma.vmem_to_hbm [thread:$0]  %s2351_s2, 384, %s6327_s3, [#allocation6]  }
 0x30f   :  { %2468 = dma.done.wait [#allocation6], 384  }
 0x310   :  { %2469 = vsyncadd [#allocation6], 4294966912 }
 0x311   :  { %2357 = vsyncpa [#allocation5], 1 }
 0x312   :  { %2358 = vsyncpa [#allocation8], 1 }
 0x313   :  { %2359 = vsyncpa [#allocation6], 1 }

</bundles_post_ra>
